<compile_context>
chip_gen: v6e
topology: v6e:2x2x1
jax: 0.10.0
libtpu: 0.0.40
codegen_flags: <defaults>
</compile_context>

<pallas_src>
import functools

import jax
import jax.numpy as jnp
from jax import lax
from jax.experimental import pallas as pl
from jax.experimental.pallas import tpu as pltpu

EPS = 1e-5


def fused_kernel(x_ref, w1_ref, gamma_ref, beta_ref, w2r_ref, out_ref, *, H, W):
    # x_ref:     (Cin, HW)      -- free reshape of NCHW input (N == 1)
    # w1_ref:    (Cmid, Cin)    -- free reshape of the (Cmid, Cin, 1, 1) weight
    # gamma/beta:(Cmid, 1)
    # w2r_ref:   (9*Cout, Cmid) -- tap-major kn2row weight
    # out_ref:   (Cout, HW)     -- already NCHW-ordered
    HW = H * W
    Cout = out_ref.shape[0]

    # relu158 + conv2d158 (1x1, no bias): standard (Cmid, Cin) @ (Cin, HW) matmul.
    x = jnp.maximum(x_ref[...], 0.0)
    y = jnp.dot(w1_ref[...], x, preferred_element_type=jnp.float32)      # (Cmid, HW)

    # batchnorm2d159: training-mode batch statistics (biased variance), with the
    # affine folded into a single scale/shift; then relu159.
    mean = jnp.mean(y, axis=1, keepdims=True)                            # (Cmid, 1)
    d = y - mean
    var = jnp.mean(d * d, axis=1, keepdims=True)                         # (Cmid, 1)
    s = gamma_ref[...] * lax.rsqrt(var + EPS)                            # (Cmid, 1)
    b = beta_ref[...] - mean * s                                         # (Cmid, 1)
    z = jnp.maximum(y * s + b, 0.0)                                      # (Cmid, HW)

    # conv2d159 (3x3, stride 1, pad 1, no bias) via kn2row:
    # one wide matmul, then nine zero-filled flat shifts accumulated.
    t = jnp.dot(w2r_ref[...], z, preferred_element_type=jnp.float32)     # (9*Cout, HW)

    col = lax.broadcasted_iota(jnp.int32, (1, HW), 1) % W                # dest column

    acc = jnp.zeros((Cout, HW), dtype=jnp.float32)
    for dh in range(3):
        for dw in range(3):
            k = dh * 3 + dw
            oh, ow = dh - 1, dw - 1
            shift = oh * W + ow
            tk = t[k * Cout:(k + 1) * Cout, :]                           # (Cout, HW)
            # out[:, p] += tk[:, p + shift] with zeros outside the flat range
            if shift > 0:
                pad = jnp.zeros((Cout, shift), dtype=jnp.float32)
                tk = jnp.concatenate([tk[:, shift:], pad], axis=1)
            elif shift < 0:
                pad = jnp.zeros((Cout, -shift), dtype=jnp.float32)
                tk = jnp.concatenate([pad, tk[:, :HW + shift]], axis=1)
            if ow != 0:
                # Width-boundary mask (row wrap). The height bound is exactly the
                # flat out-of-range case, already handled by the zero fill above.
                valid = jnp.logical_and(col + ow >= 0, col + ow < W)
                tk = jnp.where(valid, tk, 0.0)
            acc = acc + tk

    out_ref[...] = acc


@jax.jit
def forward(x_nchw, w1_oihw, gamma, beta, w2_oihw):
    """x_nchw: (1, 2160, H, W) -> (1, 48, H, W), matching M.forward semantics."""
    N, Cin, H, W = x_nchw.shape
    Cmid = w1_oihw.shape[0]
    Cout = w2_oihw.shape[0]
    assert N == 1, "kernel specialized for the module's batch size of 1"
    # TODO(synk): N > 1 would need a batched layout / grid; not needed for this module.
    HW = H * W

    x2d = x_nchw.reshape(Cin, HW)                         # free reshape (N == 1)
    w1 = w1_oihw.reshape(Cmid, Cin)                       # free reshape (1x1 kernel)
    # kn2row weight (tiny, ~331 KB): (kh, kw, Cout, Cmid) flattened tap-major.
    w2r = jnp.transpose(w2_oihw, (2, 3, 0, 1)).reshape(9 * Cout, Cmid)

    out2d = pl.pallas_call(
        functools.partial(fused_kernel, H=H, W=W),
        out_shape=jax.ShapeDtypeStruct((Cout, HW), jnp.float32),
        in_specs=[pl.BlockSpec(memory_space=pltpu.MemorySpace.VMEM)] * 5,
        out_specs=pl.BlockSpec(memory_space=pltpu.MemorySpace.VMEM),
    )(x2d, w1, gamma.reshape(Cmid, 1), beta.reshape(Cmid, 1), w2r)

    return out2d.reshape(N, Cout, H, W)                   # free reshape back to NCHW


def _reference(x_nchw, w1_oihw, gamma, beta, w2_oihw):
    # Pure-JAX reference with identical semantics for a correctness check.
    x = jnp.maximum(x_nchw, 0.0)
    y = jax.lax.conv_general_dilated(x, w1_oihw, (1, 1), "VALID",
                                     dimension_numbers=("NCHW", "OIHW", "NCHW"),
                                     precision=lax.Precision.HIGHEST)
    mean = jnp.mean(y, axis=(0, 2, 3), keepdims=True)
    var = jnp.mean((y - mean) ** 2, axis=(0, 2, 3), keepdims=True)
    z = (y - mean) * jax.lax.rsqrt(var + EPS)
    z = z * gamma.reshape(1, -1, 1, 1) + beta.reshape(1, -1, 1, 1)
    z = jnp.maximum(z, 0.0)
    return jax.lax.conv_general_dilated(z, w2_oihw, (1, 1), ((1, 1), (1, 1)),
                                        dimension_numbers=("NCHW", "OIHW", "NCHW"),
                                        precision=lax.Precision.HIGHEST)


if __name__ == "__main__":
    N, Cin, H, W = 1, 2160, 7, 7
    Cmid, Cout = 192, 48

    key = jax.random.PRNGKey(0)
    kx, kw1, kw2, kg, kb = jax.random.split(key, 5)

    x = jax.random.normal(kx, (N, Cin, H, W), dtype=jnp.float32)
    w1 = jax.random.normal(kw1, (Cmid, Cin, 1, 1), dtype=jnp.float32) * 0.02
    w2 = jax.random.normal(kw2, (Cout, Cmid, 3, 3), dtype=jnp.float32) * 0.05
    gamma = 1.0 + 0.1 * jax.random.normal(kg, (Cmid,), dtype=jnp.float32)
    beta = 0.1 * jax.random.normal(kb, (Cmid,), dtype=jnp.float32)

    out = jax.block_until_ready(forward(x, w1, gamma, beta, w2))
    ref = jax.block_until_ready(_reference(x, w1, gamma, beta, w2))

    assert out.shape == (N, Cout, H, W)
    err = float(jnp.max(jnp.abs(out - ref)))
    assert jnp.allclose(out, ref, atol=2e-3, rtol=2e-3), err

    print("KERNEL_OK")
</pallas_src>

<mosaic_0001>
module attributes {stable_mosaic.version = 11 : i64} {
  func.func @fused_kernel(%arg0: memref<2160x49xf32, #tpu.memory_space<vmem>>, %arg1: memref<192x2160xf32, #tpu.memory_space<vmem>>, %arg2: memref<192x1xf32, #tpu.memory_space<vmem>>, %arg3: memref<192x1xf32, #tpu.memory_space<vmem>>, %arg4: memref<432x192xf32, #tpu.memory_space<vmem>>, %arg5: memref<48x49xf32, #tpu.memory_space<vmem>>) attributes {dimension_semantics = [], scalar_prefetch = 0 : i64, scratch_operands = 0 : i64, tpu.core_type = #tpu.core_type<tc>} {
    %c0 = arith.constant 0 : index
    %c0_0 = arith.constant 0 : index
    %0 = vector.load %arg0[%c0, %c0_0] : memref<2160x49xf32, #tpu.memory_space<vmem>>, vector<2160x49xf32>
    %cst = arith.constant 0.000000e+00 : f32
    %1 = vector.broadcast %cst : f32 to vector<2160x49xf32>
    %2 = arith.maximumf %0, %1 : vector<2160x49xf32>
    %c0_1 = arith.constant 0 : index
    %c0_2 = arith.constant 0 : index
    %3 = vector.load %arg1[%c0_1, %c0_2] : memref<192x2160xf32, #tpu.memory_space<vmem>>, vector<192x2160xf32>
    %cst_3 = arith.constant dense<0.000000e+00> : vector<192x49xf32>
    %4 = tpu.matmul %3, %2, %cst_3 {dimension_numbers = #tpu.dot_dimension_numbers<[1], [0], [0], [1], [0, 0, 1, 1], [], []>} : vector<192x2160xf32>, vector<2160x49xf32>, vector<192x49xf32> -> vector<192x49xf32>
    %cst_4 = arith.constant dense<0.000000e+00> : vector<192xf32>
    %5 = vector.multi_reduction <add>, %4, %cst_4 [1] : vector<192x49xf32> to vector<192xf32>
    %6 = vector.shape_cast %5 : vector<192xf32> to vector<192x1xf32>
    %cst_5 = arith.constant 4.900000e+01 : f32
    %7 = vector.broadcast %cst_5 : f32 to vector<192x1xf32>
    %8 = arith.divf %6, %7 : vector<192x1xf32>
    %9 = vector.broadcast %8 : vector<192x1xf32> to vector<192x49xf32>
    %10 = arith.subf %4, %9 : vector<192x49xf32>
    %11 = arith.mulf %10, %10 : vector<192x49xf32>
    %cst_6 = arith.constant dense<0.000000e+00> : vector<192xf32>
    %12 = vector.multi_reduction <add>, %11, %cst_6 [1] : vector<192x49xf32> to vector<192xf32>
    %13 = vector.shape_cast %12 : vector<192xf32> to vector<192x1xf32>
    %cst_7 = arith.constant 4.900000e+01 : f32
    %14 = vector.broadcast %cst_7 : f32 to vector<192x1xf32>
    %15 = arith.divf %13, %14 : vector<192x1xf32>
    %c0_8 = arith.constant 0 : index
    %c0_9 = arith.constant 0 : index
    %16 = vector.load %arg2[%c0_8, %c0_9] : memref<192x1xf32, #tpu.memory_space<vmem>>, vector<192x1xf32>
    %cst_10 = arith.constant 9.99999974E-6 : f32
    %17 = vector.broadcast %cst_10 : f32 to vector<192x1xf32>
    %18 = arith.addf %15, %17 : vector<192x1xf32>
    %19 = math.rsqrt %18 : vector<192x1xf32>
    %20 = arith.mulf %16, %19 : vector<192x1xf32>
    %c0_11 = arith.constant 0 : index
    %c0_12 = arith.constant 0 : index
    %21 = vector.load %arg3[%c0_11, %c0_12] : memref<192x1xf32, #tpu.memory_space<vmem>>, vector<192x1xf32>
    %22 = arith.mulf %8, %20 : vector<192x1xf32>
    %23 = arith.subf %21, %22 : vector<192x1xf32>
    %24 = vector.broadcast %20 : vector<192x1xf32> to vector<192x49xf32>
    %25 = arith.mulf %4, %24 : vector<192x49xf32>
    %26 = vector.broadcast %23 : vector<192x1xf32> to vector<192x49xf32>
    %27 = arith.addf %25, %26 : vector<192x49xf32>
    %cst_13 = arith.constant 0.000000e+00 : f32
    %28 = vector.broadcast %cst_13 : f32 to vector<192x49xf32>
    %29 = arith.maximumf %27, %28 : vector<192x49xf32>
    %c0_14 = arith.constant 0 : index
    %c0_15 = arith.constant 0 : index
    %30 = vector.load %arg4[%c0_14, %c0_15] : memref<432x192xf32, #tpu.memory_space<vmem>>, vector<432x192xf32>
    %cst_16 = arith.constant dense<0.000000e+00> : vector<432x49xf32>
    %31 = tpu.matmul %30, %29, %cst_16 {dimension_numbers = #tpu.dot_dimension_numbers<[1], [0], [0], [1], [0, 0, 1, 1], [], []>} : vector<432x192xf32>, vector<192x49xf32>, vector<432x49xf32> -> vector<432x49xf32>
    %32 = tpu.iota {dimensions = array<i32: 1>} : vector<1x49xi32>
    %c7_i32 = arith.constant 7 : i32
    %c0_i32 = arith.constant 0 : i32
    %33 = arith.cmpi eq, %c7_i32, %c0_i32 : i32
    %c1_i32 = arith.constant 1 : i32
    %34 = arith.select %33, %c1_i32, %c7_i32 : i32
    %35 = vector.broadcast %34 : i32 to vector<1x49xi32>
    %36 = arith.remsi %32, %35 : vector<1x49xi32>
    %c0_i32_17 = arith.constant 0 : i32
    %37 = vector.broadcast %c0_i32_17 : i32 to vector<1x49xi32>
    %38 = arith.cmpi ne, %36, %37 : vector<1x49xi32>
    %c0_i32_18 = arith.constant 0 : i32
    %39 = vector.broadcast %c0_i32_18 : i32 to vector<1x49xi32>
    %40 = arith.cmpi slt, %36, %39 : vector<1x49xi32>
    %c0_i32_19 = arith.constant 0 : i32
    %41 = arith.cmpi slt, %34, %c0_i32_19 : i32
    %42 = vector.broadcast %41 : i1 to vector<1x49xi1>
    %43 = vector.broadcast %42 : vector<1x49xi1> to vector<1x49xi1>
    %44 = arith.xori %40, %43 : vector<1x49xi1>
    %45 = arith.andi %44, %38 : vector<1x49xi1>
    %46 = vector.broadcast %34 : i32 to vector<1x49xi32>
    %47 = arith.addi %36, %46 : vector<1x49xi32>
    %48 = arith.select %45, %47, %36 : vector<1x49xi1>, vector<1x49xi32>
    %cst_20 = arith.constant 0.000000e+00 : f32
    %49 = vector.broadcast %cst_20 : f32 to vector<48x49xf32>
    %50 = vector.extract_strided_slice %31 {offsets = [0, 0], sizes = [48, 49], strides = [1, 1]} : vector<432x49xf32> to vector<48x49xf32>
    %cst_21 = arith.constant 0.000000e+00 : f32
    %51 = vector.broadcast %cst_21 : f32 to vector<48x8xf32>
    %52 = vector.extract_strided_slice %50 {offsets = [0, 0], sizes = [48, 41], strides = [1, 1]} : vector<48x49xf32> to vector<48x41xf32>
    %53 = tpu.concatenate %51, %52 in 1 : vector<48x8xf32>, vector<48x41xf32> -> vector<48x49xf32>
    %c-1_i32 = arith.constant -1 : i32
    %54 = vector.broadcast %c-1_i32 : i32 to vector<1x49xi32>
    %55 = arith.addi %48, %54 : vector<1x49xi32>
    %c0_i32_22 = arith.constant 0 : i32
    %56 = vector.broadcast %c0_i32_22 : i32 to vector<1x49xi32>
    %57 = arith.cmpi sge, %55, %56 : vector<1x49xi32>
    %c-1_i32_23 = arith.constant -1 : i32
    %58 = vector.broadcast %c-1_i32_23 : i32 to vector<1x49xi32>
    %59 = arith.addi %48, %58 : vector<1x49xi32>
    %c7_i32_24 = arith.constant 7 : i32
    %60 = vector.broadcast %c7_i32_24 : i32 to vector<1x49xi32>
    %61 = arith.cmpi slt, %59, %60 : vector<1x49xi32>
    %62 = arith.andi %57, %61 : vector<1x49xi1>
    %cst_25 = arith.constant 0.000000e+00 : f32
    %63 = vector.shape_cast %62 : vector<1x49xi1> to vector<1x49xi1>
    %64 = vector.broadcast %63 : vector<1x49xi1> to vector<48x49xi1>
    %65 = vector.broadcast %cst_25 : f32 to vector<48x49xf32>
    %66 = arith.select %64, %53, %65 : vector<48x49xi1>, vector<48x49xf32>
    %67 = arith.addf %49, %66 : vector<48x49xf32>
    %68 = vector.extract_strided_slice %31 {offsets = [48, 0], sizes = [48, 49], strides = [1, 1]} : vector<432x49xf32> to vector<48x49xf32>
    %cst_26 = arith.constant 0.000000e+00 : f32
    %69 = vector.broadcast %cst_26 : f32 to vector<48x7xf32>
    %70 = vector.extract_strided_slice %68 {offsets = [0, 0], sizes = [48, 42], strides = [1, 1]} : vector<48x49xf32> to vector<48x42xf32>
    %71 = tpu.concatenate %69, %70 in 1 : vector<48x7xf32>, vector<48x42xf32> -> vector<48x49xf32>
    %72 = arith.addf %67, %71 : vector<48x49xf32>
    %73 = vector.extract_strided_slice %31 {offsets = [96, 0], sizes = [48, 49], strides = [1, 1]} : vector<432x49xf32> to vector<48x49xf32>
    %cst_27 = arith.constant 0.000000e+00 : f32
    %74 = vector.broadcast %cst_27 : f32 to vector<48x6xf32>
    %75 = vector.extract_strided_slice %73 {offsets = [0, 0], sizes = [48, 43], strides = [1, 1]} : vector<48x49xf32> to vector<48x43xf32>
    %76 = tpu.concatenate %74, %75 in 1 : vector<48x6xf32>, vector<48x43xf32> -> vector<48x49xf32>
    %c1_i32_28 = arith.constant 1 : i32
    %77 = vector.broadcast %c1_i32_28 : i32 to vector<1x49xi32>
    %78 = arith.addi %48, %77 : vector<1x49xi32>
    %c0_i32_29 = arith.constant 0 : i32
    %79 = vector.broadcast %c0_i32_29 : i32 to vector<1x49xi32>
    %80 = arith.cmpi sge, %78, %79 : vector<1x49xi32>
    %c1_i32_30 = arith.constant 1 : i32
    %81 = vector.broadcast %c1_i32_30 : i32 to vector<1x49xi32>
    %82 = arith.addi %48, %81 : vector<1x49xi32>
    %c7_i32_31 = arith.constant 7 : i32
    %83 = vector.broadcast %c7_i32_31 : i32 to vector<1x49xi32>
    %84 = arith.cmpi slt, %82, %83 : vector<1x49xi32>
    %85 = arith.andi %80, %84 : vector<1x49xi1>
    %cst_32 = arith.constant 0.000000e+00 : f32
    %86 = vector.shape_cast %85 : vector<1x49xi1> to vector<1x49xi1>
    %87 = vector.broadcast %86 : vector<1x49xi1> to vector<48x49xi1>
    %88 = vector.broadcast %cst_32 : f32 to vector<48x49xf32>
    %89 = arith.select %87, %76, %88 : vector<48x49xi1>, vector<48x49xf32>
    %90 = arith.addf %72, %89 : vector<48x49xf32>
    %91 = vector.extract_strided_slice %31 {offsets = [144, 0], sizes = [48, 49], strides = [1, 1]} : vector<432x49xf32> to vector<48x49xf32>
    %cst_33 = arith.constant 0.000000e+00 : f32
    %92 = vector.broadcast %cst_33 : f32 to vector<48x1xf32>
    %93 = vector.extract_strided_slice %91 {offsets = [0, 0], sizes = [48, 48], strides = [1, 1]} : vector<48x49xf32> to vector<48x48xf32>
    %94 = tpu.concatenate %92, %93 in 1 : vector<48x1xf32>, vector<48x48xf32> -> vector<48x49xf32>
    %c-1_i32_34 = arith.constant -1 : i32
    %95 = vector.broadcast %c-1_i32_34 : i32 to vector<1x49xi32>
    %96 = arith.addi %48, %95 : vector<1x49xi32>
    %c0_i32_35 = arith.constant 0 : i32
    %97 = vector.broadcast %c0_i32_35 : i32 to vector<1x49xi32>
    %98 = arith.cmpi sge, %96, %97 : vector<1x49xi32>
    %c-1_i32_36 = arith.constant -1 : i32
    %99 = vector.broadcast %c-1_i32_36 : i32 to vector<1x49xi32>
    %100 = arith.addi %48, %99 : vector<1x49xi32>
    %c7_i32_37 = arith.constant 7 : i32
    %101 = vector.broadcast %c7_i32_37 : i32 to vector<1x49xi32>
    %102 = arith.cmpi slt, %100, %101 : vector<1x49xi32>
    %103 = arith.andi %98, %102 : vector<1x49xi1>
    %cst_38 = arith.constant 0.000000e+00 : f32
    %104 = vector.shape_cast %103 : vector<1x49xi1> to vector<1x49xi1>
    %105 = vector.broadcast %104 : vector<1x49xi1> to vector<48x49xi1>
    %106 = vector.broadcast %cst_38 : f32 to vector<48x49xf32>
    %107 = arith.select %105, %94, %106 : vector<48x49xi1>, vector<48x49xf32>
    %108 = arith.addf %90, %107 : vector<48x49xf32>
    %109 = vector.extract_strided_slice %31 {offsets = [192, 0], sizes = [48, 49], strides = [1, 1]} : vector<432x49xf32> to vector<48x49xf32>
    %110 = arith.addf %108, %109 : vector<48x49xf32>
    %111 = vector.extract_strided_slice %31 {offsets = [240, 0], sizes = [48, 49], strides = [1, 1]} : vector<432x49xf32> to vector<48x49xf32>
    %cst_39 = arith.constant 0.000000e+00 : f32
    %112 = vector.broadcast %cst_39 : f32 to vector<48x1xf32>
    %113 = vector.extract_strided_slice %111 {offsets = [0, 1], sizes = [48, 48], strides = [1, 1]} : vector<48x49xf32> to vector<48x48xf32>
    %114 = tpu.concatenate %113, %112 in 1 : vector<48x48xf32>, vector<48x1xf32> -> vector<48x49xf32>
    %c1_i32_40 = arith.constant 1 : i32
    %115 = vector.broadcast %c1_i32_40 : i32 to vector<1x49xi32>
    %116 = arith.addi %48, %115 : vector<1x49xi32>
    %c0_i32_41 = arith.constant 0 : i32
    %117 = vector.broadcast %c0_i32_41 : i32 to vector<1x49xi32>
    %118 = arith.cmpi sge, %116, %117 : vector<1x49xi32>
    %c1_i32_42 = arith.constant 1 : i32
    %119 = vector.broadcast %c1_i32_42 : i32 to vector<1x49xi32>
    %120 = arith.addi %48, %119 : vector<1x49xi32>
    %c7_i32_43 = arith.constant 7 : i32
    %121 = vector.broadcast %c7_i32_43 : i32 to vector<1x49xi32>
    %122 = arith.cmpi slt, %120, %121 : vector<1x49xi32>
    %123 = arith.andi %118, %122 : vector<1x49xi1>
    %cst_44 = arith.constant 0.000000e+00 : f32
    %124 = vector.shape_cast %123 : vector<1x49xi1> to vector<1x49xi1>
    %125 = vector.broadcast %124 : vector<1x49xi1> to vector<48x49xi1>
    %126 = vector.broadcast %cst_44 : f32 to vector<48x49xf32>
    %127 = arith.select %125, %114, %126 : vector<48x49xi1>, vector<48x49xf32>
    %128 = arith.addf %110, %127 : vector<48x49xf32>
    %129 = vector.extract_strided_slice %31 {offsets = [288, 0], sizes = [48, 49], strides = [1, 1]} : vector<432x49xf32> to vector<48x49xf32>
    %cst_45 = arith.constant 0.000000e+00 : f32
    %130 = vector.broadcast %cst_45 : f32 to vector<48x6xf32>
    %131 = vector.extract_strided_slice %129 {offsets = [0, 6], sizes = [48, 43], strides = [1, 1]} : vector<48x49xf32> to vector<48x43xf32>
    %132 = tpu.concatenate %131, %130 in 1 : vector<48x43xf32>, vector<48x6xf32> -> vector<48x49xf32>
    %c-1_i32_46 = arith.constant -1 : i32
    %133 = vector.broadcast %c-1_i32_46 : i32 to vector<1x49xi32>
    %134 = arith.addi %48, %133 : vector<1x49xi32>
    %c0_i32_47 = arith.constant 0 : i32
    %135 = vector.broadcast %c0_i32_47 : i32 to vector<1x49xi32>
    %136 = arith.cmpi sge, %134, %135 : vector<1x49xi32>
    %c-1_i32_48 = arith.constant -1 : i32
    %137 = vector.broadcast %c-1_i32_48 : i32 to vector<1x49xi32>
    %138 = arith.addi %48, %137 : vector<1x49xi32>
    %c7_i32_49 = arith.constant 7 : i32
    %139 = vector.broadcast %c7_i32_49 : i32 to vector<1x49xi32>
    %140 = arith.cmpi slt, %138, %139 : vector<1x49xi32>
    %141 = arith.andi %136, %140 : vector<1x49xi1>
    %cst_50 = arith.constant 0.000000e+00 : f32
    %142 = vector.shape_cast %141 : vector<1x49xi1> to vector<1x49xi1>
    %143 = vector.broadcast %142 : vector<1x49xi1> to vector<48x49xi1>
    %144 = vector.broadcast %cst_50 : f32 to vector<48x49xf32>
    %145 = arith.select %143, %132, %144 : vector<48x49xi1>, vector<48x49xf32>
    %146 = arith.addf %128, %145 : vector<48x49xf32>
    %147 = vector.extract_strided_slice %31 {offsets = [336, 0], sizes = [48, 49], strides = [1, 1]} : vector<432x49xf32> to vector<48x49xf32>
    %cst_51 = arith.constant 0.000000e+00 : f32
    %148 = vector.broadcast %cst_51 : f32 to vector<48x7xf32>
    %149 = vector.extract_strided_slice %147 {offsets = [0, 7], sizes = [48, 42], strides = [1, 1]} : vector<48x49xf32> to vector<48x42xf32>
    %150 = tpu.concatenate %149, %148 in 1 : vector<48x42xf32>, vector<48x7xf32> -> vector<48x49xf32>
    %151 = arith.addf %146, %150 : vector<48x49xf32>
    %152 = vector.extract_strided_slice %31 {offsets = [384, 0], sizes = [48, 49], strides = [1, 1]} : vector<432x49xf32> to vector<48x49xf32>
    %cst_52 = arith.constant 0.000000e+00 : f32
    %153 = vector.broadcast %cst_52 : f32 to vector<48x8xf32>
    %154 = vector.extract_strided_slice %152 {offsets = [0, 8], sizes = [48, 41], strides = [1, 1]} : vector<48x49xf32> to vector<48x41xf32>
    %155 = tpu.concatenate %154, %153 in 1 : vector<48x41xf32>, vector<48x8xf32> -> vector<48x49xf32>
    %c1_i32_53 = arith.constant 1 : i32
    %156 = vector.broadcast %c1_i32_53 : i32 to vector<1x49xi32>
    %157 = arith.addi %48, %156 : vector<1x49xi32>
    %c0_i32_54 = arith.constant 0 : i32
    %158 = vector.broadcast %c0_i32_54 : i32 to vector<1x49xi32>
    %159 = arith.cmpi sge, %157, %158 : vector<1x49xi32>
    %c1_i32_55 = arith.constant 1 : i32
    %160 = vector.broadcast %c1_i32_55 : i32 to vector<1x49xi32>
    %161 = arith.addi %48, %160 : vector<1x49xi32>
    %c7_i32_56 = arith.constant 7 : i32
    %162 = vector.broadcast %c7_i32_56 : i32 to vector<1x49xi32>
    %163 = arith.cmpi slt, %161, %162 : vector<1x49xi32>
    %164 = arith.andi %159, %163 : vector<1x49xi1>
    %cst_57 = arith.constant 0.000000e+00 : f32
    %165 = vector.shape_cast %164 : vector<1x49xi1> to vector<1x49xi1>
    %166 = vector.broadcast %165 : vector<1x49xi1> to vector<48x49xi1>
    %167 = vector.broadcast %cst_57 : f32 to vector<48x49xf32>
    %168 = arith.select %166, %155, %167 : vector<48x49xi1>, vector<48x49xf32>
    %169 = arith.addf %151, %168 : vector<48x49xf32>
    %c0_58 = arith.constant 0 : index
    %c0_59 = arith.constant 0 : index
    %170 = vector.load %arg5[%c0_58, %c0_59] : memref<48x49xf32, #tpu.memory_space<vmem>>, vector<48x49xf32>
    tpu.vector_store %arg5[%c0_58, %c0_59], %169 {strides = array<i32>} : memref<48x49xf32, #tpu.memory_space<vmem>>, vector<48x49xf32>,
    return
  }
}

</mosaic_0001>

<bundles_post_ra>
// kernel: forward.1
= control target key start
LH: loop header
LB: loop body
LE: loop exit
PB: predicated region body
PF: predicated region fallthrough
CT: control target
= control target key end

     0   :  { %v8602_v0 = vmov 0.0   ;;  %vm968_vm0 = vcmask 916480   ;;  %vm2706_vm1 = vcmask 400384   ;;  %vm3536_vm2 = vcmask 523264   ;;  %s4707_s16 = smov 1   ;;  %s4710_s17 = smov 127   ;;  %s8595_s0 = inlined_call_operand.vmem [shape: f32[2160,49], index: 0, kind: input, shape index: {}]   ;;  %s8596_s1 = inlined_call_operand.vmem [shape: f32[192,2160], index: 1, kind: input, shape index: {}]   ;;  %s8597_s2 = inlined_call_operand.vmem [shape: f32[192,1], index: 2, kind: input, shape index: {}]   ;;  %s8598_s3 = inlined_call_operand.vmem [shape: f32[192,1], index: 3, kind: input, shape index: {}]   ;;  %s8599_s4 = inlined_call_operand.vmem [shape: f32[432,192], index: 4, kind: input, shape index: {}]   ;;  %s8600_s5 = inlined_call_operand.vmem [shape: f32[48,49], index: 5, kind: output, shape index: {}]  }
   0x1   :  { %1041 = vmatprep.subr.mxu0 %v8602_v0  ;;  %1226 = vmatprep.subr.mxu1 %v8602_v0  ;;  %v35_v1 = vld [vmem:[%s8595_s0 + $0x78] sm:$0xff]  ;;  %v34_v3 = vld [vmem:[%s8595_s0 + $0x70] sm:$0xff]  ;;  %v33_v8 = vld [vmem:[%s8595_s0 + $0x68] sm:$0xff]  ;;  %s4711_s18 = smov 6   ;;  %s4713_s19 = smov 121   ;;  %vm4214_vm9 = vcmask 7168  }
   0x2   :  { %v67_v2 = vld [vmem:[%s8595_s0 + $0x178] sm:$0xff]  ;;  %v305_v4 = vmax.f32 %v35_v1, 0.0  ;;  %v304_v6 = vmax.f32 %v34_v3, 0.0  ;;  %v66_v7 = vld [vmem:[%s8595_s0 + $0x170] sm:$0xff]  ;;  %v65_v9 = vld [vmem:[%s8595_s0 + $0x168] sm:$0xff]  ;;  %v303_v13 = vmax.f32 %v33_v8, 0.0 }
   0x3   :  { %v337_v5 = vmax.f32 %v67_v2, 0.0  ;;  %v336_v10 = vmax.f32 %v66_v7, 0.0  ;;  %v32_v11 = vld [vmem:[%s8595_s0 + $0x60] sm:$0xff]  ;;  %v335_v14 = vmax.f32 %v65_v9, 0.0  ;;  %v31_v15 = vld [vmem:[%s8595_s0 + $0x58] sm:$0xff]  ;;  %v30_v19 = vld [vmem:[%s8595_s0 + $0x50] sm:$0xff] }
   0x4   :  { %v64_v12 = vld [vmem:[%s8595_s0 + $0x160] sm:$0xff]  ;;  %1042 = vmatpush1.msra.mxu0 %v305_v4  ;;  %v63_v16 = vld [vmem:[%s8595_s0 + $0x158] sm:$0xff]  ;;  %v302_v17 = vmax.f32 %v32_v11, 0.0  ;;  %v62_v20 = vld [vmem:[%s8595_s0 + $0x150] sm:$0xff]  ;;  %v301_v21 = vmax.f32 %v31_v15, 0.0  ;;  %v300_v25 = vmax.f32 %v30_v19, 0.0 }
   0x5   :  { %1227 = vmatpush1.msra.mxu1 %v337_v5  ;;  %1043 = vmatprep.subr.mxu0 %v8602_v0  ;;  %v334_v18 = vmax.f32 %v64_v12, 0.0  ;;  %v333_v22 = vmax.f32 %v63_v16, 0.0  ;;  %v29_v23 = vld [vmem:[%s8595_s0 + $0x48] sm:$0xff]  ;;  %v332_v26 = vmax.f32 %v62_v20, 0.0  ;;  %v28_v27 = vld [vmem:[%s8595_s0 + $0x40] sm:$0xff]  ;;  %v27_v31 = vld [vmem:[%s8595_s0 + $0x38] sm:$0xff] }
   0x6   :  { %1228 = vmatprep.subr.mxu1 %v8602_v0  ;;  %1044 = vmatpush1.msra.mxu0 %v304_v6  ;;  %v61_v24 = vld [vmem:[%s8595_s0 + $0x148] sm:$0xff]  ;;  %v60_v28 = vld [vmem:[%s8595_s0 + $0x140] sm:$0xff]  ;;  %v299_v29 = vmax.f32 %v29_v23, 0.0  ;;  %v59_v32 = vld [vmem:[%s8595_s0 + $0x138] sm:$0xff]  ;;  %v298_v33 = vmax.f32 %v28_v27, 0.0  ;;  %v297_v37 = vmax.f32 %v27_v31, 0.0 }
   0x7   :  { %1229 = vmatpush1.msra.mxu1 %v336_v10  ;;  %1045 = vmatprep.subr.mxu0 %v8602_v0  ;;  %v331_v30 = vmax.f32 %v61_v24, 0.0  ;;  %v330_v34 = vmax.f32 %v60_v28, 0.0  ;;  %v26_v35 = vld [vmem:[%s8595_s0 + $0x30] sm:$0xff]  ;;  %v329_v38 = vmax.f32 %v59_v32, 0.0  ;;  %v25_v39 = vld [vmem:[%s8595_s0 + $0x28] sm:$0xff]  ;;  %v24_v43 = vld [vmem:[%s8595_s0 + $0x20] sm:$0xff] }
   0x8   :  { %1230 = vmatprep.subr.mxu1 %v8602_v0  ;;  %1046 = vmatpush1.msra.mxu0 %v303_v13  ;;  %v58_v36 = vld [vmem:[%s8595_s0 + $0x130] sm:$0xff]  ;;  %v57_v40 = vld [vmem:[%s8595_s0 + $0x128] sm:$0xff]  ;;  %v296_v41 = vmax.f32 %v26_v35, 0.0  ;;  %v56_v44 = vld [vmem:[%s8595_s0 + $0x120] sm:$0xff]  ;;  %v295_v45 = vmax.f32 %v25_v39, 0.0  ;;  %v294_v49 = vmax.f32 %v24_v43, 0.0 }
   0x9   :  { %1231 = vmatpush1.msra.mxu1 %v335_v14  ;;  %1047 = vmatprep.subr.mxu0 %v8602_v0  ;;  %v328_v42 = vmax.f32 %v58_v36, 0.0  ;;  %v327_v46 = vmax.f32 %v57_v40, 0.0  ;;  %v23_v47 = vld [vmem:[%s8595_s0 + $0x18] sm:$0xff]  ;;  %v326_v50 = vmax.f32 %v56_v44, 0.0  ;;  %v22_v51 = vld [vmem:[%s8595_s0 + $0x10] sm:$0xff]  ;;  %v21_v55 = vld [vmem:[%s8595_s0 + $0x8] sm:$0xff] }
   0xa   :  { %1232 = vmatprep.subr.mxu1 %v8602_v0  ;;  %1048 = vmatpush1.msra.mxu0 %v302_v17  ;;  %v55_v48 = vld [vmem:[%s8595_s0 + $0x118] sm:$0xff]  ;;  %v54_v52 = vld [vmem:[%s8595_s0 + $0x110] sm:$0xff]  ;;  %v293_v53 = vmax.f32 %v23_v47, 0.0  ;;  %v53_v56 = vld [vmem:[%s8595_s0 + $0x108] sm:$0xff]  ;;  %v292_v57 = vmax.f32 %v22_v51, 0.0  ;;  %v291_v61 = vmax.f32 %v21_v55, 0.0 }
   0xb   :  { %1233 = vmatpush1.msra.mxu1 %v334_v18  ;;  %1049 = vmatprep.subr.mxu0 %v8602_v0  ;;  %v325_v54 = vmax.f32 %v55_v48, 0.0  ;;  %v324_v58 = vmax.f32 %v54_v52, 0.0  ;;  %v20_v59 = vld [vmem:[%s8595_s0] sm:$0xff]  ;;  %v323_v62 = vmax.f32 %v53_v56, 0.0  ;;  %v51_v63 = vld [vmem:[%s8595_s0 + $0xf8] sm:$0xff]  ;;  %v50_v4 = vld [vmem:[%s8595_s0 + $0xf0] sm:$0xff] }
   0xc   :  { %1234 = vmatprep.subr.mxu1 %v8602_v0  ;;  %1050 = vmatpush1.msra.mxu0 %v301_v21  ;;  %v52_v60 = vld [vmem:[%s8595_s0 + $0x100] sm:$0xff]  ;;  %v83_v1 = vld [vmem:[%s8595_s0 + $0x1f8] sm:$0xff]  ;;  %v290_v2 = vmax.f32 %v20_v59, 0.0  ;;  %v82_v5 = vld [vmem:[%s8595_s0 + $0x1f0] sm:$0xff]  ;;  %v321_v6 = vmax.f32 %v51_v63, 0.0  ;;  %v320_v10 = vmax.f32 %v50_v4, 0.0 }
   0xd   :  { %1235 = vmatpush1.msra.mxu1 %v333_v22  ;;  %1051 = vmatprep.subr.mxu0 %v8602_v0  ;;  %v322_v3 = vmax.f32 %v52_v60, 0.0  ;;  %v353_v7 = vmax.f32 %v83_v1, 0.0  ;;  %v49_v8 = vld [vmem:[%s8595_s0 + $0xe8] sm:$0xff]  ;;  %v352_v11 = vmax.f32 %v82_v5, 0.0  ;;  %v48_v12 = vld [vmem:[%s8595_s0 + $0xe0] sm:$0xff]  ;;  %v47_v16 = vld [vmem:[%s8595_s0 + $0xd8] sm:$0xff] }
   0xe   :  { %1236 = vmatprep.subr.mxu1 %v8602_v0  ;;  %1052 = vmatpush1.msra.mxu0 %v300_v25  ;;  %v81_v9 = vld [vmem:[%s8595_s0 + $0x1e8] sm:$0xff]  ;;  %v80_v13 = vld [vmem:[%s8595_s0 + $0x1e0] sm:$0xff]  ;;  %v319_v14 = vmax.f32 %v49_v8, 0.0  ;;  %v79_v17 = vld [vmem:[%s8595_s0 + $0x1d8] sm:$0xff]  ;;  %v318_v18 = vmax.f32 %v48_v12, 0.0  ;;  %v317_v22 = vmax.f32 %v47_v16, 0.0 }
   0xf   :  { %1237 = vmatpush1.msra.mxu1 %v332_v26  ;;  %1053 = vmatprep.subr.mxu0 %v8602_v0  ;;  %v351_v15 = vmax.f32 %v81_v9, 0.0  ;;  %v350_v19 = vmax.f32 %v80_v13, 0.0  ;;  %v46_v20 = vld [vmem:[%s8595_s0 + $0xd0] sm:$0xff]  ;;  %v349_v23 = vmax.f32 %v79_v17, 0.0  ;;  %v45_v24 = vld [vmem:[%s8595_s0 + $0xc8] sm:$0xff]  ;;  %v44_v28 = vld [vmem:[%s8595_s0 + $0xc0] sm:$0xff] }
  0x10   :  { %1238 = vmatprep.subr.mxu1 %v8602_v0  ;;  %1054 = vmatpush1.msra.mxu0 %v299_v29  ;;  %v78_v21 = vld [vmem:[%s8595_s0 + $0x1d0] sm:$0xff]  ;;  %v77_v25 = vld [vmem:[%s8595_s0 + $0x1c8] sm:$0xff]  ;;  %v316_v26 = vmax.f32 %v46_v20, 0.0  ;;  %v76_v29 = vld [vmem:[%s8595_s0 + $0x1c0] sm:$0xff]  ;;  %s4714_s20 = smov 120   ;;  %vm4079_vm10 = vcmask 64512  }
  0x11   :  { %1239 = vmatpush1.msra.mxu1 %v331_v30  ;;  %1055 = vmatprep.subr.mxu0 %v8602_v0  ;;  %v348_v27 = vmax.f32 %v78_v21, 0.0  ;;  %v315_v30 = vmax.f32 %v45_v24, 0.0  ;;  %v347_v31 = vmax.f32 %v77_v25, 0.0  ;;  %v43_v32 = vld [vmem:[%s8595_s0 + $0xb8] sm:$0xff]  ;;  %v346_v35 = vmax.f32 %v76_v29, 0.0  ;;  %v42_v36 = vld [vmem:[%s8595_s0 + $0xb0] sm:$0xff] }
  0x12   :  { %1240 = vmatprep.subr.mxu1 %v8602_v0  ;;  %1056 = vmatpush1.msra.mxu0 %v298_v33  ;;  %v75_v33 = vld [vmem:[%s8595_s0 + $0x1b8] sm:$0xff]  ;;  %v41_v40 = vld [vmem:[%s8595_s0 + $0xa8] sm:$0xff]  ;;  %v40_v44 = vld [vmem:[%s8595_s0 + $0xa0] sm:$0xff]  ;;  %vm4128_vm12 = vcmask 56320   ;;  %vm4165_vm15 = vcmask 48128  }
  0x13   :  { %1241 = vmatpush1.msra.mxu1 %v330_v34  ;;  %1057 = vmatprep.subr.mxu0 %v8602_v0  ;;  %v314_v34 = vmax.f32 %v44_v28, 0.0  ;;  %v345_v39 = vmax.f32 %v75_v33, 0.0  ;;  %v39_v48 = vld [vmem:[%s8595_s0 + $0x98] sm:$0xff]  ;;  %v38_v52 = vld [vmem:[%s8595_s0 + $0x90] sm:$0xff]  ;;  %v37_v56 = vld [vmem:[%s8595_s0 + $0x88] sm:$0xff] }
  0x14   :  { %1242 = vmatprep.subr.mxu1 %v8602_v0  ;;  %1058 = vmatpush1.msra.mxu0 %v297_v37  ;;  %v74_v37 = vld [vmem:[%s8595_s0 + $0x1b0] sm:$0xff]  ;;  %v36_v60 = vld [vmem:[%s8595_s0 + $0x80] sm:$0xff]  ;;  %v563_v4 = vld [vmem:[%s8596_s1 + $0x18] sm:$0xff] }
  0x15   :  { %1243 = vmatpush1.msra.mxu1 %v329_v38  ;;  %1059 = vmatprep.subr.mxu0 %v8602_v0  ;;  %v313_v38 = vmax.f32 %v43_v32, 0.0  ;;  %v344_v43 = vmax.f32 %v74_v37, 0.0  ;;  %v68_v63 = vld [vmem:[%s8595_s0 + $0x180] sm:$0xff]  ;;  %v306_v1 = vmax.f32 %v36_v60, 0.0  ;;  %v99_v5 = vld [vmem:[%s8595_s0 + $0x278] sm:$0xff]  ;;  %v562_v8 = vld [vmem:[%s8596_s1 + $0x10] sm:$0xff] }
  0x16   :  { %1244 = vmatprep.subr.mxu1 %v8602_v0  ;;  %1060 = vmatpush1.msra.mxu0 %v296_v41  ;;  %v73_v41 = vld [vmem:[%s8595_s0 + $0x1a8] sm:$0xff]  ;;  %v578_v9 = vld [vmem:[%s8596_s1 + $0x90] sm:$0xff]  ;;  %v579_v16 = vld [vmem:[%s8596_s1 + $0x98] sm:$0xff] }
  0x17   :  { %1245 = vmatpush1.msra.mxu1 %v328_v42  ;;  %1061 = vmatprep.subr.mxu0 %v8602_v0  ;;  %v312_v42 = vmax.f32 %v42_v36, 0.0  ;;  %v343_v47 = vmax.f32 %v73_v41, 0.0  ;;  %v98_v13 = vld [vmem:[%s8595_s0 + $0x270] sm:$0xff]  ;;  %v595_v17 = vld [vmem:[%s8596_s1 + $0x118] sm:$0xff]  ;;  %v97_v21 = vld [vmem:[%s8595_s0 + $0x268] sm:$0xff] }
  0x18   :  { %1246 = vmatprep.subr.mxu1 %v8602_v0  ;;  %1062 = vmatpush1.msra.mxu0 %v295_v45  ;;  %v72_v45 = vld [vmem:[%s8595_s0 + $0x1a0] sm:$0xff]  ;;  %v613_v32 = vld [vmem:[%s8596_s1 + $0x1a8] sm:$0xff]  ;;  %v95_v37 = vld [vmem:[%s8595_s0 + $0x258] sm:$0xff] }
  0x19   :  { %1247 = vmatpush1.msra.mxu1 %v327_v46  ;;  %1063 = vmatprep.subr.mxu0 %v8602_v0  ;;  %v311_v46 = vmax.f32 %v41_v40, 0.0  ;;  %v342_v51 = vmax.f32 %v72_v45, 0.0  ;;  %v596_v24 = vld [vmem:[%s8596_s1 + $0x120] sm:$0xff]  ;;  %v629_v33 = vld [vmem:[%s8596_s1 + $0x228] sm:$0xff]  ;;  %v630_v40 = vld [vmem:[%s8596_s1 + $0x230] sm:$0xff] }
  0x1a   :  { %1248 = vmatprep.subr.mxu1 %v8602_v0  ;;  %1064 = vmatpush1.msra.mxu0 %v294_v49  ;;  %v71_v49 = vld [vmem:[%s8595_s0 + $0x198] sm:$0xff]  ;;  %v612_v25 = vld [vmem:[%s8596_s1 + $0x1a0] sm:$0xff]  ;;  %v646_v41 = vld [vmem:[%s8596_s1 + $0x2b0] sm:$0xff] }
  0x1b   :  { %1249 = vmatpush1.msra.mxu1 %v326_v50  ;;  %1065 = vmatprep.subr.mxu0 %v8602_v0  ;;  %v310_v50 = vmax.f32 %v40_v44, 0.0  ;;  %v341_v55 = vmax.f32 %v71_v49, 0.0  ;;  %v96_v29 = vld [vmem:[%s8595_s0 + $0x260] sm:$0xff]  ;;  %v94_v45 = vld [vmem:[%s8595_s0 + $0x250] sm:$0xff]  ;;  %v663_v49 = vld [vmem:[%s8596_s1 + $0x338] sm:$0xff] }
  0x1c   :  { %1250 = vmatprep.subr.mxu1 %v8602_v0  ;;  %1066 = vmatpush1.msra.mxu0 %v293_v53  ;;  %v70_v53 = vld [vmem:[%s8595_s0 + $0x190] sm:$0xff] }
  0x1d   :  { %1251 = vmatpush1.msra.mxu1 %v325_v54  ;;  %1067 = vmatprep.subr.mxu0 %v8602_v0  ;;  %v309_v54 = vmax.f32 %v39_v48, 0.0  ;;  %v340_v59 = vmax.f32 %v70_v53, 0.0  ;;  %v647_v48 = vld [vmem:[%s8596_s1 + $0x2b8] sm:$0xff]  ;;  %v93_v53 = vld [vmem:[%s8595_s0 + $0x248] sm:$0xff] }
  0x1e   :  { %1252 = vmatprep.subr.mxu1 %v8602_v0  ;;  %1068 = vmatpush1.msra.mxu0 %v292_v57  ;;  %v69_v57 = vld [vmem:[%s8595_s0 + $0x188] sm:$0xff] }
  0x1f   :  { %1253 = vmatpush1.msra.mxu1 %v324_v58  ;;  %1069 = vmatprep.subr.mxu0 %v8602_v0  ;;  %v308_v58 = vmax.f32 %v38_v52, 0.0 }
  0x20   :  { %1254 = vmatprep.subr.mxu1 %v8602_v0  ;;  %1070 = vmatpush1.msra.mxu0 %v291_v61  ;;  %v307_v61 = vmax.f32 %v37_v56, 0.0  ;;  %v664_v56 = vld [vmem:[%s8596_s1 + $0x340] sm:$0xff] }
  0x21   :  { %1255 = vmatpush1.msra.mxu1 %v323_v62  ;;  %1071 = vmatprep.subr.mxu0 %v8602_v0  ;;  %v339_v62 = vmax.f32 %v69_v57, 0.0  ;;  %v680_v57 = vld [vmem:[%s8596_s1 + $0x3c0] sm:$0xff] }
  0x22   :  { %1256 = vmatprep.subr.mxu1 %v8602_v0  ;;  %1072 = vmatpush1.msra.mxu0 %v290_v2  ;;  %v561_v2 = vld [vmem:[%s8596_s1 + $0x8] sm:$0xff] }
  0x23   :  { %1257 = vmatpush1.msra.mxu1 %v322_v3  ;;  %1073 = vmatprep.subr.mxu0 %v8602_v0  ;;  %v338_v3 = vmax.f32 %v68_v63, 0.0  ;;  %v679_v63 = vld [vmem:[%s8596_s1 + $0x3b8] sm:$0xff] }
  0x24   :  { %1258 = vmatprep.subr.mxu1 %v8602_v0  ;;  %1074 = vmatpush2.msra.mxu0 %v321_v6  ;;  %v131_v6 = vld [vmem:[%s8595_s0 + $0x378] sm:$0xff] }
  0x25   :  { %1259 = vmatpush2.msra.mxu1 %v353_v7  ;;  %1075 = vmatprep.subr.mxu0 %v8602_v0  ;;  %v560_v7 = vld [vmem:[%s8596_s1] sm:$0xff]  ;;  %v401_v12 = vmax.f32 %v131_v6, 0.0  ;;  %v91_v6 = vld [vmem:[%s8595_s0 + $0x238] sm:$0xff] }
  0x26   :  { %1260 = vmatprep.subr.mxu1 %v8602_v0  ;;  %1076 = vmatpush2.msra.mxu0 %v320_v10  ;;  %v580_v10 = vld [vmem:[%s8596_s1 + $0xa0] sm:$0xff] }
  0x27   :  { %1261 = vmatpush2.msra.mxu1 %v352_v11  ;;  %1077 = vmatprep.subr.mxu0 %v8602_v0  ;;  %v369_v11 = vmax.f32 %v99_v5, 0.0 }
  0x28   :  { %1262 = vmatprep.subr.mxu1 %v8602_v0  ;;  %1078 = vmatpush2.msra.mxu0 %v319_v14  ;;  %v130_v14 = vld [vmem:[%s8595_s0 + $0x370] sm:$0xff] }
  0x29   :  { %1263 = vmatpush2.msra.mxu1 %v351_v15  ;;  %1079 = vmatprep.subr.mxu0 %v8602_v0  ;;  %v577_v15 = vld [vmem:[%s8596_s1 + $0x88] sm:$0xff]  ;;  %v400_v20 = vmax.f32 %v130_v14, 0.0  ;;  %v90_v14 = vld [vmem:[%s8595_s0 + $0x230] sm:$0xff] }
  0x2a   :  { %1264 = vmatprep.subr.mxu1 %v8602_v0  ;;  %1080 = vmatpush2.msra.mxu0 %v318_v18  ;;  %v597_v18 = vld [vmem:[%s8596_s1 + $0x128] sm:$0xff] }
  0x2b   :  { %1265 = vmatpush2.msra.mxu1 %v350_v19  ;;  %1081 = vmatprep.subr.mxu0 %v8602_v0  ;;  %v368_v19 = vmax.f32 %v98_v13, 0.0 }
  0x2c   :  { %1266 = vmatprep.subr.mxu1 %v8602_v0  ;;  %1082 = vmatpush2.msra.mxu0 %v317_v22  ;;  %v129_v22 = vld [vmem:[%s8595_s0 + $0x368] sm:$0xff] }
  0x2d   :  { %1267 = vmatpush2.msra.mxu1 %v349_v23  ;;  %1083 = vmatprep.subr.mxu0 %v8602_v0  ;;  %v594_v23 = vld [vmem:[%s8596_s1 + $0x110] sm:$0xff]  ;;  %v399_v28 = vmax.f32 %v129_v22, 0.0  ;;  %v89_v22 = vld [vmem:[%s8595_s0 + $0x228] sm:$0xff] }
  0x2e   :  { %1268 = vmatprep.subr.mxu1 %v8602_v0  ;;  %1084 = vmatpush2.msra.mxu0 %v316_v26  ;;  %v614_v26 = vld [vmem:[%s8596_s1 + $0x1b0] sm:$0xff] }
  0x2f   :  { %1269 = vmatpush2.msra.mxu1 %v348_v27  ;;  %1085 = vmatprep.subr.mxu0 %v8602_v0  ;;  %v367_v27 = vmax.f32 %v97_v21, 0.0 }
  0x30   :  { %1270 = vmatprep.subr.mxu1 %v8602_v0  ;;  %1086 = vmatpush2.msra.mxu0 %v315_v30  ;;  %v128_v30 = vld [vmem:[%s8595_s0 + $0x360] sm:$0xff] }
  0x31   :  { %1271 = vmatpush2.msra.mxu1 %v347_v31  ;;  %1087 = vmatprep.subr.mxu0 %v8602_v0  ;;  %v611_v31 = vld [vmem:[%s8596_s1 + $0x198] sm:$0xff]  ;;  %v398_v36 = vmax.f32 %v128_v30, 0.0  ;;  %v88_v30 = vld [vmem:[%s8595_s0 + $0x220] sm:$0xff] }
  0x32   :  { %1272 = vmatprep.subr.mxu1 %v8602_v0  ;;  %1088 = vmatpush2.msra.mxu0 %v314_v34  ;;  %v631_v34 = vld [vmem:[%s8596_s1 + $0x238] sm:$0xff] }
  0x33   :  { %1273 = vmatpush2.msra.mxu1 %v346_v35  ;;  %1089 = vmatprep.subr.mxu0 %v8602_v0  ;;  %v366_v35 = vmax.f32 %v96_v29, 0.0 }
  0x34   :  { %1274 = vmatprep.subr.mxu1 %v8602_v0  ;;  %1090 = vmatpush2.msra.mxu0 %v313_v38  ;;  %v127_v38 = vld [vmem:[%s8595_s0 + $0x358] sm:$0xff] }
  0x35   :  { %1275 = vmatpush2.msra.mxu1 %v345_v39  ;;  %1091 = vmatprep.subr.mxu0 %v8602_v0  ;;  %v628_v39 = vld [vmem:[%s8596_s1 + $0x220] sm:$0xff]  ;;  %v397_v44 = vmax.f32 %v127_v38, 0.0  ;;  %v87_v38 = vld [vmem:[%s8595_s0 + $0x218] sm:$0xff] }
  0x36   :  { %1276 = vmatprep.subr.mxu1 %v8602_v0  ;;  %1092 = vmatpush2.msra.mxu0 %v312_v42  ;;  %v648_v42 = vld [vmem:[%s8596_s1 + $0x2c0] sm:$0xff] }
  0x37   :  { %1277 = vmatpush2.msra.mxu1 %v344_v43  ;;  %1093 = vmatprep.subr.mxu0 %v8602_v0  ;;  %v365_v43 = vmax.f32 %v95_v37, 0.0 }
  0x38   :  { %1278 = vmatprep.subr.mxu1 %v8602_v0  ;;  %1094 = vmatpush2.msra.mxu0 %v311_v46  ;;  %v126_v46 = vld [vmem:[%s8595_s0 + $0x350] sm:$0xff] }
  0x39   :  { %1279 = vmatpush2.msra.mxu1 %v343_v47  ;;  %1095 = vmatprep.subr.mxu0 %v8602_v0  ;;  %v645_v47 = vld [vmem:[%s8596_s1 + $0x2a8] sm:$0xff]  ;;  %v396_v52 = vmax.f32 %v126_v46, 0.0  ;;  %v86_v46 = vld [vmem:[%s8595_s0 + $0x210] sm:$0xff] }
  0x3a   :  { %1280 = vmatprep.subr.mxu1 %v8602_v0  ;;  %1096 = vmatpush2.msra.mxu0 %v310_v50  ;;  %v665_v50 = vld [vmem:[%s8596_s1 + $0x348] sm:$0xff] }
  0x3b   :  { %1281 = vmatpush2.msra.mxu1 %v342_v51  ;;  %1097 = vmatprep.subr.mxu0 %v8602_v0  ;;  %v364_v51 = vmax.f32 %v94_v45, 0.0 }
  0x3c   :  { %1282 = vmatprep.subr.mxu1 %v8602_v0  ;;  %1098 = vmatpush2.msra.mxu0 %v309_v54  ;;  %v125_v54 = vld [vmem:[%s8595_s0 + $0x348] sm:$0xff] }
  0x3d   :  { %1283 = vmatpush2.msra.mxu1 %v341_v55  ;;  %1099 = vmatprep.subr.mxu0 %v8602_v0  ;;  %v662_v55 = vld [vmem:[%s8596_s1 + $0x330] sm:$0xff]  ;;  %v395_v60 = vmax.f32 %v125_v54, 0.0  ;;  %v85_v54 = vld [vmem:[%s8595_s0 + $0x208] sm:$0xff] }
  0x3e   :  { %1284 = vmatprep.subr.mxu1 %v8602_v0  ;;  %1100 = vmatpush2.msra.mxu0 %v308_v58  ;;  %v682_v58 = vld [vmem:[%s8596_s1 + $0x3d0] sm:$0xff] }
  0x3f   :  { %1285 = vmatpush2.msra.mxu1 %v340_v59  ;;  %1101 = vmatprep.subr.mxu0 %v8602_v0  ;;  %v363_v59 = vmax.f32 %v93_v53, 0.0 }
  0x40   :  { %1286 = vmatprep.subr.mxu1 %v8602_v0  ;;  %1102 = vmatpush2.msra.mxu0 %v307_v61  ;;  %v92_v61 = vld [vmem:[%s8595_s0 + $0x240] sm:$0xff] }
  0x41   :  { %1287 = vmatpush2.msra.mxu1 %v339_v62  ;;  %1103 = vmatprep.subr.mxu0 %v8602_v0  ;;  %v124_v62 = vld [vmem:[%s8595_s0 + $0x340] sm:$0xff] }
  0x42   :  { %1288 = vmatprep.subr.mxu1 %v8602_v0  ;;  %1104 = vmatpush2.msra.mxu0 %v306_v1  ;;  %v681_v1 = vld [vmem:[%s8596_s1 + $0x3c8] sm:$0xff]  ;;  %v394_v5 = vmax.f32 %v124_v62, 0.0 }
  0x43   :  { %1105 = vmatprep.mubr.f32.mxu0 %v561_v2  ;;  %1289 = vmatpush2.msra.mxu1 %v338_v3  ;;  %v697_v2 = vld [vmem:[%s8596_s1 + $0x448] sm:$0xff]  ;;  %v699_v3 = vld [vmem:[%s8596_s1 + $0x458] sm:$0xff] }
  0x44   :  { %1290 = vmatprep.mubr.f32.mxu1 %v563_v4  ;;  %1106 = vmatmul.mubr.f32.vlgmr.msra.gmra.mxu0 %v560_v7  ;;  %v362_v4 = vmax.f32 %v92_v61, 0.0  ;;  %v123_v7 = vld [vmem:[%s8595_s0 + $0x338] sm:$0xff]  ;;  %v84_v61 = vld [vmem:[%s8595_s0 + $0x200] sm:$0xff] }
  0x45   :  { %1291 = vmatmul.mubr.f32.vlgmr.msra.gmra.mxu1 %v562_v8  ;;  %1110 = vmatprep.mubr.f32.mxu0 %v578_v9  ;;  %v696_v8 = vld [vmem:[%s8596_s1 + $0x440] sm:$0xff]  ;;  %v698_v9 = vld [vmem:[%s8596_s1 + $0x450] sm:$0xff]  ;;  %v393_v13 = vmax.f32 %v123_v7, 0.0 }
  0x46   :  { %1295 = vmatprep.mubr.f32.mxu1 %v580_v10  ;;  %1411 = vmatprep.subr.mxu0 %v8602_v0  ;;  %v714_v10 = vld [vmem:[%s8596_s1 + $0x4d0] sm:$0xff]  ;;  %v832_v7 = vld [vmem:[%s8596_s1 + $0x880] sm:$0xff] }
  0x47   :  { %1596 = vmatprep.subr.mxu1 %v8602_v0  ;;  %1412 = vmatpush1.msra.mxu0 %v369_v11  ;;  %v716_v11 = vld [vmem:[%s8596_s1 + $0x4e0] sm:$0xff] }
  0x48   :  { %1597 = vmatpush1.msra.mxu1 %v401_v12  ;;  %1111 = vmatmul.mubr.f32.gmra.mxu0 %v577_v15  ;;  %v361_v12 = vmax.f32 %v91_v6, 0.0  ;;  %v122_v15 = vld [vmem:[%s8595_s0 + $0x330] sm:$0xff]  ;;  %v835_v6 = vld [vmem:[%s8596_s1 + $0x898] sm:$0xff] }
  0x49   :  { %1296 = vmatmul.mubr.f32.gmra.mxu1 %v579_v16  ;;  %1115 = vmatprep.mubr.f32.mxu0 %v595_v17  ;;  %v713_v16 = vld [vmem:[%s8596_s1 + $0x4c8] sm:$0xff]  ;;  %v715_v17 = vld [vmem:[%s8596_s1 + $0x4d8] sm:$0xff]  ;;  %v392_v21 = vmax.f32 %v122_v15, 0.0 }
  0x4a   :  { %1300 = vmatprep.mubr.f32.mxu1 %v597_v18  ;;  %1413 = vmatprep.subr.mxu0 %v8602_v0  ;;  %v731_v18 = vld [vmem:[%s8596_s1 + $0x558] sm:$0xff] }
  0x4b   :  { %1598 = vmatprep.subr.mxu1 %v8602_v0  ;;  %1414 = vmatpush1.msra.mxu0 %v368_v19  ;;  %v733_v19 = vld [vmem:[%s8596_s1 + $0x568] sm:$0xff] }
  0x4c   :  { %1599 = vmatpush1.msra.mxu1 %v400_v20  ;;  %1116 = vmatmul.mubr.f32.gmra.mxu0 %v594_v23  ;;  %v360_v20 = vmax.f32 %v90_v14, 0.0  ;;  %v121_v23 = vld [vmem:[%s8595_s0 + $0x328] sm:$0xff]  ;;  %v852_v14 = vld [vmem:[%s8596_s1 + $0x920] sm:$0xff] }
  0x4d   :  { %1301 = vmatmul.mubr.f32.gmra.mxu1 %v596_v24  ;;  %1120 = vmatprep.mubr.f32.mxu0 %v612_v25  ;;  %v730_v24 = vld [vmem:[%s8596_s1 + $0x550] sm:$0xff]  ;;  %v732_v25 = vld [vmem:[%s8596_s1 + $0x560] sm:$0xff]  ;;  %v391_v29 = vmax.f32 %v121_v23, 0.0 }
  0x4e   :  { %1305 = vmatprep.mubr.f32.mxu1 %v614_v26  ;;  %1415 = vmatprep.subr.mxu0 %v8602_v0  ;;  %v748_v26 = vld [vmem:[%s8596_s1 + $0x5e0] sm:$0xff] }
  0x4f   :  { %1600 = vmatprep.subr.mxu1 %v8602_v0  ;;  %1416 = vmatpush1.msra.mxu0 %v367_v27  ;;  %v750_v27 = vld [vmem:[%s8596_s1 + $0x5f0] sm:$0xff]  ;;  %v112_v23 = vld [vmem:[%s8595_s0 + $0x2e0] sm:$0xff] }
  0x50   :  { %1601 = vmatpush1.msra.mxu1 %v399_v28  ;;  %1121 = vmatmul.mubr.f32.gmra.mxu0 %v611_v31  ;;  %v359_v28 = vmax.f32 %v89_v22, 0.0  ;;  %v120_v31 = vld [vmem:[%s8595_s0 + $0x320] sm:$0xff] }
  0x51   :  { %1306 = vmatmul.mubr.f32.gmra.mxu1 %v613_v32  ;;  %1125 = vmatprep.mubr.f32.mxu0 %v629_v33  ;;  %v747_v32 = vld [vmem:[%s8596_s1 + $0x5d8] sm:$0xff]  ;;  %v749_v33 = vld [vmem:[%s8596_s1 + $0x5e8] sm:$0xff]  ;;  %v390_v37 = vmax.f32 %v120_v31, 0.0  ;;  %v866_v31 = vld [vmem:[%s8596_s1 + $0x990] sm:$0xff] }
  0x52   :  { %1310 = vmatprep.mubr.f32.mxu1 %v631_v34  ;;  %1417 = vmatprep.subr.mxu0 %v8602_v0  ;;  %v765_v34 = vld [vmem:[%s8596_s1 + $0x668] sm:$0xff] }
  0x53   :  { %1602 = vmatprep.subr.mxu1 %v8602_v0  ;;  %1418 = vmatpush1.msra.mxu0 %v366_v35  ;;  %v767_v35 = vld [vmem:[%s8596_s1 + $0x678] sm:$0xff] }
  0x54   :  { %1603 = vmatpush1.msra.mxu1 %v398_v36  ;;  %1126 = vmatmul.mubr.f32.gmra.mxu0 %v628_v39  ;;  %v358_v36 = vmax.f32 %v88_v30, 0.0  ;;  %v119_v39 = vld [vmem:[%s8595_s0 + $0x318] sm:$0xff]  ;;  %v144_v30 = vld [vmem:[%s8595_s0 + $0x3e0] sm:$0xff] }
  0x55   :  { %1311 = vmatmul.mubr.f32.gmra.mxu1 %v630_v40  ;;  %1130 = vmatprep.mubr.f32.mxu0 %v646_v41  ;;  %v764_v40 = vld [vmem:[%s8596_s1 + $0x660] sm:$0xff]  ;;  %v766_v41 = vld [vmem:[%s8596_s1 + $0x670] sm:$0xff]  ;;  %v389_v45 = vmax.f32 %v119_v39, 0.0 }
  0x56   :  { %1315 = vmatprep.mubr.f32.mxu1 %v648_v42  ;;  %1419 = vmatprep.subr.mxu0 %v8602_v0  ;;  %v782_v42 = vld [vmem:[%s8596_s1 + $0x6f0] sm:$0xff] }
  0x57   :  { %1604 = vmatprep.subr.mxu1 %v8602_v0  ;;  %1420 = vmatpush1.msra.mxu0 %v365_v43  ;;  %v784_v43 = vld [vmem:[%s8596_s1 + $0x700] sm:$0xff] }
  0x58   :  { %1605 = vmatpush1.msra.mxu1 %v397_v44  ;;  %1131 = vmatmul.mubr.f32.gmra.mxu0 %v645_v47  ;;  %v357_v44 = vmax.f32 %v87_v38, 0.0  ;;  %v118_v47 = vld [vmem:[%s8595_s0 + $0x310] sm:$0xff] }
  0x59   :  { %1316 = vmatmul.mubr.f32.gmra.mxu1 %v647_v48  ;;  %1135 = vmatprep.mubr.f32.mxu0 %v663_v49  ;;  %v781_v48 = vld [vmem:[%s8596_s1 + $0x6e8] sm:$0xff]  ;;  %v783_v49 = vld [vmem:[%s8596_s1 + $0x6f8] sm:$0xff]  ;;  %v388_v53 = vmax.f32 %v118_v47, 0.0  ;;  %v886_v38 = vld [vmem:[%s8596_s1 + $0xa30] sm:$0xff] }
  0x5a   :  { %1320 = vmatprep.mubr.f32.mxu1 %v665_v50  ;;  %1421 = vmatprep.subr.mxu0 %v8602_v0  ;;  %v799_v50 = vld [vmem:[%s8596_s1 + $0x778] sm:$0xff]  ;;  %v108_v47 = vld [vmem:[%s8595_s0 + $0x2c0] sm:$0xff] }
  0x5b   :  { %1606 = vmatprep.subr.mxu1 %v8602_v0  ;;  %1422 = vmatpush1.msra.mxu0 %v364_v51  ;;  %v801_v51 = vld [vmem:[%s8596_s1 + $0x788] sm:$0xff] }
  0x5c   :  { %1607 = vmatpush1.msra.mxu1 %v396_v52  ;;  %1136 = vmatmul.mubr.f32.gmra.mxu0 %v662_v55  ;;  %v356_v52 = vmax.f32 %v86_v46, 0.0  ;;  %v117_v55 = vld [vmem:[%s8595_s0 + $0x308] sm:$0xff] }
  0x5d   :  { %1321 = vmatmul.mubr.f32.gmra.mxu1 %v664_v56  ;;  %1140 = vmatprep.mubr.f32.mxu0 %v680_v57  ;;  %v798_v56 = vld [vmem:[%s8596_s1 + $0x770] sm:$0xff]  ;;  %v800_v57 = vld [vmem:[%s8596_s1 + $0x780] sm:$0xff]  ;;  %v387_v62 = vmax.f32 %v117_v55, 0.0 }
  0x5e   :  { %1325 = vmatprep.mubr.f32.mxu1 %v682_v58  ;;  %1423 = vmatprep.subr.mxu0 %v8602_v0  ;;  %v816_v58 = vld [vmem:[%s8596_s1 + $0x800] sm:$0xff] }
  0x5f   :  { %1608 = vmatprep.subr.mxu1 %v8602_v0  ;;  %1424 = vmatpush1.msra.mxu0 %v363_v59  ;;  %v818_v59 = vld [vmem:[%s8596_s1 + $0x810] sm:$0xff]  ;;  %v900_v55 = vld [vmem:[%s8596_s1 + $0xaa0] sm:$0xff] }
  0x60   :  { %1609 = vmatpush1.msra.mxu1 %v395_v60  ;;  %1141 = vmatmul.mubr.f32.gmra.mxu0 %v679_v63  ;;  %v355_v60 = vmax.f32 %v85_v54, 0.0  ;;  %v815_v63 = vld [vmem:[%s8596_s1 + $0x7f8] sm:$0xff]  ;;  %v140_v54 = vld [vmem:[%s8595_s0 + $0x3c0] sm:$0xff] }
  0x61   :  { %1326 = vmatmul.mubr.f32.gmra.mxu1 %v681_v1  ;;  %1145 = vmatprep.mubr.f32.mxu0 %v697_v2  ;;  %v817_v1 = vld [vmem:[%s8596_s1 + $0x808] sm:$0xff] }
  0x62   :  { %1330 = vmatprep.mubr.f32.mxu1 %v699_v3  ;;  %1425 = vmatprep.subr.mxu0 %v8602_v0  ;;  %v833_v2 = vld [vmem:[%s8596_s1 + $0x888] sm:$0xff]  ;;  %v354_v3 = vmax.f32 %v84_v61, 0.0  ;;  %v918_v61 = vld [vmem:[%s8596_s1 + $0xb30] sm:$0xff] }
  0x63   :  { %1610 = vmatprep.subr.mxu1 %v8602_v0  ;;  %1426 = vmatpush1.msra.mxu0 %v362_v4  ;;  %v115_v4 = vld [vmem:[%s8595_s0 + $0x2f8] sm:$0xff] }
  0x64   :  { %1611 = vmatpush1.msra.mxu1 %v394_v5  ;;  %1146 = vmatmul.mubr.f32.gmra.mxu0 %v696_v8  ;;  %v116_v5 = vld [vmem:[%s8595_s0 + $0x300] sm:$0xff]  ;;  %v834_v8 = vld [vmem:[%s8596_s1 + $0x890] sm:$0xff] }
  0x65   :  { %1331 = vmatmul.mubr.f32.gmra.mxu1 %v698_v9  ;;  %1150 = vmatprep.mubr.f32.mxu0 %v714_v10  ;;  %v385_v9 = vmax.f32 %v115_v4, 0.0  ;;  %v386_v10 = vmax.f32 %v116_v5, 0.0  ;;  %v917_v4 = vld [vmem:[%s8596_s1 + $0xb28] sm:$0xff]  ;;  %v919_v5 = vld [vmem:[%s8596_s1 + $0xb38] sm:$0xff] }
  0x66   :  { %1335 = vmatprep.mubr.f32.mxu1 %v716_v11  ;;  %1427 = vmatprep.subr.mxu0 %v8602_v0  ;;  %v114_v11 = vld [vmem:[%s8595_s0 + $0x2f0] sm:$0xff] }
  0x67   :  { %1612 = vmatprep.subr.mxu1 %v8602_v0  ;;  %1428 = vmatpush1.msra.mxu0 %v361_v12  ;;  %v147_v12 = vld [vmem:[%s8595_s0 + $0x3f8] sm:$0xff]  ;;  %v384_v15 = vmax.f32 %v114_v11, 0.0  ;;  %v937_v11 = vld [vmem:[%s8596_s1 + $0xbc8] sm:$0xff] }
  0x68   :  { %1613 = vmatpush1.msra.mxu1 %v393_v13  ;;  %1151 = vmatmul.mubr.f32.gmra.mxu0 %v713_v16  ;;  %v850_v13 = vld [vmem:[%s8596_s1 + $0x910] sm:$0xff]  ;;  %v417_v16 = vmax.f32 %v147_v12, 0.0 }
  0x69   :  { %1336 = vmatmul.mubr.f32.gmra.mxu1 %v715_v17  ;;  %1155 = vmatprep.mubr.f32.mxu0 %v731_v18  ;;  %v113_v17 = vld [vmem:[%s8595_s0 + $0x2e8] sm:$0xff]  ;;  %v146_v18 = vld [vmem:[%s8595_s0 + $0x3f0] sm:$0xff] }
  0x6a   :  { %1340 = vmatprep.mubr.f32.mxu1 %v733_v19  ;;  %1429 = vmatprep.subr.mxu0 %v8602_v0  ;;  %v849_v19 = vld [vmem:[%s8596_s1 + $0x908] sm:$0xff]  ;;  %v416_v22 = vmax.f32 %v146_v18, 0.0 }
  0x6b   :  { %1614 = vmatprep.subr.mxu1 %v8602_v0  ;;  %1430 = vmatpush1.msra.mxu0 %v360_v20  ;;  %v851_v20 = vld [vmem:[%s8596_s1 + $0x918] sm:$0xff] }
  0x6c   :  { %1615 = vmatpush1.msra.mxu1 %v392_v21  ;;  %1156 = vmatmul.mubr.f32.gmra.mxu0 %v730_v24  ;;  %v383_v21 = vmax.f32 %v113_v17, 0.0  ;;  %v145_v24 = vld [vmem:[%s8595_s0 + $0x3e8] sm:$0xff]  ;;  %v936_v17 = vld [vmem:[%s8596_s1 + $0xbc0] sm:$0xff] }
  0x6d   :  { %1341 = vmatmul.mubr.f32.gmra.mxu1 %v732_v25  ;;  %1160 = vmatprep.mubr.f32.mxu0 %v748_v26  ;;  %v867_v25 = vld [vmem:[%s8596_s1 + $0x998] sm:$0xff]  ;;  %v869_v26 = vld [vmem:[%s8596_s1 + $0x9a8] sm:$0xff] }
  0x6e   :  { %1345 = vmatprep.mubr.f32.mxu1 %v750_v27  ;;  %1431 = vmatprep.subr.mxu0 %v8602_v0  ;;  %v382_v27 = vmax.f32 %v112_v23, 0.0  ;;  %v954_v23 = vld [vmem:[%s8596_s1 + $0xc50] sm:$0xff] }
  0x6f   :  { %1616 = vmatprep.subr.mxu1 %v8602_v0  ;;  %1432 = vmatpush1.msra.mxu0 %v359_v28  ;;  %v415_v28 = vmax.f32 %v145_v24, 0.0 }
  0x70   :  { %1617 = vmatpush1.msra.mxu1 %v391_v29  ;;  %1161 = vmatmul.mubr.f32.gmra.mxu0 %v747_v32  ;;  %v111_v29 = vld [vmem:[%s8595_s0 + $0x2d8] sm:$0xff]  ;;  %v868_v32 = vld [vmem:[%s8596_s1 + $0x9a0] sm:$0xff] }
  0x71   :  { %1346 = vmatmul.mubr.f32.gmra.mxu1 %v749_v33  ;;  %1165 = vmatprep.mubr.f32.mxu0 %v765_v34  ;;  %v381_v33 = vmax.f32 %v111_v29, 0.0  ;;  %v414_v34 = vmax.f32 %v144_v30, 0.0  ;;  %v953_v29 = vld [vmem:[%s8596_s1 + $0xc48] sm:$0xff]  ;;  %v100_v30 = vld [vmem:[%s8595_s0 + $0x280] sm:$0xff] }
  0x72   :  { %1350 = vmatprep.mubr.f32.mxu1 %v767_v35  ;;  %1433 = vmatprep.subr.mxu0 %v8602_v0  ;;  %v110_v35 = vld [vmem:[%s8595_s0 + $0x2d0] sm:$0xff] }
  0x73   :  { %1618 = vmatprep.subr.mxu1 %v8602_v0  ;;  %1434 = vmatpush1.msra.mxu0 %v358_v36  ;;  %v143_v36 = vld [vmem:[%s8595_s0 + $0x3d8] sm:$0xff]  ;;  %v380_v39 = vmax.f32 %v110_v35, 0.0  ;;  %v132_v35 = vld [vmem:[%s8595_s0 + $0x380] sm:$0xff] }
  0x74   :  { %1619 = vmatpush1.msra.mxu1 %v390_v37  ;;  %1166 = vmatmul.mubr.f32.gmra.mxu0 %v764_v40  ;;  %v884_v37 = vld [vmem:[%s8596_s1 + $0xa20] sm:$0xff]  ;;  %v413_v40 = vmax.f32 %v143_v36, 0.0  ;;  %v565_v36 = vld [vmem:[%s8596_s1 + $0x28] sm:$0xff] }
  0x75   :  { %1351 = vmatmul.mubr.f32.gmra.mxu1 %v766_v41  ;;  %1170 = vmatprep.mubr.f32.mxu0 %v782_v42  ;;  %v109_v41 = vld [vmem:[%s8595_s0 + $0x2c8] sm:$0xff]  ;;  %v142_v42 = vld [vmem:[%s8595_s0 + $0x3d0] sm:$0xff] }
  0x76   :  { %1355 = vmatprep.mubr.f32.mxu1 %v784_v43  ;;  %1435 = vmatprep.subr.mxu0 %v8602_v0  ;;  %v883_v43 = vld [vmem:[%s8596_s1 + $0xa18] sm:$0xff]  ;;  %v412_v46 = vmax.f32 %v142_v42, 0.0  ;;  %v582_v42 = vld [vmem:[%s8596_s1 + $0xb0] sm:$0xff] }
  0x77   :  { %1620 = vmatprep.subr.mxu1 %v8602_v0  ;;  %1436 = vmatpush1.msra.mxu0 %v357_v44  ;;  %v885_v44 = vld [vmem:[%s8596_s1 + $0xa28] sm:$0xff] }
  0x78   :  { %1621 = vmatpush1.msra.mxu1 %v389_v45  ;;  %1171 = vmatmul.mubr.f32.gmra.mxu0 %v781_v48  ;;  %v379_v45 = vmax.f32 %v109_v41, 0.0  ;;  %v141_v48 = vld [vmem:[%s8595_s0 + $0x3c8] sm:$0xff]  ;;  %v163_v41 = vld [vmem:[%s8595_s0 + $0x478] sm:$0xff] }
  0x79   :  { %1356 = vmatmul.mubr.f32.gmra.mxu1 %v783_v49  ;;  %1175 = vmatprep.mubr.f32.mxu0 %v799_v50  ;;  %v901_v49 = vld [vmem:[%s8596_s1 + $0xaa8] sm:$0xff]  ;;  %v903_v50 = vld [vmem:[%s8596_s1 + $0xab8] sm:$0xff] }
  0x7a   :  { %1360 = vmatprep.mubr.f32.mxu1 %v801_v51  ;;  %1437 = vmatprep.subr.mxu0 %v8602_v0  ;;  %v378_v51 = vmax.f32 %v108_v47, 0.0  ;;  %v433_v47 = vmax.f32 %v163_v41, 0.0  ;;  %v718_v41 = vld [vmem:[%s8596_s1 + $0x4f0] sm:$0xff] }
  0x7b   :  { %1622 = vmatprep.subr.mxu1 %v8602_v0  ;;  %1438 = vmatpush1.msra.mxu0 %v356_v52  ;;  %v411_v52 = vmax.f32 %v141_v48, 0.0  ;;  %v599_v48 = vld [vmem:[%s8596_s1 + $0x138] sm:$0xff] }
  0x7c   :  { %1623 = vmatpush1.msra.mxu1 %v388_v53  ;;  %1176 = vmatmul.mubr.f32.gmra.mxu0 %v798_v56  ;;  %v107_v53 = vld [vmem:[%s8595_s0 + $0x2b8] sm:$0xff]  ;;  %v902_v56 = vld [vmem:[%s8596_s1 + $0xab0] sm:$0xff] }
  0x7d   :  { %1361 = vmatmul.mubr.f32.gmra.mxu1 %v800_v57  ;;  %1180 = vmatprep.mubr.f32.mxu0 %v816_v58  ;;  %v377_v57 = vmax.f32 %v107_v53, 0.0  ;;  %v410_v58 = vmax.f32 %v140_v54, 0.0  ;;  %v598_v53 = vld [vmem:[%s8596_s1 + $0x130] sm:$0xff]  ;;  %v601_v54 = vld [vmem:[%s8596_s1 + $0x148] sm:$0xff] }
  0x7e   :  { %1365 = vmatprep.mubr.f32.mxu1 %v818_v59  ;;  %1439 = vmatprep.subr.mxu0 %v8602_v0  ;;  %v106_v59 = vld [vmem:[%s8595_s0 + $0x2b0] sm:$0xff] }
  0x7f   :  { %1624 = vmatprep.subr.mxu1 %v8602_v0  ;;  %1440 = vmatpush1.msra.mxu0 %v355_v60  ;;  %v139_v60 = vld [vmem:[%s8595_s0 + $0x3b8] sm:$0xff] }
  0x80   :  { %1625 = vmatpush1.msra.mxu1 %v387_v62  ;;  %1181 = vmatmul.mubr.f32.gmra.mxu0 %v815_v63  ;;  %v920_v62 = vld [vmem:[%s8596_s1 + $0xb40] sm:$0xff]  ;;  %v376_v63 = vmax.f32 %v106_v59, 0.0 }
  0x81   :  { %1366 = vmatmul.mubr.f32.gmra.mxu1 %v817_v1  ;;  %1441 = vmatprep.subr.mxu0 %v8602_v0  ;;  %v409_v1 = vmax.f32 %v139_v60, 0.0  ;;  %v600_v59 = vld [vmem:[%s8596_s1 + $0x140] sm:$0xff] }
  0x82   :  { %1185 = vmatprep.mubr.f32.mxu0 %v833_v2  ;;  %1370 = vmatprep.mubr.f32.mxu1 %v835_v6  ;;  %v105_v2 = vld [vmem:[%s8595_s0 + $0x2a8] sm:$0xff]  ;;  %v160_v60 = vld [vmem:[%s8595_s0 + $0x460] sm:$0xff] }
  0x83   :  { %1442 = vmatpush1.msra.mxu0 %v354_v3  ;;  %1626 = vmatprep.subr.mxu1 %v8602_v0  ;;  %v138_v3 = vld [vmem:[%s8595_s0 + $0x3b0] sm:$0xff]  ;;  %v375_v6 = vmax.f32 %v105_v2, 0.0  ;;  %v193_v2 = vld [vmem:[%s8595_s0 + $0x568] sm:$0xff] }
  0x84   :  { %1443 = vmatprep.subr.mxu0 %v8602_v0  ;;  %1186 = vmatmul.mubr.f32.gmra.mxu0 %v832_v7  ;;  %v408_v7 = vmax.f32 %v138_v3, 0.0  ;;  %v430_v3 = vmax.f32 %v160_v60, 0.0  ;;  %v736_v60 = vld [vmem:[%s8596_s1 + $0x580] sm:$0xff] }
  0x85   :  { %1371 = vmatmul.mubr.f32.gmra.mxu1 %v834_v8  ;;  %1444 = vmatpush2.msra.mxu0 %v385_v9  ;;  %v104_v8 = vld [vmem:[%s8595_s0 + $0x2a0] sm:$0xff]  ;;  %v137_v9 = vld [vmem:[%s8595_s0 + $0x3a8] sm:$0xff] }
  0x86   :  { %1627 = vmatpush1.msra.mxu1 %v386_v10  ;;  %1445 = vmatprep.subr.mxu0 %v8602_v0  ;;  %v935_v10 = vld [vmem:[%s8596_s1 + $0xbb8] sm:$0xff]  ;;  %v374_v12 = vmax.f32 %v104_v8, 0.0  ;;  %v463_v8 = vmax.f32 %v193_v2, 0.0  ;;  %v769_v2 = vld [vmem:[%s8596_s1 + $0x688] sm:$0xff] }
  0x87   :  { %1628 = vmatprep.subr.mxu1 %v8602_v0  ;;  %1190 = vmatprep.mubr.f32.mxu0 %v850_v13  ;;  %v407_v13 = vmax.f32 %v137_v9, 0.0  ;;  %v650_v9 = vld [vmem:[%s8596_s1 + $0x2d0] sm:$0xff] }
  0x88   :  { %1375 = vmatprep.mubr.f32.mxu1 %v852_v14  ;;  %1446 = vmatpush2.msra.mxu0 %v384_v15  ;;  %v103_v14 = vld [vmem:[%s8595_s0 + $0x298] sm:$0xff]  ;;  %v136_v15 = vld [vmem:[%s8595_s0 + $0x3a0] sm:$0xff] }
  0x89   :  { %1629 = vmatpush2.msra.mxu1 %v417_v16  ;;  %1191 = vmatmul.mubr.f32.gmra.mxu0 %v849_v19  ;;  %v934_v16 = vld [vmem:[%s8596_s1 + $0xbb0] sm:$0xff]  ;;  %v373_v18 = vmax.f32 %v103_v14, 0.0  ;;  %v406_v19 = vmax.f32 %v136_v15, 0.0  ;;  %v649_v14 = vld [vmem:[%s8596_s1 + $0x2c8] sm:$0xff]  ;;  %v652_v15 = vld [vmem:[%s8596_s1 + $0x2e0] sm:$0xff] }
  0x8a   :  { %1376 = vmatmul.mubr.f32.gmra.mxu1 %v851_v20  ;;  %1447 = vmatprep.subr.mxu0 %v8602_v0  ;;  %v102_v20 = vld [vmem:[%s8595_s0 + $0x290] sm:$0xff] }
  0x8b   :  { %1630 = vmatprep.subr.mxu1 %v8602_v0  ;;  %1448 = vmatpush2.msra.mxu0 %v383_v21  ;;  %v135_v21 = vld [vmem:[%s8595_s0 + $0x398] sm:$0xff]  ;;  %v372_v24 = vmax.f32 %v102_v20, 0.0 }
  0x8c   :  { %1631 = vmatpush2.msra.mxu1 %v416_v22  ;;  %1449 = vmatprep.subr.mxu0 %v8602_v0  ;;  %v952_v22 = vld [vmem:[%s8596_s1 + $0xc40] sm:$0xff]  ;;  %v651_v20 = vld [vmem:[%s8596_s1 + $0x2d8] sm:$0xff] }
  0x8d   :  { %1632 = vmatprep.subr.mxu1 %v8602_v0  ;;  %1195 = vmatprep.mubr.f32.mxu0 %v867_v25  ;;  %v405_v25 = vmax.f32 %v135_v21, 0.0  ;;  %v157_v21 = vld [vmem:[%s8595_s0 + $0x448] sm:$0xff] }
  0x8e   :  { %1380 = vmatprep.mubr.f32.mxu1 %v869_v26  ;;  %1450 = vmatpush2.msra.mxu0 %v382_v27  ;;  %v101_v26 = vld [vmem:[%s8595_s0 + $0x288] sm:$0xff]  ;;  %v134_v27 = vld [vmem:[%s8595_s0 + $0x390] sm:$0xff] }
  0x8f   :  { %1633 = vmatpush2.msra.mxu1 %v415_v28  ;;  %1196 = vmatmul.mubr.f32.gmra.mxu0 %v866_v31  ;;  %v951_v28 = vld [vmem:[%s8596_s1 + $0xc38] sm:$0xff]  ;;  %v371_v31 = vmax.f32 %v101_v26, 0.0  ;;  %v190_v26 = vld [vmem:[%s8595_s0 + $0x550] sm:$0xff] }
  0x90   :  { %1381 = vmatmul.mubr.f32.gmra.mxu1 %v868_v32  ;;  %1451 = vmatprep.subr.mxu0 %v8602_v0  ;;  %v404_v32 = vmax.f32 %v134_v27, 0.0  ;;  %v427_v27 = vmax.f32 %v157_v21, 0.0  ;;  %v787_v21 = vld [vmem:[%s8596_s1 + $0x718] sm:$0xff] }
  0x91   :  { %1634 = vmatprep.subr.mxu1 %v8602_v0  ;;  %1452 = vmatpush2.msra.mxu0 %v381_v33  ;;  %v133_v33 = vld [vmem:[%s8595_s0 + $0x388] sm:$0xff] }
  0x92   :  { %1635 = vmatpush2.msra.mxu1 %v414_v34  ;;  %1453 = vmatprep.subr.mxu0 %v8602_v0  ;;  %v370_v34 = vmax.f32 %v100_v30, 0.0  ;;  %v683_v30 = vld [vmem:[%s8596_s1 + $0x3d8] sm:$0xff] }
  0x93   :  { %1636 = vmatprep.subr.mxu1 %v8602_v0  ;;  %1200 = vmatprep.mubr.f32.mxu0 %v884_v37  ;;  %v403_v37 = vmax.f32 %v133_v33, 0.0  ;;  %v701_v33 = vld [vmem:[%s8596_s1 + $0x468] sm:$0xff] }
  0x94   :  { %1385 = vmatprep.mubr.f32.mxu1 %v886_v38  ;;  %1454 = vmatpush2.msra.mxu0 %v380_v39  ;;  %v564_v38 = vld [vmem:[%s8596_s1 + $0x20] sm:$0xff]  ;;  %v402_v39 = vmax.f32 %v132_v35, 0.0 }
  0x95   :  { %1637 = vmatpush2.msra.mxu1 %v413_v40  ;;  %1201 = vmatmul.mubr.f32.gmra.mxu0 %v883_v43  ;;  %v567_v40 = vld [vmem:[%s8596_s1 + $0x38] sm:$0xff]  ;;  %v566_v43 = vld [vmem:[%s8596_s1 + $0x30] sm:$0xff] }
  0x96   :  { %1386 = vmatmul.mubr.f32.gmra.mxu1 %v885_v44  ;;  %1455 = vmatprep.subr.mxu0 %v8602_v0  ;;  %v162_v44 = vld [vmem:[%s8595_s0 + $0x470] sm:$0xff] }
  0x97   :  { %1638 = vmatprep.subr.mxu1 %v8602_v0  ;;  %1456 = vmatpush2.msra.mxu0 %v379_v45  ;;  %v581_v45 = vld [vmem:[%s8596_s1 + $0xa8] sm:$0xff] }
  0x98   :  { %1639 = vmatpush2.msra.mxu1 %v412_v46  ;;  %1457 = vmatprep.subr.mxu0 %v8602_v0  ;;  %v584_v46 = vld [vmem:[%s8596_s1 + $0xc0] sm:$0xff] }
  0x99   :  { %1640 = vmatprep.subr.mxu1 %v8602_v0  ;;  %1205 = vmatprep.mubr.f32.mxu0 %v901_v49  ;;  %v195_v49 = vld [vmem:[%s8595_s0 + $0x578] sm:$0xff] }
  0x9a   :  { %1390 = vmatprep.mubr.f32.mxu1 %v903_v50  ;;  %1458 = vmatpush2.msra.mxu0 %v378_v51  ;;  %v432_v50 = vmax.f32 %v162_v44, 0.0  ;;  %v583_v51 = vld [vmem:[%s8596_s1 + $0xb8] sm:$0xff]  ;;  %v702_v44 = vld [vmem:[%s8596_s1 + $0x470] sm:$0xff] }
  0x9b   :  { %1641 = vmatpush2.msra.mxu1 %v411_v52  ;;  %1206 = vmatmul.mubr.f32.gmra.mxu0 %v900_v55  ;;  %v161_v52 = vld [vmem:[%s8595_s0 + $0x468] sm:$0xff]  ;;  %v465_v55 = vmax.f32 %v195_v49, 0.0  ;;  %v735_v49 = vld [vmem:[%s8596_s1 + $0x578] sm:$0xff] }
  0x9c   :  { %1391 = vmatmul.mubr.f32.gmra.mxu1 %v902_v56  ;;  %1459 = vmatprep.subr.mxu0 %v8602_v0  ;;  %v616_v56 = vld [vmem:[%s8596_s1 + $0x1c0] sm:$0xff] }
  0x9d   :  { %1642 = vmatprep.subr.mxu1 %v8602_v0  ;;  %1460 = vmatpush2.msra.mxu0 %v377_v57  ;;  %v194_v57 = vld [vmem:[%s8595_s0 + $0x570] sm:$0xff] }
  0x9e   :  { %1643 = vmatpush2.msra.mxu1 %v410_v58  ;;  %1461 = vmatprep.subr.mxu0 %v8602_v0  ;;  %v431_v58 = vmax.f32 %v161_v52, 0.0  ;;  %v719_v52 = vld [vmem:[%s8596_s1 + $0x4f8] sm:$0xff] }
  0x9f   :  { %1644 = vmatprep.subr.mxu1 %v8602_v0  ;;  %1210 = vmatprep.mubr.f32.mxu0 %v918_v61  ;;  %v615_v61 = vld [vmem:[%s8596_s1 + $0x1b8] sm:$0xff] }
  0xa0   :  { %1395 = vmatprep.mubr.f32.mxu1 %v920_v62  ;;  %1462 = vmatpush2.msra.mxu0 %v376_v63  ;;  %v618_v62 = vld [vmem:[%s8596_s1 + $0x1d0] sm:$0xff]  ;;  %v464_v63 = vmax.f32 %v194_v57, 0.0  ;;  %v752_v57 = vld [vmem:[%s8596_s1 + $0x600] sm:$0xff] }
  0xa1   :  { %1645 = vmatpush2.msra.mxu1 %v409_v1  ;;  %1211 = vmatmul.mubr.f32.gmra.mxu0 %v917_v4  ;;  %v633_v1 = vld [vmem:[%s8596_s1 + $0x248] sm:$0xff] }
  0xa2   :  { %1396 = vmatmul.mubr.f32.gmra.mxu1 %v919_v5  ;;  %1463 = vmatprep.subr.mxu0 %v8602_v0  ;;  %v617_v4 = vld [vmem:[%s8596_s1 + $0x1c8] sm:$0xff]  ;;  %v159_v5 = vld [vmem:[%s8595_s0 + $0x458] sm:$0xff] }
  0xa3   :  { %1646 = vmatprep.subr.mxu1 %v8602_v0  ;;  %1464 = vmatpush2.msra.mxu0 %v375_v6  ;;  %v632_v6 = vld [vmem:[%s8596_s1 + $0x240] sm:$0xff] }
  0xa4   :  { %1647 = vmatpush2.msra.mxu1 %v408_v7  ;;  %1465 = vmatprep.subr.mxu0 %v8602_v0  ;;  %v635_v7 = vld [vmem:[%s8596_s1 + $0x258] sm:$0xff] }
  0xa5   :  { %1648 = vmatprep.subr.mxu1 %v8602_v0  ;;  %1215 = vmatprep.mubr.f32.mxu0 %v935_v10  ;;  %v192_v10 = vld [vmem:[%s8595_s0 + $0x560] sm:$0xff] }
  0xa6   :  { %1400 = vmatprep.mubr.f32.mxu1 %v937_v11  ;;  %1466 = vmatpush2.msra.mxu0 %v374_v12  ;;  %v429_v11 = vmax.f32 %v159_v5, 0.0  ;;  %v634_v12 = vld [vmem:[%s8596_s1 + $0x250] sm:$0xff]  ;;  %v753_v5 = vld [vmem:[%s8596_s1 + $0x608] sm:$0xff] }
  0xa7   :  { %1649 = vmatpush2.msra.mxu1 %v407_v13  ;;  %1216 = vmatmul.mubr.f32.gmra.mxu0 %v934_v16  ;;  %v158_v13 = vld [vmem:[%s8595_s0 + $0x450] sm:$0xff]  ;;  %v462_v16 = vmax.f32 %v192_v10, 0.0 }
  0xa8   :  { %1401 = vmatmul.mubr.f32.gmra.mxu1 %v936_v17  ;;  %1467 = vmatprep.subr.mxu0 %v8602_v0  ;;  %v667_v17 = vld [vmem:[%s8596_s1 + $0x358] sm:$0xff]  ;;  %v786_v10 = vld [vmem:[%s8596_s1 + $0x710] sm:$0xff] }
  0xa9   :  { %1650 = vmatprep.subr.mxu1 %v8602_v0  ;;  %1468 = vmatpush2.msra.mxu0 %v373_v18  ;;  %v191_v18 = vld [vmem:[%s8595_s0 + $0x558] sm:$0xff] }
  0xaa   :  { %1651 = vmatpush2.msra.mxu1 %v406_v19  ;;  %1469 = vmatprep.subr.mxu0 %v8602_v0  ;;  %v428_v19 = vmax.f32 %v158_v13, 0.0  ;;  %v770_v13 = vld [vmem:[%s8596_s1 + $0x690] sm:$0xff] }
  0xab   :  { %1652 = vmatprep.subr.mxu1 %v8602_v0  ;;  %1220 = vmatprep.mubr.f32.mxu0 %v952_v22  ;;  %v666_v22 = vld [vmem:[%s8596_s1 + $0x350] sm:$0xff] }
  0xac   :  { %1405 = vmatprep.mubr.f32.mxu1 %v954_v23  ;;  %1470 = vmatpush2.msra.mxu0 %v372_v24  ;;  %v669_v23 = vld [vmem:[%s8596_s1 + $0x368] sm:$0xff]  ;;  %v461_v24 = vmax.f32 %v191_v18, 0.0  ;;  %v803_v18 = vld [vmem:[%s8596_s1 + $0x798] sm:$0xff] }
  0xad   :  { %1653 = vmatpush2.msra.mxu1 %v405_v25  ;;  %1221 = vmatmul.mubr.f32.gmra.mxu0 %v951_v28  ;;  %v684_v25 = vld [vmem:[%s8596_s1 + $0x3e0] sm:$0xff] }
  0xae   :  { %1406 = vmatmul.mubr.f32.gmra.mxu1 %v953_v29  ;;  %1471 = vmatprep.subr.mxu0 %v8602_v0  ;;  %v668_v28 = vld [vmem:[%s8596_s1 + $0x360] sm:$0xff] }
  0xaf   :  { %1654 = vmatprep.subr.mxu1 %v8602_v0  ;;  %1472 = vmatpush2.msra.mxu0 %v371_v31  ;;  %v156_v29 = vld [vmem:[%s8595_s0 + $0x440] sm:$0xff]  ;;  %v686_v31 = vld [vmem:[%s8596_s1 + $0x3f0] sm:$0xff] }
  0xb0   :  { %1655 = vmatpush2.msra.mxu1 %v404_v32  ;;  %1473 = vmatprep.subr.mxu0 %v8602_v0  ;;  %v460_v32 = vmax.f32 %v190_v26, 0.0  ;;  %v426_v35 = vmax.f32 %v156_v29, 0.0  ;;  %v820_v26 = vld [vmem:[%s8596_s1 + $0x820] sm:$0xff] }
  0xb1   :  { %1656 = vmatprep.subr.mxu1 %v8602_v0  ;;  %1474 = vmatpush2.msra.mxu0 %v370_v34  ;;  %v189_v34 = vld [vmem:[%s8595_s0 + $0x548] sm:$0xff]  ;;  %v804_v29 = vld [vmem:[%s8596_s1 + $0x7a0] sm:$0xff] }
  0xb2   :  { %1475 = vmatprep.mubr.f32.mxu0 %v565_v36  ;;  %1657 = vmatpush2.msra.mxu1 %v403_v37  ;;  %v685_v36 = vld [vmem:[%s8596_s1 + $0x3e8] sm:$0xff]  ;;  %v155_v37 = vld [vmem:[%s8595_s0 + $0x438] sm:$0xff] }
  0xb3   :  { %1476 = vmatmul.mubr.f32.vlgmr.msra.gmra.mxu0 %v564_v38  ;;  %1658 = vmatprep.subr.mxu1 %v8602_v0  ;;  %v700_v38 = vld [vmem:[%s8596_s1 + $0x460] sm:$0xff] }
  0xb4   :  { %1660 = vmatprep.mubr.f32.mxu1 %v567_v40  ;;  %1659 = vmatpush2.msra.mxu1 %v402_v39  ;;  %v703_v39 = vld [vmem:[%s8596_s1 + $0x478] sm:$0xff]  ;;  %v459_v40 = vmax.f32 %v189_v34, 0.0  ;;  %v181_v34 = vld [vmem:[%s8595_s0 + $0x508] sm:$0xff] }
  0xb5   :  { %1480 = vmatprep.mubr.f32.mxu0 %v582_v42  ;;  %1661 = vmatmul.mubr.f32.vlgmr.msra.gmra.mxu1 %v566_v43  ;;  %v188_v42 = vld [vmem:[%s8595_s0 + $0x540] sm:$0xff]  ;;  %v425_v43 = vmax.f32 %v155_v37, 0.0  ;;  %v179_v37 = vld [vmem:[%s8595_s0 + $0x4f8] sm:$0xff] }
  0xb6   :  { %1781 = vmatprep.subr.mxu0 %v8602_v0  ;;  %1665 = vmatprep.mubr.f32.mxu1 %v584_v46  ;;  %v717_v46 = vld [vmem:[%s8596_s1 + $0x4e8] sm:$0xff] }
  0xb7   :  { %1481 = vmatmul.mubr.f32.gmra.mxu0 %v581_v45  ;;  %1966 = vmatprep.subr.mxu1 %v8602_v0  ;;  %v154_v45 = vld [vmem:[%s8595_s0 + $0x430] sm:$0xff] }
  0xb8   :  { %1485 = vmatprep.mubr.f32.mxu0 %v599_v48  ;;  %1782 = vmatpush1.msra.mxu0 %v433_v47  ;;  %v720_v47 = vld [vmem:[%s8596_s1 + $0x500] sm:$0xff]  ;;  %v458_v48 = vmax.f32 %v188_v42, 0.0  ;;  %v449_v42 = vmax.f32 %v179_v37, 0.0 }
  0xb9   :  { %1783 = vmatprep.subr.mxu0 %v8602_v0  ;;  %1666 = vmatmul.mubr.f32.gmra.mxu1 %v583_v51  ;;  %v424_v51 = vmax.f32 %v154_v45, 0.0 }
  0xba   :  { %1784 = vmatpush1.msra.mxu0 %v432_v50  ;;  %1670 = vmatprep.mubr.f32.mxu1 %v601_v54  ;;  %v187_v50 = vld [vmem:[%s8595_s0 + $0x538] sm:$0xff]  ;;  %v734_v54 = vld [vmem:[%s8596_s1 + $0x570] sm:$0xff] }
  0xbb   :  { %1486 = vmatmul.mubr.f32.gmra.mxu0 %v598_v53  ;;  %1967 = vmatpush1.msra.mxu1 %v465_v55  ;;  %v153_v53 = vld [vmem:[%s8595_s0 + $0x428] sm:$0xff] }
  0xbc   :  { %1490 = vmatprep.mubr.f32.mxu0 %v616_v56  ;;  %1785 = vmatprep.subr.mxu0 %v8602_v0  ;;  %v737_v55 = vld [vmem:[%s8596_s1 + $0x588] sm:$0xff]  ;;  %v457_v56 = vmax.f32 %v187_v50, 0.0  ;;  %v854_v50 = vld [vmem:[%s8596_s1 + $0x930] sm:$0xff] }
  0xbd   :  { %1968 = vmatprep.subr.mxu1 %v8602_v0  ;;  %1671 = vmatmul.mubr.f32.gmra.mxu1 %v600_v59  ;;  %v423_v59 = vmax.f32 %v153_v53, 0.0  ;;  %v853_v53 = vld [vmem:[%s8596_s1 + $0x928] sm:$0xff] }
  0xbe   :  { %1786 = vmatpush1.msra.mxu0 %v431_v58  ;;  %1675 = vmatprep.mubr.f32.mxu1 %v618_v62  ;;  %v186_v58 = vld [vmem:[%s8595_s0 + $0x530] sm:$0xff]  ;;  %v751_v62 = vld [vmem:[%s8596_s1 + $0x5f8] sm:$0xff] }
  0xbf   :  { %1491 = vmatmul.mubr.f32.gmra.mxu0 %v615_v61  ;;  %1969 = vmatpush1.msra.mxu1 %v464_v63  ;;  %v152_v61 = vld [vmem:[%s8595_s0 + $0x420] sm:$0xff]  ;;  %v754_v63 = vld [vmem:[%s8596_s1 + $0x610] sm:$0xff] }
  0xc0   :  { %1495 = vmatprep.mubr.f32.mxu0 %v633_v1  ;;  %1787 = vmatprep.subr.mxu0 %v8602_v0  ;;  %v456_v1 = vmax.f32 %v186_v58, 0.0  ;;  %v209_v58 = vld [vmem:[%s8595_s0 + $0x5e8] sm:$0xff] }
  0xc1   :  { %1970 = vmatprep.subr.mxu1 %v8602_v0  ;;  %1676 = vmatmul.mubr.f32.gmra.mxu1 %v617_v4  ;;  %v422_v4 = vmax.f32 %v152_v61, 0.0  ;;  %v175_v61 = vld [vmem:[%s8595_s0 + $0x4d8] sm:$0xff] }
  0xc2   :  { %1788 = vmatpush1.msra.mxu0 %v430_v3  ;;  %1680 = vmatprep.mubr.f32.mxu1 %v635_v7  ;;  %v185_v3 = vld [vmem:[%s8595_s0 + $0x528] sm:$0xff]  ;;  %v768_v7 = vld [vmem:[%s8596_s1 + $0x680] sm:$0xff] }
  0xc3   :  { %1496 = vmatmul.mubr.f32.gmra.mxu0 %v632_v6  ;;  %1971 = vmatpush1.msra.mxu1 %v463_v8  ;;  %v151_v6 = vld [vmem:[%s8595_s0 + $0x418] sm:$0xff] }
  0xc4   :  { %1500 = vmatprep.mubr.f32.mxu0 %v650_v9  ;;  %1789 = vmatprep.subr.mxu0 %v8602_v0  ;;  %v771_v8 = vld [vmem:[%s8596_s1 + $0x698] sm:$0xff]  ;;  %v455_v9 = vmax.f32 %v185_v3, 0.0  ;;  %v445_v3 = vmax.f32 %v175_v61, 0.0 }
  0xc5   :  { %1972 = vmatprep.subr.mxu1 %v8602_v0  ;;  %1681 = vmatmul.mubr.f32.gmra.mxu1 %v634_v12  ;;  %v421_v12 = vmax.f32 %v151_v6, 0.0  ;;  %v923_v61 = vld [vmem:[%s8596_s1 + $0xb58] sm:$0xff] }
  0xc6   :  { %1790 = vmatpush1.msra.mxu0 %v429_v11  ;;  %1685 = vmatprep.mubr.f32.mxu1 %v652_v15  ;;  %v184_v11 = vld [vmem:[%s8595_s0 + $0x520] sm:$0xff]  ;;  %v785_v15 = vld [vmem:[%s8596_s1 + $0x708] sm:$0xff] }
  0xc7   :  { %1501 = vmatmul.mubr.f32.gmra.mxu0 %v649_v14  ;;  %1973 = vmatpush1.msra.mxu1 %v462_v16  ;;  %v150_v14 = vld [vmem:[%s8595_s0 + $0x410] sm:$0xff]  ;;  %v788_v16 = vld [vmem:[%s8596_s1 + $0x720] sm:$0xff] }
  0xc8   :  { %1505 = vmatprep.mubr.f32.mxu0 %v667_v17  ;;  %1791 = vmatprep.subr.mxu0 %v8602_v0  ;;  %v454_v17 = vmax.f32 %v184_v11, 0.0  ;;  %v888_v11 = vld [vmem:[%s8596_s1 + $0xa40] sm:$0xff] }
  0xc9   :  { %1974 = vmatprep.subr.mxu1 %v8602_v0  ;;  %1686 = vmatmul.mubr.f32.gmra.mxu1 %v651_v20  ;;  %v420_v20 = vmax.f32 %v150_v14, 0.0  ;;  %v887_v14 = vld [vmem:[%s8596_s1 + $0xa38] sm:$0xff] }
  0xca   :  { %1792 = vmatpush1.msra.mxu0 %v428_v19  ;;  %1690 = vmatprep.mubr.f32.mxu1 %v669_v23  ;;  %v183_v19 = vld [vmem:[%s8595_s0 + $0x518] sm:$0xff]  ;;  %v802_v23 = vld [vmem:[%s8596_s1 + $0x790] sm:$0xff] }
  0xcb   :  { %1506 = vmatmul.mubr.f32.gmra.mxu0 %v666_v22  ;;  %1975 = vmatpush1.msra.mxu1 %v461_v24  ;;  %v149_v22 = vld [vmem:[%s8595_s0 + $0x408] sm:$0xff] }
  0xcc   :  { %1510 = vmatprep.mubr.f32.mxu0 %v684_v25  ;;  %1793 = vmatprep.subr.mxu0 %v8602_v0  ;;  %v805_v24 = vld [vmem:[%s8596_s1 + $0x7a8] sm:$0xff]  ;;  %v453_v25 = vmax.f32 %v183_v19, 0.0 }
  0xcd   :  { %1976 = vmatprep.subr.mxu1 %v8602_v0  ;;  %1691 = vmatmul.mubr.f32.gmra.mxu1 %v668_v28  ;;  %v419_v28 = vmax.f32 %v149_v22, 0.0  ;;  %v205_v19 = vld [vmem:[%s8595_s0 + $0x5c8] sm:$0xff] }
  0xce   :  { %1794 = vmatpush1.msra.mxu0 %v427_v27  ;;  %1695 = vmatprep.mubr.f32.mxu1 %v686_v31  ;;  %v182_v27 = vld [vmem:[%s8595_s0 + $0x510] sm:$0xff]  ;;  %v819_v31 = vld [vmem:[%s8596_s1 + $0x818] sm:$0xff]  ;;  %v889_v22 = vld [vmem:[%s8596_s1 + $0xa48] sm:$0xff] }
  0xcf   :  { %1511 = vmatmul.mubr.f32.gmra.mxu0 %v683_v30  ;;  %1977 = vmatpush1.msra.mxu1 %v460_v32  ;;  %v148_v30 = vld [vmem:[%s8595_s0 + $0x400] sm:$0xff]  ;;  %v822_v32 = vld [vmem:[%s8596_s1 + $0x830] sm:$0xff] }
  0xd0   :  { %1515 = vmatprep.mubr.f32.mxu0 %v701_v33  ;;  %1795 = vmatprep.subr.mxu0 %v8602_v0  ;;  %v452_v33 = vmax.f32 %v182_v27, 0.0  ;;  %v475_v27 = vmax.f32 %v205_v19, 0.0 }
  0xd1   :  { %1978 = vmatprep.subr.mxu1 %v8602_v0  ;;  %1696 = vmatmul.mubr.f32.gmra.mxu1 %v685_v36  ;;  %v418_v36 = vmax.f32 %v148_v30, 0.0 }
  0xd2   :  { %1796 = vmatpush1.msra.mxu0 %v426_v35  ;;  %1700 = vmatprep.mubr.f32.mxu1 %v703_v39  ;;  %v837_v35 = vld [vmem:[%s8596_s1 + $0x8a8] sm:$0xff]  ;;  %v451_v39 = vmax.f32 %v181_v34, 0.0 }
  0xd3   :  { %1516 = vmatmul.mubr.f32.gmra.mxu0 %v700_v38  ;;  %1979 = vmatpush1.msra.mxu1 %v459_v40  ;;  %v821_v38 = vld [vmem:[%s8596_s1 + $0x828] sm:$0xff]  ;;  %v180_v40 = vld [vmem:[%s8595_s0 + $0x500] sm:$0xff] }
  0xd4   :  { %1520 = vmatprep.mubr.f32.mxu0 %v718_v41  ;;  %1797 = vmatprep.subr.mxu0 %v8602_v0  ;;  %v836_v41 = vld [vmem:[%s8596_s1 + $0x8a0] sm:$0xff]  ;;  %v450_v45 = vmax.f32 %v180_v40, 0.0 }
  0xd5   :  { %1980 = vmatprep.subr.mxu1 %v8602_v0  ;;  %1701 = vmatmul.mubr.f32.gmra.mxu1 %v702_v44  ;;  %v839_v44 = vld [vmem:[%s8596_s1 + $0x8b8] sm:$0xff] }
  0xd6   :  { %1798 = vmatpush1.msra.mxu0 %v425_v43  ;;  %1705 = vmatprep.mubr.f32.mxu1 %v720_v47  ;;  %v178_v43 = vld [vmem:[%s8595_s0 + $0x4f0] sm:$0xff] }
  0xd7   :  { %1521 = vmatmul.mubr.f32.gmra.mxu0 %v717_v46  ;;  %1981 = vmatpush1.msra.mxu1 %v458_v48  ;;  %v211_v46 = vld [vmem:[%s8595_s0 + $0x5f8] sm:$0xff]  ;;  %v838_v47 = vld [vmem:[%s8596_s1 + $0x8b0] sm:$0xff]  ;;  %v448_v48 = vmax.f32 %v178_v43, 0.0 }
  0xd8   :  { %1525 = vmatprep.mubr.f32.mxu0 %v735_v49  ;;  %1799 = vmatprep.subr.mxu0 %v8602_v0  ;;  %v177_v49 = vld [vmem:[%s8595_s0 + $0x4e8] sm:$0xff] }
  0xd9   :  { %1982 = vmatprep.subr.mxu1 %v8602_v0  ;;  %1706 = vmatmul.mubr.f32.gmra.mxu1 %v719_v52  ;;  %v210_v52 = vld [vmem:[%s8595_s0 + $0x5f0] sm:$0xff] }
  0xda   :  { %1800 = vmatpush1.msra.mxu0 %v424_v51  ;;  %1710 = vmatprep.mubr.f32.mxu1 %v737_v55  ;;  %v481_v51 = vmax.f32 %v211_v46, 0.0  ;;  %v176_v55 = vld [vmem:[%s8595_s0 + $0x4e0] sm:$0xff] }
  0xdb   :  { %1526 = vmatmul.mubr.f32.gmra.mxu0 %v734_v54  ;;  %1983 = vmatpush1.msra.mxu1 %v457_v56  ;;  %v447_v54 = vmax.f32 %v177_v49, 0.0  ;;  %v856_v56 = vld [vmem:[%s8596_s1 + $0x940] sm:$0xff] }
  0xdc   :  { %1530 = vmatprep.mubr.f32.mxu0 %v752_v57  ;;  %1801 = vmatprep.subr.mxu0 %v8602_v0  ;;  %v480_v57 = vmax.f32 %v210_v52, 0.0 }
  0xdd   :  { %1984 = vmatprep.subr.mxu1 %v8602_v0  ;;  %1711 = vmatmul.mubr.f32.gmra.mxu1 %v736_v60  ;;  %v446_v60 = vmax.f32 %v176_v55, 0.0 }
  0xde   :  { %1802 = vmatpush1.msra.mxu0 %v423_v59  ;;  %1715 = vmatprep.mubr.f32.mxu1 %v754_v63  ;;  %v855_v59 = vld [vmem:[%s8596_s1 + $0x938] sm:$0xff]  ;;  %v479_v63 = vmax.f32 %v209_v58, 0.0  ;;  %v201_v58 = vld [vmem:[%s8595_s0 + $0x5a8] sm:$0xff] }
  0xdf   :  { %1531 = vmatmul.mubr.f32.gmra.mxu0 %v751_v62  ;;  %1985 = vmatpush1.msra.mxu1 %v456_v1  ;;  %v871_v62 = vld [vmem:[%s8596_s1 + $0x9b8] sm:$0xff]  ;;  %v208_v1 = vld [vmem:[%s8595_s0 + $0x5e0] sm:$0xff] }
  0xe0   :  { %1535 = vmatprep.mubr.f32.mxu0 %v769_v2  ;;  %1803 = vmatprep.subr.mxu0 %v8602_v0  ;;  %v870_v2 = vld [vmem:[%s8596_s1 + $0x9b0] sm:$0xff]  ;;  %v478_v6 = vmax.f32 %v208_v1, 0.0 }
  0xe1   :  { %1986 = vmatprep.subr.mxu1 %v8602_v0  ;;  %1716 = vmatmul.mubr.f32.gmra.mxu1 %v753_v5  ;;  %v873_v5 = vld [vmem:[%s8596_s1 + $0x9c8] sm:$0xff] }
  0xe2   :  { %1804 = vmatpush1.msra.mxu0 %v422_v4  ;;  %1720 = vmatprep.mubr.f32.mxu1 %v771_v8  ;;  %v174_v4 = vld [vmem:[%s8595_s0 + $0x4d0] sm:$0xff]  ;;  %v872_v8 = vld [vmem:[%s8596_s1 + $0x9c0] sm:$0xff] }
  0xe3   :  { %1536 = vmatmul.mubr.f32.gmra.mxu0 %v768_v7  ;;  %1987 = vmatpush1.msra.mxu1 %v455_v9  ;;  %v207_v7 = vld [vmem:[%s8595_s0 + $0x5d8] sm:$0xff]  ;;  %v444_v9 = vmax.f32 %v174_v4, 0.0  ;;  %v200_v4 = vld [vmem:[%s8595_s0 + $0x5a0] sm:$0xff] }
  0xe4   :  { %1540 = vmatprep.mubr.f32.mxu0 %v786_v10  ;;  %1805 = vmatprep.subr.mxu0 %v8602_v0  ;;  %v173_v10 = vld [vmem:[%s8595_s0 + $0x4c8] sm:$0xff] }
  0xe5   :  { %1988 = vmatprep.subr.mxu1 %v8602_v0  ;;  %1721 = vmatmul.mubr.f32.gmra.mxu1 %v770_v13  ;;  %v206_v13 = vld [vmem:[%s8595_s0 + $0x5d0] sm:$0xff] }
  0xe6   :  { %1806 = vmatpush1.msra.mxu0 %v421_v12  ;;  %1725 = vmatprep.mubr.f32.mxu1 %v788_v16  ;;  %v477_v12 = vmax.f32 %v207_v7, 0.0  ;;  %v172_v16 = vld [vmem:[%s8595_s0 + $0x4c0] sm:$0xff]  ;;  %v938_v7 = vld [vmem:[%s8596_s1 + $0xbd0] sm:$0xff] }
  0xe7   :  { %1541 = vmatmul.mubr.f32.gmra.mxu0 %v785_v15  ;;  %1989 = vmatpush1.msra.mxu1 %v454_v17  ;;  %v443_v15 = vmax.f32 %v173_v10, 0.0  ;;  %v890_v17 = vld [vmem:[%s8596_s1 + $0xa50] sm:$0xff] }
  0xe8   :  { %1545 = vmatprep.mubr.f32.mxu0 %v803_v18  ;;  %1807 = vmatprep.subr.mxu0 %v8602_v0  ;;  %v476_v18 = vmax.f32 %v206_v13, 0.0  ;;  %v470_v13 = vmax.f32 %v200_v4, 0.0  ;;  %v259_v4 = vld [vmem:[%s8595_s0 + $0x778] sm:$0xff] }
  0xe9   :  { %1990 = vmatprep.subr.mxu1 %v8602_v0  ;;  %1726 = vmatmul.mubr.f32.gmra.mxu1 %v787_v21 }
  0xea   :  { %1808 = vmatpush1.msra.mxu0 %v420_v20  ;;  %1730 = vmatprep.mubr.f32.mxu1 %v805_v24  ;;  %v171_v24 = vld [vmem:[%s8595_s0 + $0x4b8] sm:$0xff] }
  0xeb   :  { %1546 = vmatmul.mubr.f32.gmra.mxu0 %v802_v23  ;;  %1991 = vmatpush1.msra.mxu1 %v453_v25  ;;  %v442_v23 = vmax.f32 %v172_v16, 0.0 }
  0xec   :  { %1550 = vmatprep.mubr.f32.mxu0 %v820_v26  ;;  %1809 = vmatprep.subr.mxu0 %v8602_v0  ;;  %v905_v26 = vld [vmem:[%s8596_s1 + $0xac8] sm:$0xff] }
  0xed   :  { %1992 = vmatprep.subr.mxu1 %v8602_v0  ;;  %1731 = vmatmul.mubr.f32.gmra.mxu1 %v804_v29 }
  0xee   :  { %1810 = vmatpush1.msra.mxu0 %v419_v28  ;;  %1735 = vmatprep.mubr.f32.mxu1 %v822_v32  ;;  %v204_v28 = vld [vmem:[%s8595_s0 + $0x5c0] sm:$0xff]  ;;  %v441_v32 = vmax.f32 %v171_v24, 0.0 }
  0xef   :  { %1551 = vmatmul.mubr.f32.gmra.mxu0 %v819_v31  ;;  %1993 = vmatpush1.msra.mxu1 %v452_v33  ;;  %v904_v31 = vld [vmem:[%s8596_s1 + $0xac0] sm:$0xff]  ;;  %v170_v33 = vld [vmem:[%s8595_s0 + $0x4b0] sm:$0xff]  ;;  %v474_v37 = vmax.f32 %v204_v28, 0.0 }
  0xf0   :  { %1811 = vmatprep.subr.mxu0 %v8602_v0  ;;  %1994 = vmatprep.subr.mxu1 %v8602_v0  ;;  %v440_v43 = vmax.f32 %v170_v33, 0.0  ;;  %v958_v33 = vld [vmem:[%s8596_s1 + $0xc70] sm:$0xff] }
  0xf1   :  { %1555 = vmatprep.mubr.f32.mxu0 %v837_v35  ;;  %1736 = vmatmul.mubr.f32.gmra.mxu1 %v821_v38  ;;  %v203_v38 = vld [vmem:[%s8595_s0 + $0x5b8] sm:$0xff] }
  0xf2   :  { %1812 = vmatpush1.msra.mxu0 %v418_v36  ;;  %1995 = vmatpush1.msra.mxu1 %v451_v39  ;;  %v907_v36 = vld [vmem:[%s8596_s1 + $0xad8] sm:$0xff]  ;;  %v473_v46 = vmax.f32 %v203_v38, 0.0  ;;  %v957_v38 = vld [vmem:[%s8596_s1 + $0xc68] sm:$0xff] }
  0xf3   :  { %1556 = vmatmul.mubr.f32.gmra.mxu0 %v836_v41  ;;  %1813 = vmatprep.subr.mxu0 %v8602_v0 }
  0xf4   :  { %1996 = vmatprep.subr.mxu1 %v8602_v0  ;;  %1740 = vmatprep.mubr.f32.mxu1 %v839_v44  ;;  %v169_v44 = vld [vmem:[%s8595_s0 + $0x4a8] sm:$0xff] }
  0xf5   :  { %1814 = vmatpush2.msra.mxu0 %v449_v42  ;;  %1997 = vmatpush1.msra.mxu1 %v450_v45  ;;  %v906_v42 = vld [vmem:[%s8596_s1 + $0xad0] sm:$0xff]  ;;  %v439_v52 = vmax.f32 %v169_v44, 0.0 }
  0xf6   :  { %1815 = vmatprep.subr.mxu0 %v8602_v0  ;;  %1741 = vmatmul.mubr.f32.gmra.mxu1 %v838_v47  ;;  %v922_v45 = vld [vmem:[%s8596_s1 + $0xb50] sm:$0xff] }
  0xf7   :  { %1998 = vmatprep.subr.mxu1 %v8602_v0  ;;  %1560 = vmatprep.mubr.f32.mxu0 %v854_v50  ;;  %v202_v47 = vld [vmem:[%s8595_s0 + $0x5b0] sm:$0xff]  ;;  %v921_v50 = vld [vmem:[%s8596_s1 + $0xb48] sm:$0xff] }
  0xf8   :  { %1816 = vmatpush2.msra.mxu0 %v448_v48  ;;  %1999 = vmatpush2.msra.mxu1 %v481_v51 }
  0xf9   :  { %1561 = vmatmul.mubr.f32.gmra.mxu0 %v853_v53  ;;  %1817 = vmatprep.subr.mxu0 %v8602_v0  ;;  %v168_v53 = vld [vmem:[%s8595_s0 + $0x4a0] sm:$0xff] }
  0xfa   :  { %2000 = vmatprep.subr.mxu1 %v8602_v0  ;;  %1745 = vmatprep.mubr.f32.mxu1 %v856_v56  ;;  %v924_v56 = vld [vmem:[%s8596_s1 + $0xb60] sm:$0xff] }
  0xfb   :  { %1818 = vmatpush2.msra.mxu0 %v447_v54  ;;  %2001 = vmatpush2.msra.mxu1 %v480_v57  ;;  %v472_v57 = vmax.f32 %v202_v47, 0.0  ;;  %v568_v47 = vld [vmem:[%s8596_s1 + $0x40] sm:$0xff] }
  0xfc   :  { %1819 = vmatprep.subr.mxu0 %v8602_v0  ;;  %1746 = vmatmul.mubr.f32.gmra.mxu1 %v855_v59 }
  0xfd   :  { %2002 = vmatprep.subr.mxu1 %v8602_v0  ;;  %1565 = vmatprep.mubr.f32.mxu0 %v871_v62  ;;  %v438_v62 = vmax.f32 %v168_v53, 0.0  ;;  %v227_v53 = vld [vmem:[%s8595_s0 + $0x678] sm:$0xff] }
  0xfe   :  { %1820 = vmatpush2.msra.mxu0 %v446_v60  ;;  %2003 = vmatpush2.msra.mxu1 %v479_v63  ;;  %v167_v63 = vld [vmem:[%s8595_s0 + $0x498] sm:$0xff] }
  0xff   :  { %1566 = vmatmul.mubr.f32.gmra.mxu0 %v870_v2  ;;  %1821 = vmatprep.subr.mxu0 %v8602_v0  ;;  %v939_v2 = vld [vmem:[%s8596_s1 + $0xbd8] sm:$0xff] }
 0x100   :  { %2004 = vmatprep.subr.mxu1 %v8602_v0  ;;  %1750 = vmatprep.mubr.f32.mxu1 %v873_v5 }
 0x101   :  { %1822 = vmatpush2.msra.mxu0 %v445_v3  ;;  %2005 = vmatpush2.msra.mxu1 %v478_v6  ;;  %v471_v3 = vmax.f32 %v201_v58, 0.0 }
 0x102   :  { %1823 = vmatprep.subr.mxu0 %v8602_v0  ;;  %1751 = vmatmul.mubr.f32.gmra.mxu1 %v872_v8  ;;  %v437_v8 = vmax.f32 %v167_v63, 0.0  ;;  %v603_v63 = vld [vmem:[%s8596_s1 + $0x158] sm:$0xff] }
 0x103   :  { %2006 = vmatprep.subr.mxu1 %v8602_v0  ;;  %1570 = vmatprep.mubr.f32.mxu0 %v888_v11 }
 0x104   :  { %1824 = vmatpush2.msra.mxu0 %v444_v9  ;;  %2007 = vmatpush2.msra.mxu1 %v477_v12  ;;  %v1107_v20 = vpop.f32.mrf.mxu0  ;;  %v166_v9 = vld [vmem:[%s8595_s0 + $0x490] sm:$0xff]  ;;  %v941_v12 = vld [vmem:[%s8596_s1 + $0xbe8] sm:$0xff] }
 0x105   :  { %1571 = vmatmul.mubr.f32.gmra.mxu0 %v887_v14  ;;  %v1292_v21 = vpop.f32.mrf.mxu1  ;;  %1825 = vmatprep.subr.mxu0 %v8602_v0  ;;  %v199_v14 = vld [vmem:[%s8595_s0 + $0x598] sm:$0xff]  ;;  %v436_v19 = vmax.f32 %v166_v9, 0.0 }
 0x106   :  { %2008 = vmatprep.subr.mxu1 %v8602_v0  ;;  %v5974_v25 = vadd.f32 %v1292_v21, %v1107_v20  ;;  %1755 = vmatprep.mubr.f32.mxu1 %v890_v17  ;;  %v1109_v29 = vpop.f32.mrf.mxu0  ;;  %v165_v20 = vld [vmem:[%s8595_s0 + $0x488] sm:$0xff]  ;;  %v956_v21 = vld [vmem:[%s8596_s1 + $0xc60] sm:$0xff] }
 0x107   :  { %1826 = vmatpush2.msra.mxu0 %v443_v15  ;;  %v1294_v30 = vpop.f32.mrf.mxu1  ;;  %2009 = vmatpush2.msra.mxu1 %v476_v18  ;;  %v940_v18 = vld [vmem:[%s8596_s1 + $0xbe0] sm:$0xff]  ;;  %v435_v29 = vmax.f32 %v165_v20, 0.0 }
 0x108   :  { %1827 = vmatprep.subr.mxu0 %v8602_v0  ;;  %1756 = vmatmul.mubr.f32.gmra.mxu1 %v889_v22  ;;  %v1112_v34 = vpop.f32.mrf.mxu0  ;;  %v469_v22 = vmax.f32 %v199_v14, 0.0  ;;  %v164_v30 = vld [vmem:[%s8595_s0 + $0x480] sm:$0xff] }
 0x109   :  { %2010 = vmatprep.subr.mxu1 %v8602_v0  ;;  %v1297_v35 = vpop.f32.mrf.mxu1  ;;  %1575 = vmatprep.mubr.f32.mxu0 %v905_v26  ;;  %v620_v14 = vld [vmem:[%s8596_s1 + $0x1e0] sm:$0xff] }
 0x10a   :  { %1828 = vmatpush2.msra.mxu0 %v442_v23  ;;  %v5996_v39 = vadd.f32 %v1297_v35, %v1112_v34  ;;  %2011 = vmatpush2.msra.mxu1 %v475_v27  ;;  %v1114_v40 = vpop.f32.mrf.mxu0  ;;  %v198_v23 = vld [vmem:[%s8595_s0 + $0x590] sm:$0xff]  ;;  %v955_v27 = vld [vmem:[%s8596_s1 + $0xc58] sm:$0xff]  ;;  %v197_v35 = vld [vmem:[%s8595_s0 + $0x588] sm:$0xff] }
 0x10b   :  { %1576 = vmatmul.mubr.f32.gmra.mxu0 %v904_v31  ;;  %v1299_v41 = vpop.f32.mrf.mxu1  ;;  %1829 = vmatprep.subr.mxu0 %v8602_v0  ;;  %v468_v34 = vmax.f32 %v198_v23, 0.0  ;;  %v434_v40 = vmax.f32 %v164_v30, 0.0  ;;  %v467_v44 = vmax.f32 %v197_v35, 0.0  ;;  %v637_v30 = vld [vmem:[%s8596_s1 + $0x268] sm:$0xff] }
 0x10c   :  { %2012 = vmatprep.subr.mxu1 %v8602_v0  ;;  %1760 = vmatprep.mubr.f32.mxu1 %v907_v36  ;;  %v1117_v48 = vpop.f32.mrf.mxu0  ;;  %v196_v41 = vld [vmem:[%s8595_s0 + $0x580] sm:$0xff] }
 0x10d   :  { %1830 = vmatpush2.msra.mxu0 %v441_v32  ;;  %v1302_v49 = vpop.f32.mrf.mxu1  ;;  %2013 = vmatpush2.msra.mxu1 %v474_v37 }
 0x10e   :  { %1831 = vmatprep.subr.mxu0 %v8602_v0  ;;  %v6016_v51 = vadd.f32 %v1302_v49, %v1117_v48  ;;  %1761 = vmatmul.mubr.f32.gmra.mxu1 %v906_v42  ;;  %v1119_v54 = vpop.f32.mrf.mxu0  ;;  %v466_v48 = vmax.f32 %v196_v41, 0.0  ;;  %v571_v49 = vld [vmem:[%s8596_s1 + $0x58] sm:$0xff]  ;;  %v636_v41 = vld [vmem:[%s8596_s1 + $0x260] sm:$0xff] }
 0x10f   :  { %2014 = vmatprep.subr.mxu1 %v8602_v0  ;;  %v1304_v55 = vpop.f32.mrf.mxu1  ;;  %1580 = vmatprep.mubr.f32.mxu0 %v922_v45  ;;  %v586_v54 = vld [vmem:[%s8596_s1 + $0xd0] sm:$0xff] }
 0x110   :  { %1832 = vmatpush2.msra.mxu0 %v440_v43  ;;  %2015 = vmatpush2.msra.mxu1 %v473_v46  ;;  %v1122_v59 = vpop.f32.mrf.mxu0  ;;  %v569_v43 = vld [vmem:[%s8596_s1 + $0x48] sm:$0xff] }
 0x111   :  { %1581 = vmatmul.mubr.f32.gmra.mxu0 %v921_v50  ;;  %v1307_v60 = vpop.f32.mrf.mxu1  ;;  %1833 = vmatprep.subr.mxu0 %v8602_v0 }
 0x112   :  { %2016 = vmatprep.subr.mxu1 %v8602_v0  ;;  %v6036_v1 = vadd.f32 %v1307_v60, %v1122_v59  ;;  %1765 = vmatprep.mubr.f32.mxu1 %v924_v56  ;;  %v1124_v5 = vpop.f32.mrf.mxu0  ;;  %v570_v56 = vld [vmem:[%s8596_s1 + $0x50] sm:$0xff]  ;;  %v585_v60 = vld [vmem:[%s8596_s1 + $0xc8] sm:$0xff] }
 0x113   :  { %1834 = vmatpush2.msra.mxu0 %v439_v52  ;;  %v1309_v6 = vpop.f32.mrf.mxu1  ;;  %2017 = vmatpush2.msra.mxu1 %v472_v57  ;;  %v226_v59 = vld [vmem:[%s8595_s0 + $0x670] sm:$0xff] }
 0x114   :  { %1835 = vmatprep.subr.mxu0 %v8602_v0  ;;  %1766 = vmatmul.mubr.f32.gmra.mxu1 %v923_v61  ;;  %v1127_v10 = vpop.f32.mrf.mxu0  ;;  %v588_v61 = vld [vmem:[%s8596_s1 + $0xe0] sm:$0xff]  ;;  %v496_v6 = vmax.f32 %v226_v59, 0.0 }
 0x115   :  { %2018 = vmatprep.subr.mxu1 %v8602_v0  ;;  %v1312_v11 = vpop.f32.mrf.mxu1  ;;  %1585 = vmatprep.mubr.f32.mxu0 %v939_v2 }
 0x116   :  { %1836 = vmatpush2.msra.mxu0 %v438_v62  ;;  %v6058_v15 = vadd.f32 %v1312_v11, %v1127_v10  ;;  %2019 = vmatpush2.msra.mxu1 %v471_v3  ;;  %v1129_v16 = vpop.f32.mrf.mxu0  ;;  %v497_v62 = vmax.f32 %v227_v53, 0.0  ;;  %v225_v10 = vld [vmem:[%s8595_s0 + $0x668] sm:$0xff]  ;;  %v602_v11 = vld [vmem:[%s8596_s1 + $0x150] sm:$0xff] }
 0x117   :  { %1586 = vmatmul.mubr.f32.gmra.mxu0 %v938_v7  ;;  %v1314_v17 = vpop.f32.mrf.mxu1  ;;  %1837 = vmatprep.subr.mxu0 %v8602_v0  ;;  %v587_v7 = vld [vmem:[%s8596_s1 + $0xd8] sm:$0xff]  ;;  %v495_v20 = vmax.f32 %v225_v10, 0.0  ;;  %v222_v53 = vld [vmem:[%s8595_s0 + $0x650] sm:$0xff]  ;;  %v673_v10 = vld [vmem:[%s8596_s1 + $0x388] sm:$0xff] }
 0x118   :  { %2020 = vmatprep.subr.mxu1 %v8602_v0  ;;  %1770 = vmatprep.mubr.f32.mxu1 %v941_v12  ;;  %v1132_v24 = vpop.f32.mrf.mxu0  ;;  %v605_v12 = vld [vmem:[%s8596_s1 + $0x168] sm:$0xff] }
 0x119   :  { %1838 = vmatpush2.msra.mxu0 %v437_v8  ;;  %v1317_v26 = vpop.f32.mrf.mxu1  ;;  %2021 = vmatpush2.msra.mxu1 %v470_v13  ;;  %v529_v13 = vmax.f32 %v259_v4, 0.0  ;;  %v655_v4 = vld [vmem:[%s8596_s1 + $0x2f8] sm:$0xff] }
 0x11a   :  { %1839 = vmatprep.subr.mxu0 %v8602_v0  ;;  %v6078_v28 = vadd.f32 %v1317_v26, %v1132_v24  ;;  %1771 = vmatmul.mubr.f32.gmra.mxu1 %v940_v18  ;;  %v1134_v31 = vpop.f32.mrf.mxu0  ;;  %v258_v18 = vld [vmem:[%s8595_s0 + $0x770] sm:$0xff]  ;;  %v224_v24 = vld [vmem:[%s8595_s0 + $0x660] sm:$0xff]  ;;  %v619_v26 = vld [vmem:[%s8596_s1 + $0x1d8] sm:$0xff] }
 0x11b   :  { %2022 = vmatprep.subr.mxu1 %v8602_v0  ;;  %v1319_v32 = vpop.f32.mrf.mxu1  ;;  %1590 = vmatprep.mubr.f32.mxu0 %v956_v21  ;;  %v604_v21 = vld [vmem:[%s8596_s1 + $0x160] sm:$0xff]  ;;  %v257_v31 = vld [vmem:[%s8595_s0 + $0x768] sm:$0xff] }
 0x11c   :  { %1840 = vmatpush2.msra.mxu0 %v436_v19  ;;  %2023 = vmatpush2.msra.mxu1 %v469_v22  ;;  %v1137_v36 = vpop.f32.mrf.mxu0 }
 0x11d   :  { %1591 = vmatmul.mubr.f32.gmra.mxu0 %v955_v27  ;;  %v1322_v37 = vpop.f32.mrf.mxu1  ;;  %1841 = vmatprep.subr.mxu0 %v8602_v0  ;;  %v622_v27 = vld [vmem:[%s8596_s1 + $0x1f0] sm:$0xff] }
 0x11e   :  { %2024 = vmatprep.subr.mxu1 %v8602_v0  ;;  %v6098_v42 = vadd.f32 %v1322_v37, %v1137_v36  ;;  %1775 = vmatprep.mubr.f32.mxu1 %v958_v33  ;;  %v1139_v45 = vpop.f32.mrf.mxu0  ;;  %v621_v36 = vld [vmem:[%s8596_s1 + $0x1e8] sm:$0xff]  ;;  %v223_v37 = vld [vmem:[%s8595_s0 + $0x658] sm:$0xff] }
 0x11f   :  { %1842 = vmatpush2.msra.mxu0 %v435_v29  ;;  %v1324_v46 = vpop.f32.mrf.mxu1  ;;  %2025 = vmatpush2.msra.mxu1 %v468_v34  ;;  %v528_v29 = vmax.f32 %v258_v18, 0.0  ;;  %v494_v34 = vmax.f32 %v224_v24, 0.0  ;;  %v654_v45 = vld [vmem:[%s8596_s1 + $0x2f0] sm:$0xff]  ;;  %v687_v24 = vld [vmem:[%s8596_s1 + $0x3f8] sm:$0xff] }
 0x120   :  { %1843 = vmatprep.subr.mxu0 %v8602_v0  ;;  %1776 = vmatmul.mubr.f32.gmra.mxu1 %v957_v38  ;;  %v1142_v50 = vpop.f32.mrf.mxu0  ;;  %v256_v46 = vld [vmem:[%s8595_s0 + $0x760] sm:$0xff] }
 0x121   :  { %2026 = vmatprep.subr.mxu1 %v8602_v0  ;;  %v1327_v52 = vpop.f32.mrf.mxu1  ;;  %1844 = vmatpush2.msra.mxu0 %v434_v40  ;;  %v526_v59 = vmax.f32 %v256_v46, 0.0  ;;  %v252_v46 = vld [vmem:[%s8595_s0 + $0x740] sm:$0xff] }
 0x122   :  { %1845 = vmatprep.mubr.f32.mxu0 %v569_v43  ;;  %v6117_v55 = vadd.f32 %v1327_v52, %v1142_v50  ;;  %2027 = vmatpush2.msra.mxu1 %v467_v44  ;;  %v1144_v57 = vpop.f32.mrf.mxu0  ;;  %v639_v43 = vld [vmem:[%s8596_s1 + $0x278] sm:$0xff]  ;;  %v527_v44 = vmax.f32 %v257_v31, 0.0  ;;  %v638_v52 = vld [vmem:[%s8596_s1 + $0x270] sm:$0xff] }
 0x123   :  { %1846 = vmatmul.mubr.f32.vlgmr.msra.gmra.mxu0 %v568_v47  ;;  %v1329_v58 = vpop.f32.mrf.mxu1  ;;  %2028 = vmatprep.subr.mxu1 %v8602_v0  ;;  %v653_v57 = vld [vmem:[%s8596_s1 + $0x2e8] sm:$0xff] }
 0x124   :  { %2030 = vmatprep.mubr.f32.mxu1 %v571_v49  ;;  %2029 = vmatpush2.msra.mxu1 %v466_v48  ;;  %v1147_v2 = vpop.f32.mrf.mxu0  ;;  %v493_v49 = vmax.f32 %v223_v37, 0.0  ;;  %v656_v58 = vld [vmem:[%s8596_s1 + $0x300] sm:$0xff]  ;;  %v219_v37 = vld [vmem:[%s8595_s0 + $0x638] sm:$0xff] }
 0x125   :  { %1850 = vmatprep.mubr.f32.mxu0 %v586_v54  ;;  %v1332_v3 = vpop.f32.mrf.mxu1  ;;  %2031 = vmatmul.mubr.f32.vlgmr.msra.gmra.mxu1 %v570_v56 }
 0x126   :  { %v6138_v5 = vadd.f32 %v1332_v3, %v1147_v2  ;;  %2151 = vmatprep.subr.mxu0 %v8602_v0  ;;  %2035 = vmatprep.mubr.f32.mxu1 %v588_v61  ;;  %v1149_v8 = vpop.f32.mrf.mxu0  ;;  %v255_v61 = vld [vmem:[%s8595_s0 + $0x758] sm:$0xff]  ;;  %v492_v2 = vmax.f32 %v222_v53, 0.0  ;;  %v706_v53 = vld [vmem:[%s8596_s1 + $0x490] sm:$0xff] }
 0x127   :  { %1851 = vmatmul.mubr.f32.gmra.mxu0 %v585_v60  ;;  %v1334_v9 = vpop.f32.mrf.mxu1  ;;  %2336 = vmatprep.subr.mxu1 %v8602_v0  ;;  %v671_v60 = vld [vmem:[%s8596_s1 + $0x378] sm:$0xff] }
 0x128   :  { %1855 = vmatprep.mubr.f32.mxu0 %v603_v63  ;;  %2152 = vmatpush1.msra.mxu0 %v497_v62  ;;  %v1152_v16 = vpop.f32.mrf.mxu0  ;;  %v670_v9 = vld [vmem:[%s8596_s1 + $0x370] sm:$0xff] }
 0x129   :  { %2153 = vmatprep.subr.mxu0 %v8602_v0  ;;  %v1337_v17 = vpop.f32.mrf.mxu1  ;;  %2036 = vmatmul.mubr.f32.gmra.mxu1 %v587_v7 }
 0x12a   :  { %2154 = vmatpush1.msra.mxu0 %v496_v6  ;;  %v6161_v19 = vadd.f32 %v1337_v17, %v1152_v16  ;;  %2040 = vmatprep.mubr.f32.mxu1 %v605_v12  ;;  %v1154_v22 = vpop.f32.mrf.mxu0  ;;  %v221_v6 = vld [vmem:[%s8595_s0 + $0x648] sm:$0xff]  ;;  %v688_v12 = vld [vmem:[%s8596_s1 + $0x400] sm:$0xff] }
 0x12b   :  { %1856 = vmatmul.mubr.f32.gmra.mxu0 %v602_v11  ;;  %v1339_v23 = vpop.f32.mrf.mxu1  ;;  %2337 = vmatpush1.msra.mxu1 %v529_v13  ;;  %v525_v11 = vmax.f32 %v255_v61, 0.0  ;;  %v254_v13 = vld [vmem:[%s8595_s0 + $0x750] sm:$0xff]  ;;  %v491_v17 = vmax.f32 %v221_v6, 0.0  ;;  %v739_v61 = vld [vmem:[%s8596_s1 + $0x598] sm:$0xff] }
 0x12c   :  { %1860 = vmatprep.mubr.f32.mxu0 %v620_v14  ;;  %2155 = vmatprep.subr.mxu0 %v8602_v0  ;;  %v1157_v32 = vpop.f32.mrf.mxu0 }
 0x12d   :  { %2338 = vmatprep.subr.mxu1 %v8602_v0  ;;  %v1342_v33 = vpop.f32.mrf.mxu1  ;;  %2041 = vmatmul.mubr.f32.gmra.mxu1 %v604_v21  ;;  %v220_v21 = vld [vmem:[%s8595_s0 + $0x640] sm:$0xff] }
 0x12e   :  { %2156 = vmatpush1.msra.mxu0 %v495_v20  ;;  %v6183_v35 = vadd.f32 %v1342_v33, %v1157_v32  ;;  %2045 = vmatprep.mubr.f32.mxu1 %v622_v27  ;;  %v1159_v38 = vpop.f32.mrf.mxu0  ;;  %v672_v20 = vld [vmem:[%s8596_s1 + $0x380] sm:$0xff]  ;;  %v524_v27 = vmax.f32 %v254_v13, 0.0  ;;  %v490_v33 = vmax.f32 %v220_v21, 0.0 }
 0x12f   :  { %1861 = vmatmul.mubr.f32.gmra.mxu0 %v619_v26  ;;  %v1344_v40 = vpop.f32.mrf.mxu1  ;;  %2339 = vmatpush1.msra.mxu1 %v528_v29  ;;  %v690_v26 = vld [vmem:[%s8596_s1 + $0x410] sm:$0xff]  ;;  %v705_v29 = vld [vmem:[%s8596_s1 + $0x488] sm:$0xff] }
 0x130   :  { %1865 = vmatprep.mubr.f32.mxu0 %v637_v30  ;;  %2157 = vmatprep.subr.mxu0 %v8602_v0  ;;  %v1162_v47 = vpop.f32.mrf.mxu0  ;;  %v253_v30 = vld [vmem:[%s8595_s0 + $0x748] sm:$0xff] }
 0x131   :  { %2340 = vmatprep.subr.mxu1 %v8602_v0  ;;  %v1347_v48 = vpop.f32.mrf.mxu1  ;;  %2046 = vmatmul.mubr.f32.gmra.mxu1 %v621_v36  ;;  %v689_v36 = vld [vmem:[%s8596_s1 + $0x408] sm:$0xff] }
 0x132   :  { %2158 = vmatpush1.msra.mxu0 %v494_v34  ;;  %v6205_v50 = vadd.f32 %v1347_v48, %v1162_v47  ;;  %2050 = vmatprep.mubr.f32.mxu1 %v639_v43  ;;  %v1164_v54 = vpop.f32.mrf.mxu0  ;;  %v707_v43 = vld [vmem:[%s8596_s1 + $0x498] sm:$0xff] }
 0x133   :  { %1866 = vmatmul.mubr.f32.gmra.mxu0 %v636_v41  ;;  %v1349_v56 = vpop.f32.mrf.mxu1  ;;  %2341 = vmatpush1.msra.mxu1 %v527_v44  ;;  %v704_v41 = vld [vmem:[%s8596_s1 + $0x480] sm:$0xff]  ;;  %v523_v44 = vmax.f32 %v253_v30, 0.0  ;;  %v218_v54 = vld [vmem:[%s8595_s0 + $0x630] sm:$0xff] }
 0x134   :  { %1870 = vmatprep.mubr.f32.mxu0 %v654_v45  ;;  %2159 = vmatprep.subr.mxu0 %v8602_v0  ;;  %v1167_v62 = vpop.f32.mrf.mxu0  ;;  %v722_v45 = vld [vmem:[%s8596_s1 + $0x510] sm:$0xff] }
 0x135   :  { %2342 = vmatprep.subr.mxu1 %v8602_v0  ;;  %v1352_v63 = vpop.f32.mrf.mxu1  ;;  %2051 = vmatmul.mubr.f32.gmra.mxu1 %v638_v52 }
 0x136   :  { %2160 = vmatpush1.msra.mxu0 %v493_v49  ;;  %v6227_v3 = vadd.f32 %v1352_v63, %v1167_v62  ;;  %2055 = vmatprep.mubr.f32.mxu1 %v656_v58  ;;  %v1169_v7 = vpop.f32.mrf.mxu0  ;;  %v489_v49 = vmax.f32 %v219_v37, 0.0  ;;  %v721_v58 = vld [vmem:[%s8596_s1 + $0x508] sm:$0xff]  ;;  %v251_v62 = vld [vmem:[%s8595_s0 + $0x738] sm:$0xff] }
 0x137   :  { %1871 = vmatmul.mubr.f32.gmra.mxu0 %v653_v57  ;;  %v1354_v8 = vpop.f32.mrf.mxu1  ;;  %2343 = vmatpush1.msra.mxu1 %v526_v59  ;;  %v724_v59 = vld [vmem:[%s8596_s1 + $0x520] sm:$0xff]  ;;  %v723_v7 = vld [vmem:[%s8596_s1 + $0x518] sm:$0xff]  ;;  %v521_v13 = vmax.f32 %v251_v62, 0.0  ;;  %v757_v37 = vld [vmem:[%s8596_s1 + $0x628] sm:$0xff] }
 0x138   :  { %1875 = vmatprep.mubr.f32.mxu0 %v671_v60  ;;  %2161 = vmatprep.subr.mxu0 %v8602_v0  ;;  %v1172_v14 = vpop.f32.mrf.mxu0  ;;  %v522_v60 = vmax.f32 %v252_v46, 0.0  ;;  %v217_v8 = vld [vmem:[%s8595_s0 + $0x628] sm:$0xff]  ;;  %v790_v46 = vld [vmem:[%s8596_s1 + $0x730] sm:$0xff]  ;;  %v247_v62 = vld [vmem:[%s8595_s0 + $0x718] sm:$0xff] }
 0x139   :  { %2344 = vmatprep.subr.mxu1 %v8602_v0  ;;  %v1357_v16 = vpop.f32.mrf.mxu1  ;;  %2056 = vmatmul.mubr.f32.gmra.mxu1 %v655_v4  ;;  %v488_v4 = vmax.f32 %v218_v54, 0.0 }
 0x13a   :  { %2162 = vmatpush1.msra.mxu0 %v492_v2  ;;  %v6249_v18 = vadd.f32 %v1357_v16, %v1172_v14  ;;  %2060 = vmatprep.mubr.f32.mxu1 %v673_v10  ;;  %v1174_v22 = vpop.f32.mrf.mxu0  ;;  %v756_v14 = vld [vmem:[%s8596_s1 + $0x620] sm:$0xff]  ;;  %v250_v16 = vld [vmem:[%s8595_s0 + $0x730] sm:$0xff] }
 0x13b   :  { %1876 = vmatmul.mubr.f32.gmra.mxu0 %v670_v9  ;;  %v1359_v23 = vpop.f32.mrf.mxu1  ;;  %2345 = vmatpush1.msra.mxu1 %v525_v11  ;;  %v738_v11 = vld [vmem:[%s8596_s1 + $0x590] sm:$0xff]  ;;  %v740_v22 = vld [vmem:[%s8596_s1 + $0x5a0] sm:$0xff] }
 0x13c   :  { %1880 = vmatprep.mubr.f32.mxu0 %v688_v12  ;;  %2163 = vmatprep.subr.mxu0 %v8602_v0  ;;  %v1177_v31 = vpop.f32.mrf.mxu0  ;;  %v741_v12 = vld [vmem:[%s8596_s1 + $0x5a8] sm:$0xff]  ;;  %v216_v23 = vld [vmem:[%s8595_s0 + $0x620] sm:$0xff] }
 0x13d   :  { %2346 = vmatprep.subr.mxu1 %v8602_v0  ;;  %v1362_v32 = vpop.f32.mrf.mxu1  ;;  %2061 = vmatmul.mubr.f32.gmra.mxu1 %v672_v20 }
 0x13e   :  { %2164 = vmatpush1.msra.mxu0 %v491_v17  ;;  %v6271_v34 = vadd.f32 %v1362_v32, %v1177_v31  ;;  %2065 = vmatprep.mubr.f32.mxu1 %v690_v26  ;;  %v1179_v38 = vpop.f32.mrf.mxu0  ;;  %v487_v17 = vmax.f32 %v217_v8, 0.0  ;;  %v755_v26 = vld [vmem:[%s8596_s1 + $0x618] sm:$0xff]  ;;  %v773_v32 = vld [vmem:[%s8596_s1 + $0x6a8] sm:$0xff] }
 0x13f   :  { %1881 = vmatmul.mubr.f32.gmra.mxu0 %v687_v24  ;;  %v1364_v40 = vpop.f32.mrf.mxu1  ;;  %2347 = vmatpush1.msra.mxu1 %v524_v27  ;;  %v758_v27 = vld [vmem:[%s8596_s1 + $0x630] sm:$0xff]  ;;  %v215_v38 = vld [vmem:[%s8595_s0 + $0x618] sm:$0xff]  ;;  %v213_v8 = vld [vmem:[%s8595_s0 + $0x608] sm:$0xff] }
 0x140   :  { %1885 = vmatprep.mubr.f32.mxu0 %v705_v29  ;;  %2165 = vmatprep.subr.mxu0 %v8602_v0  ;;  %v1182_v47 = vpop.f32.mrf.mxu0  ;;  %v520_v29 = vmax.f32 %v250_v16, 0.0  ;;  %v772_v40 = vld [vmem:[%s8596_s1 + $0x6a0] sm:$0xff] }
 0x141   :  { %2348 = vmatprep.subr.mxu1 %v8602_v0  ;;  %v1367_v48 = vpop.f32.mrf.mxu1  ;;  %2066 = vmatmul.mubr.f32.gmra.mxu1 %v689_v36  ;;  %v486_v36 = vmax.f32 %v216_v23, 0.0  ;;  %v824_v16 = vld [vmem:[%s8596_s1 + $0x840] sm:$0xff]  ;;  %v823_v23 = vld [vmem:[%s8596_s1 + $0x838] sm:$0xff] }
 0x142   :  { %2166 = vmatpush1.msra.mxu0 %v490_v33  ;;  %v6293_v52 = vadd.f32 %v1367_v48, %v1182_v47  ;;  %2070 = vmatprep.mubr.f32.mxu1 %v707_v43  ;;  %v1184_v56 = vpop.f32.mrf.mxu0  ;;  %v249_v33 = vld [vmem:[%s8595_s0 + $0x728] sm:$0xff]  ;;  %v248_v47 = vld [vmem:[%s8595_s0 + $0x720] sm:$0xff] }
 0x143   :  { %1886 = vmatmul.mubr.f32.gmra.mxu0 %v704_v41  ;;  %v1369_v57 = vpop.f32.mrf.mxu1  ;;  %2349 = vmatpush1.msra.mxu1 %v523_v44  ;;  %v775_v41 = vld [vmem:[%s8596_s1 + $0x6b8] sm:$0xff]  ;;  %v519_v43 = vmax.f32 %v249_v33, 0.0  ;;  %v774_v56 = vld [vmem:[%s8596_s1 + $0x6b0] sm:$0xff]  ;;  %v841_v33 = vld [vmem:[%s8596_s1 + $0x8c8] sm:$0xff] }
 0x144   :  { %1890 = vmatprep.mubr.f32.mxu0 %v722_v45  ;;  %2167 = vmatprep.subr.mxu0 %v8602_v0  ;;  %v1187_v63 = vpop.f32.mrf.mxu0  ;;  %v214_v57 = vld [vmem:[%s8595_s0 + $0x610] sm:$0xff] }
 0x145   :  { %2350 = vmatprep.subr.mxu1 %v8602_v0  ;;  %v1372_v2 = vpop.f32.mrf.mxu1  ;;  %2071 = vmatmul.mubr.f32.gmra.mxu1 %v706_v53 }
 0x146   :  { %2168 = vmatpush1.msra.mxu0 %v489_v49  ;;  %v6315_v6 = vadd.f32 %v1372_v2, %v1187_v63  ;;  %2075 = vmatprep.mubr.f32.mxu1 %v724_v59  ;;  %v1189_v9 = vpop.f32.mrf.mxu0  ;;  %v485_v49 = vmax.f32 %v215_v38, 0.0  ;;  %v792_v59 = vld [vmem:[%s8596_s1 + $0x740] sm:$0xff]  ;;  %v484_v63 = vmax.f32 %v214_v57, 0.0 }
 0x147   :  { %1891 = vmatmul.mubr.f32.gmra.mxu0 %v721_v58  ;;  %v1374_v10 = vpop.f32.mrf.mxu1  ;;  %2351 = vmatpush1.msra.mxu1 %v522_v60  ;;  %v789_v58 = vld [vmem:[%s8596_s1 + $0x728] sm:$0xff]  ;;  %v518_v60 = vmax.f32 %v248_v47, 0.0  ;;  %v242_v47 = vld [vmem:[%s8595_s0 + $0x6f0] sm:$0xff] }
 0x148   :  { %1895 = vmatprep.mubr.f32.mxu0 %v739_v61  ;;  %2169 = vmatprep.subr.mxu0 %v8602_v0  ;;  %v807_v61 = vld [vmem:[%s8596_s1 + $0x7b8] sm:$0xff]  ;;  %v806_v10 = vld [vmem:[%s8596_s1 + $0x7b0] sm:$0xff] }
 0x149   :  { %2352 = vmatprep.subr.mxu1 %v8602_v0  ;;  %2076 = vmatmul.mubr.f32.gmra.mxu1 %v723_v7  ;;  %v1192_v20 = vpop.f32.mrf.mxu0  ;;  %v791_v7 = vld [vmem:[%s8596_s1 + $0x738] sm:$0xff] }
 0x14a   :  { %2170 = vmatpush1.msra.mxu0 %v488_v4  ;;  %v1377_v21 = vpop.f32.mrf.mxu1  ;;  %2080 = vmatprep.mubr.f32.mxu1 %v741_v12  ;;  %v517_v12 = vmax.f32 %v247_v62, 0.0 }
 0x14b   :  { %1896 = vmatmul.mubr.f32.gmra.mxu0 %v738_v11  ;;  %v6343_v24 = vadd.f32 %v1377_v21, %v1192_v20  ;;  %2353 = vmatpush1.msra.mxu1 %v521_v13  ;;  %v1194_v30 = vpop.f32.mrf.mxu0  ;;  %v809_v11 = vld [vmem:[%s8596_s1 + $0x7c8] sm:$0xff]  ;;  %v483_v20 = vmax.f32 %v213_v8, 0.0  ;;  %v808_v21 = vld [vmem:[%s8596_s1 + $0x7c0] sm:$0xff] }
 0x14c   :  { %1900 = vmatprep.mubr.f32.mxu0 %v756_v14  ;;  %v1379_v31 = vpop.f32.mrf.mxu1  ;;  %2171 = vmatprep.subr.mxu0 %v8602_v0  ;;  %v857_v8 = vld [vmem:[%s8596_s1 + $0x948] sm:$0xff] }
 0x14d   :  { %2354 = vmatprep.subr.mxu1 %v8602_v0  ;;  %2081 = vmatmul.mubr.f32.gmra.mxu1 %v740_v22  ;;  %v212_v22 = vld [vmem:[%s8595_s0 + $0x600] sm:$0xff] }
 0x14e   :  { %2172 = vmatpush1.msra.mxu0 %v487_v17  ;;  %2085 = vmatprep.mubr.f32.mxu1 %v758_v27  ;;  %v246_v17 = vld [vmem:[%s8595_s0 + $0x710] sm:$0xff] }
 0x14f   :  { %1901 = vmatmul.mubr.f32.gmra.mxu0 %v755_v26  ;;  %2355 = vmatpush1.msra.mxu1 %v520_v29  ;;  %v1197_v44 = vpop.f32.mrf.mxu0  ;;  %v826_v26 = vld [vmem:[%s8596_s1 + $0x850] sm:$0xff]  ;;  %v516_v27 = vmax.f32 %v246_v17, 0.0  ;;  %v245_v29 = vld [vmem:[%s8595_s0 + $0x708] sm:$0xff] }
 0x150   :  { %1905 = vmatprep.mubr.f32.mxu0 %v773_v32  ;;  %v1382_v45 = vpop.f32.mrf.mxu1  ;;  %2173 = vmatprep.subr.mxu0 %v8602_v0 }
 0x151   :  { %2356 = vmatprep.subr.mxu1 %v8602_v0  ;;  %v6379_v48 = vadd.f32 %v1382_v45, %v1197_v44  ;;  %2086 = vmatmul.mubr.f32.gmra.mxu1 %v757_v37  ;;  %v1199_v53 = vpop.f32.mrf.mxu0  ;;  %v243_v37 = vld [vmem:[%s8595_s0 + $0x6f8] sm:$0xff]  ;;  %v244_v44 = vld [vmem:[%s8595_s0 + $0x700] sm:$0xff] }
 0x152   :  { %2174 = vmatpush1.msra.mxu0 %v486_v36  ;;  %v1384_v54 = vpop.f32.mrf.mxu1  ;;  %2090 = vmatprep.mubr.f32.mxu1 %v775_v41  ;;  %v482_v36 = vmax.f32 %v212_v22, 0.0  ;;  %v825_v41 = vld [vmem:[%s8596_s1 + $0x848] sm:$0xff]  ;;  %v840_v45 = vld [vmem:[%s8596_s1 + $0x8c0] sm:$0xff]  ;;  %v514_v53 = vmax.f32 %v244_v44, 0.0 }
 0x153   :  { %1906 = vmatmul.mubr.f32.gmra.mxu0 %v772_v40  ;;  %2357 = vmatpush1.msra.mxu1 %v519_v43  ;;  %v515_v43 = vmax.f32 %v245_v29, 0.0  ;;  %v275_v54 = vld [vmem:[%s8595_s0 + $0x7f8] sm:$0xff] }
 0x154   :  { %1910 = vmatprep.mubr.f32.mxu0 %v790_v46  ;;  %2175 = vmatprep.subr.mxu0 %v8602_v0  ;;  %v513_v46 = vmax.f32 %v243_v37, 0.0  ;;  %v875_v29 = vld [vmem:[%s8596_s1 + $0x9d8] sm:$0xff]  ;;  %v238_v37 = vld [vmem:[%s8595_s0 + $0x6d0] sm:$0xff] }
 0x155   :  { %2358 = vmatprep.subr.mxu1 %v8602_v0  ;;  %2091 = vmatmul.mubr.f32.gmra.mxu1 %v774_v56  ;;  %v1202_v2 = vpop.f32.mrf.mxu0 }
 0x156   :  { %2176 = vmatpush1.msra.mxu0 %v485_v49  ;;  %v1387_v4 = vpop.f32.mrf.mxu1  ;;  %2095 = vmatprep.mubr.f32.mxu1 %v792_v59  ;;  %v843_v49 = vld [vmem:[%s8596_s1 + $0x8d8] sm:$0xff]  ;;  %v842_v59 = vld [vmem:[%s8596_s1 + $0x8d0] sm:$0xff] }
 0x157   :  { %1911 = vmatmul.mubr.f32.gmra.mxu0 %v789_v58  ;;  %v6407_v9 = vadd.f32 %v1387_v4, %v1202_v2  ;;  %2359 = vmatpush1.msra.mxu1 %v518_v60  ;;  %v1204_v13 = vpop.f32.mrf.mxu0  ;;  %v512_v60 = vmax.f32 %v242_v47, 0.0  ;;  %v858_v2 = vld [vmem:[%s8596_s1 + $0x950] sm:$0xff]  ;;  %v545_v4 = vmax.f32 %v275_v54, 0.0  ;;  %v508_v47 = vmax.f32 %v238_v37, 0.0 }
 0x158   :  { %1915 = vmatprep.mubr.f32.mxu0 %v807_v61  ;;  %v1389_v14 = vpop.f32.mrf.mxu1  ;;  %2177 = vmatprep.subr.mxu0 %v8602_v0  ;;  %v241_v61 = vld [vmem:[%s8595_s0 + $0x6e8] sm:$0xff] }
 0x159   :  { %2360 = vmatprep.subr.mxu1 %v8602_v0  ;;  %2096 = vmatmul.mubr.f32.gmra.mxu1 %v791_v7  ;;  %v274_v7 = vld [vmem:[%s8595_s0 + $0x7f0] sm:$0xff]  ;;  %v273_v14 = vld [vmem:[%s8595_s0 + $0x7e8] sm:$0xff] }
 0x15a   :  { %2178 = vmatpush1.msra.mxu0 %v484_v63  ;;  %2100 = vmatprep.mubr.f32.mxu1 %v809_v11  ;;  %v240_v11 = vld [vmem:[%s8595_s0 + $0x6e0] sm:$0xff]  ;;  %v544_v13 = vmax.f32 %v274_v7, 0.0  ;;  %v269_v7 = vld [vmem:[%s8595_s0 + $0x7c8] sm:$0xff] }
 0x15b   :  { %1916 = vmatmul.mubr.f32.gmra.mxu0 %v806_v10  ;;  %2361 = vmatpush1.msra.mxu1 %v517_v12  ;;  %v1207_v30 = vpop.f32.mrf.mxu0  ;;  %v511_v10 = vmax.f32 %v241_v61, 0.0  ;;  %v860_v12 = vld [vmem:[%s8596_s1 + $0x960] sm:$0xff]  ;;  %v510_v22 = vmax.f32 %v240_v11, 0.0  ;;  %v893_v11 = vld [vmem:[%s8596_s1 + $0xa68] sm:$0xff] }
 0x15c   :  { %1920 = vmatprep.mubr.f32.mxu0 %v824_v16  ;;  %v1392_v31 = vpop.f32.mrf.mxu1  ;;  %2179 = vmatprep.subr.mxu0 %v8602_v0 }
 0x15d   :  { %2362 = vmatprep.subr.mxu1 %v8602_v0  ;;  %v6440_v32 = vadd.f32 %v1392_v31, %v1207_v30  ;;  %2101 = vmatmul.mubr.f32.gmra.mxu1 %v808_v21  ;;  %v1209_v38 = vpop.f32.mrf.mxu0  ;;  %v859_v21 = vld [vmem:[%s8596_s1 + $0x958] sm:$0xff]  ;;  %v543_v30 = vmax.f32 %v273_v14, 0.0  ;;  %v272_v31 = vld [vmem:[%s8595_s0 + $0x7e0] sm:$0xff] }
 0x15e   :  { %2180 = vmatpush1.msra.mxu0 %v483_v20  ;;  %v1394_v40 = vpop.f32.mrf.mxu1  ;;  %2105 = vmatprep.mubr.f32.mxu1 %v826_v26  ;;  %v877_v38 = vld [vmem:[%s8596_s1 + $0x9e8] sm:$0xff] }
 0x15f   :  { %1921 = vmatmul.mubr.f32.gmra.mxu0 %v823_v23  ;;  %2363 = vmatpush1.msra.mxu1 %v516_v27  ;;  %v239_v23 = vld [vmem:[%s8595_s0 + $0x6d8] sm:$0xff]  ;;  %v542_v40 = vmax.f32 %v272_v31, 0.0 }
 0x160   :  { %2181 = vmatprep.subr.mxu0 %v8602_v0  ;;  %2364 = vmatprep.subr.mxu1 %v8602_v0 }
 0x161   :  { %1925 = vmatprep.mubr.f32.mxu0 %v841_v33  ;;  %2106 = vmatmul.mubr.f32.gmra.mxu1 %v825_v41  ;;  %v1212_v56 = vpop.f32.mrf.mxu0  ;;  %v874_v33 = vld [vmem:[%s8596_s1 + $0x9d0] sm:$0xff]  ;;  %v271_v41 = vld [vmem:[%s8595_s0 + $0x7d8] sm:$0xff] }
 0x162   :  { %2182 = vmatpush1.msra.mxu0 %v482_v36  ;;  %v1397_v57 = vpop.f32.mrf.mxu1  ;;  %2365 = vmatpush1.msra.mxu1 %v515_v43  ;;  %v509_v36 = vmax.f32 %v239_v23, 0.0  ;;  %v908_v23 = vld [vmem:[%s8596_s1 + $0xae0] sm:$0xff] }
 0x163   :  { %1926 = vmatmul.mubr.f32.gmra.mxu0 %v840_v45  ;;  %v6468_v58 = vadd.f32 %v1397_v57, %v1212_v56  ;;  %2183 = vmatprep.subr.mxu0 %v8602_v0  ;;  %v1214_v62 = vpop.f32.mrf.mxu0  ;;  %v892_v56 = vld [vmem:[%s8596_s1 + $0xa60] sm:$0xff]  ;;  %v541_v57 = vmax.f32 %v271_v41, 0.0  ;;  %v910_v41 = vld [vmem:[%s8596_s1 + $0xaf0] sm:$0xff] }
 0x164   :  { %2366 = vmatprep.subr.mxu1 %v8602_v0  ;;  %v1399_v63 = vpop.f32.mrf.mxu1  ;;  %2110 = vmatprep.mubr.f32.mxu1 %v843_v49  ;;  %v237_v49 = vld [vmem:[%s8595_s0 + $0x6c8] sm:$0xff]  ;;  %v236_v62 = vld [vmem:[%s8595_s0 + $0x6c0] sm:$0xff] }
 0x165   :  { %2184 = vmatpush2.msra.mxu0 %v513_v46  ;;  %2367 = vmatpush1.msra.mxu1 %v514_v53  ;;  %v876_v46 = vld [vmem:[%s8596_s1 + $0x9e0] sm:$0xff]  ;;  %v507_v61 = vmax.f32 %v237_v49, 0.0  ;;  %v926_v49 = vld [vmem:[%s8596_s1 + $0xb70] sm:$0xff] }
 0x166   :  { %2185 = vmatprep.subr.mxu0 %v8602_v0  ;;  %2111 = vmatmul.mubr.f32.gmra.mxu1 %v842_v59  ;;  %v270_v59 = vld [vmem:[%s8595_s0 + $0x7d0] sm:$0xff] }
 0x167   :  { %2368 = vmatprep.subr.mxu1 %v8602_v0  ;;  %1930 = vmatprep.mubr.f32.mxu0 %v858_v2  ;;  %v1217_v16 = vpop.f32.mrf.mxu0  ;;  %v894_v2 = vld [vmem:[%s8596_s1 + $0xa70] sm:$0xff] }
 0x168   :  { %2186 = vmatpush2.msra.mxu0 %v512_v60  ;;  %v1402_v17 = vpop.f32.mrf.mxu1  ;;  %2369 = vmatpush2.msra.mxu1 %v545_v4  ;;  %v891_v60 = vld [vmem:[%s8596_s1 + $0xa58] sm:$0xff]  ;;  %v540_v4 = vmax.f32 %v270_v59, 0.0 }
 0x169   :  { %1931 = vmatmul.mubr.f32.gmra.mxu0 %v857_v8  ;;  %v6498_v20 = vadd.f32 %v1402_v17, %v1217_v16  ;;  %2187 = vmatprep.subr.mxu0 %v8602_v0  ;;  %v1219_v26 = vpop.f32.mrf.mxu0  ;;  %v539_v16 = vmax.f32 %v269_v7, 0.0  ;;  %v268_v17 = vld [vmem:[%s8595_s0 + $0x7c0] sm:$0xff] }
 0x16a   :  { %2370 = vmatprep.subr.mxu1 %v8602_v0  ;;  %v1404_v27 = vpop.f32.mrf.mxu1  ;;  %2115 = vmatprep.mubr.f32.mxu1 %v860_v12  ;;  %v506_v12 = vmax.f32 %v236_v62, 0.0 }
 0x16b   :  { %2188 = vmatpush2.msra.mxu0 %v511_v10  ;;  %2371 = vmatpush2.msra.mxu1 %v544_v13  ;;  %v235_v13 = vld [vmem:[%s8595_s0 + $0x6b8] sm:$0xff] }
 0x16c   :  { %2189 = vmatprep.subr.mxu0 %v8602_v0  ;;  %2116 = vmatmul.mubr.f32.gmra.mxu1 %v859_v21 }
 0x16d   :  { %2372 = vmatprep.subr.mxu1 %v8602_v0  ;;  %1935 = vmatprep.mubr.f32.mxu0 %v875_v29  ;;  %v1222_v43 = vpop.f32.mrf.mxu0  ;;  %v505_v29 = vmax.f32 %v235_v13, 0.0  ;;  %v231_v13 = vld [vmem:[%s8595_s0 + $0x698] sm:$0xff] }
 0x16e   :  { %2190 = vmatpush2.msra.mxu0 %v510_v22  ;;  %v1407_v44 = vpop.f32.mrf.mxu1  ;;  %2373 = vmatpush2.msra.mxu1 %v543_v30  ;;  %v234_v30 = vld [vmem:[%s8595_s0 + $0x6b0] sm:$0xff] }
 0x16f   :  { %1936 = vmatmul.mubr.f32.gmra.mxu0 %v874_v33  ;;  %v6528_v45 = vadd.f32 %v1407_v44, %v1222_v43  ;;  %2191 = vmatprep.subr.mxu0 %v8602_v0  ;;  %v1224_v53 = vpop.f32.mrf.mxu0  ;;  %v911_v33 = vld [vmem:[%s8596_s1 + $0xaf8] sm:$0xff]  ;;  %v504_v43 = vmax.f32 %v234_v30, 0.0  ;;  %v233_v44 = vld [vmem:[%s8595_s0 + $0x6a8] sm:$0xff]  ;;  %v230_v30 = vld [vmem:[%s8595_s0 + $0x690] sm:$0xff] }
 0x170   :  { %2374 = vmatprep.subr.mxu1 %v8602_v0  ;;  %v1409_v54 = vpop.f32.mrf.mxu1  ;;  %2120 = vmatprep.mubr.f32.mxu1 %v877_v38  ;;  %v503_v59 = vmax.f32 %v233_v44, 0.0  ;;  %v229_v44 = vld [vmem:[%s8595_s0 + $0x688] sm:$0xff] }
 0x171   :  { %2192 = vmatpush2.msra.mxu0 %v509_v36  ;;  %2375 = vmatpush2.msra.mxu1 %v542_v40  ;;  %v538_v36 = vmax.f32 %v268_v17, 0.0  ;;  %v266_v54 = vld [vmem:[%s8595_s0 + $0x7b0] sm:$0xff] }
 0x172   :  { %2193 = vmatprep.subr.mxu0 %v8602_v0  ;;  %2121 = vmatmul.mubr.f32.gmra.mxu1 %v876_v46 }
 0x173   :  { %2376 = vmatprep.subr.mxu1 %v8602_v0  ;;  %v1477_v63 = vpop.f32.mrf.mxu0  ;;  %1940 = vmatprep.mubr.f32.mxu0 %v892_v56 }
 0x174   :  { %2194 = vmatpush2.msra.mxu0 %v508_v47  ;;  %v1478_v8 = vadd.f32 %v1477_v63, %v5974_v25  ;;  %2377 = vmatpush2.msra.mxu1 %v541_v57  ;;  %v909_v25 = vld [vmem:[%s8596_s1 + $0xae8] sm:$0xff]  ;;  %v928_v63 = vld [vmem:[%s8596_s1 + $0xb80] sm:$0xff] }
 0x175   :  { %1941 = vmatmul.mubr.f32.gmra.mxu0 %v891_v60  ;;  %v1479_v10 = vpop.f32.mrf.mxu0  ;;  %2195 = vmatprep.subr.mxu0 %v8602_v0  ;;  %v1662_v14 = vpop.f32.mrf.mxu1  ;;  %v232_v60 = vld [vmem:[%s8595_s0 + $0x6a0] sm:$0xff] }
 0x176   :  { %2378 = vmatprep.subr.mxu1 %v8602_v0  ;;  %2125 = vmatprep.mubr.f32.mxu1 %v894_v2  ;;  %v6573_v21 = vadd.f32 %v1662_v14, %v1478_v8  ;;  %v536_v2 = vmax.f32 %v266_v54, 0.0  ;;  %v262_v54 = vld [vmem:[%s8595_s0 + $0x790] sm:$0xff] }
 0x177   :  { %2196 = vmatpush2.msra.mxu0 %v507_v61  ;;  %v1482_v22 = vpop.f32.mrf.mxu0  ;;  %2379 = vmatpush2.msra.mxu1 %v540_v4  ;;  %v1664_v27 = vpop.f32.mrf.mxu1  ;;  %v265_v4 = vld [vmem:[%s8595_s0 + $0x7a8] sm:$0xff] }
 0x178   :  { %2197 = vmatprep.subr.mxu0 %v8602_v0  ;;  %v1483_v26 = vadd.f32 %v1482_v22, %v5996_v39  ;;  %2126 = vmatmul.mubr.f32.gmra.mxu1 %v893_v11  ;;  %v267_v39 = vld [vmem:[%s8595_s0 + $0x7b8] sm:$0xff] }
 0x179   :  { %2380 = vmatprep.subr.mxu1 %v8602_v0  ;;  %v1484_v31 = vpop.f32.mrf.mxu0  ;;  %1945 = vmatprep.mubr.f32.mxu0 %v909_v25  ;;  %v1667_v37 = vpop.f32.mrf.mxu1  ;;  %v537_v53 = vmax.f32 %v267_v39, 0.0  ;;  %v927_v11 = vld [vmem:[%s8596_s1 + $0xb78] sm:$0xff]  ;;  %v535_v25 = vmax.f32 %v265_v4, 0.0  ;;  %v261_v4 = vld [vmem:[%s8595_s0 + $0x788] sm:$0xff] }
 0x17a   :  { %2198 = vmatpush2.msra.mxu0 %v506_v12  ;;  %2381 = vmatpush2.msra.mxu1 %v539_v16  ;;  %v6590_v38 = vadd.f32 %v1667_v37, %v1483_v26  ;;  %v502_v12 = vmax.f32 %v232_v60, 0.0  ;;  %v264_v16 = vld [vmem:[%s8595_s0 + $0x7a0] sm:$0xff] }
 0x17b   :  { %1946 = vmatmul.mubr.f32.gmra.mxu0 %v908_v23  ;;  %v1487_v40 = vpop.f32.mrf.mxu0  ;;  %2199 = vmatprep.subr.mxu0 %v8602_v0  ;;  %v1669_v47 = vpop.f32.mrf.mxu1  ;;  %v942_v23 = vld [vmem:[%s8596_s1 + $0xbf0] sm:$0xff] }
 0x17c   :  { %2382 = vmatprep.subr.mxu1 %v8602_v0  ;;  %v1488_v46 = vadd.f32 %v1487_v40, %v6016_v51  ;;  %2130 = vmatprep.mubr.f32.mxu1 %v911_v33  ;;  %v925_v51 = vld [vmem:[%s8596_s1 + $0xb68] sm:$0xff] }
 0x17d   :  { %2200 = vmatpush2.msra.mxu0 %v505_v29  ;;  %v1489_v56 = vpop.f32.mrf.mxu0  ;;  %2383 = vmatpush2.msra.mxu1 %v538_v36  ;;  %v1672_v57 = vpop.f32.mrf.mxu1  ;;  %v501_v29 = vmax.f32 %v231_v13, 0.0  ;;  %v945_v33 = vld [vmem:[%s8596_s1 + $0xc08] sm:$0xff]  ;;  %v534_v36 = vmax.f32 %v264_v16, 0.0  ;;  %v260_v13 = vld [vmem:[%s8595_s0 + $0x780] sm:$0xff] }
 0x17e   :  { %2201 = vmatprep.subr.mxu0 %v8602_v0  ;;  %2131 = vmatmul.mubr.f32.gmra.mxu1 %v910_v41  ;;  %v6615_v61 = vadd.f32 %v1672_v57, %v1488_v46  ;;  %v944_v41 = vld [vmem:[%s8596_s1 + $0xc00] sm:$0xff]  ;;  %v499_v57 = vmax.f32 %v229_v44, 0.0 }
 0x17f   :  { %2384 = vmatprep.subr.mxu1 %v8602_v0  ;;  %v1492_v62 = vpop.f32.mrf.mxu0  ;;  %1950 = vmatprep.mubr.f32.mxu0 %v926_v49  ;;  %v1674_v8 = vpop.f32.mrf.mxu1  ;;  %v960_v49 = vld [vmem:[%s8596_s1 + $0xc80] sm:$0xff] }
 0x180   :  { %2202 = vmatpush2.msra.mxu0 %v504_v43  ;;  %v1493_v7 = vadd.f32 %v1492_v62, %v6036_v1  ;;  %2385 = vmatpush2.msra.mxu1 %v537_v53  ;;  %v943_v1 = vld [vmem:[%s8596_s1 + $0xbf8] sm:$0xff]  ;;  %v500_v43 = vmax.f32 %v230_v30, 0.0  ;;  %v592_v44 = vld [vmem:[%s8596_s1 + $0x100] sm:$0xff] }
 0x181   :  { %1951 = vmatmul.mubr.f32.gmra.mxu0 %v925_v51  ;;  %v1494_v10 = vpop.f32.mrf.mxu0  ;;  %2203 = vmatprep.subr.mxu0 %v8602_v0  ;;  %v1677_v14 = vpop.f32.mrf.mxu1  ;;  %v575_v30 = vld [vmem:[%s8596_s1 + $0x78] sm:$0xff] }
 0x182   :  { %2386 = vmatprep.subr.mxu1 %v8602_v0  ;;  %2135 = vmatprep.mubr.f32.mxu1 %v928_v63  ;;  %v6638_v17 = vadd.f32 %v1677_v14, %v1493_v7  ;;  %v962_v63 = vld [vmem:[%s8596_s1 + $0xc90] sm:$0xff] }
 0x183   :  { %2204 = vmatpush2.msra.mxu0 %v503_v59  ;;  %v1497_v22 = vpop.f32.mrf.mxu0  ;;  %2387 = vmatpush2.msra.mxu1 %v536_v2  ;;  %v1679_v27 = vpop.f32.mrf.mxu1  ;;  %v228_v59 = vld [vmem:[%s8595_s0 + $0x680] sm:$0xff]  ;;  %v532_v2 = vmax.f32 %v262_v54, 0.0 }
 0x184   :  { %2205 = vmatprep.subr.mxu0 %v8602_v0  ;;  %v1498_v26 = vadd.f32 %v1497_v22, %v6058_v15  ;;  %2136 = vmatmul.mubr.f32.gmra.mxu1 %v927_v11  ;;  %v263_v15 = vld [vmem:[%s8595_s0 + $0x798] sm:$0xff]  ;;  %v961_v11 = vld [vmem:[%s8596_s1 + $0xc88] sm:$0xff] }
 0x185   :  { %2388 = vmatprep.subr.mxu1 %v8602_v0  ;;  %v1499_v31 = vpop.f32.mrf.mxu0  ;;  %1955 = vmatprep.mubr.f32.mxu0 %v943_v1  ;;  %v1682_v39 = vpop.f32.mrf.mxu1  ;;  %v533_v53 = vmax.f32 %v263_v15, 0.0  ;;  %v531_v1 = vmax.f32 %v261_v4, 0.0  ;;  %v289_v22 = vld [vmem:[%s8595_s0 + $0x868] sm:$0xff] }
 0x186   :  { %2206 = vmatpush2.msra.mxu0 %v502_v12  ;;  %2389 = vmatpush2.msra.mxu1 %v535_v25  ;;  %v6655_v37 = vadd.f32 %v1682_v39, %v1498_v26  ;;  %v498_v12 = vmax.f32 %v228_v59, 0.0  ;;  %v559_v15 = vmax.f32 %v289_v22, 0.0  ;;  %v574_v39 = vld [vmem:[%s8596_s1 + $0x70] sm:$0xff] }
 0x187   :  { %1956 = vmatmul.mubr.f32.gmra.mxu0 %v942_v23  ;;  %v1502_v40 = vpop.f32.mrf.mxu0  ;;  %2207 = vmatprep.subr.mxu0 %v8602_v0  ;;  %v1684_v47 = vpop.f32.mrf.mxu1  ;;  %v572_v23 = vld [vmem:[%s8596_s1 + $0x60] sm:$0xff]  ;;  %v286_v59 = vld [vmem:[%s8595_s0 + $0x850] sm:$0xff] }
 0x188   :  { %2390 = vmatprep.subr.mxu1 %v8602_v0  ;;  %v1503_v46 = vadd.f32 %v1502_v40, %v6078_v28  ;;  %2140 = vmatprep.mubr.f32.mxu1 %v945_v33  ;;  %v959_v28 = vld [vmem:[%s8596_s1 + $0xc78] sm:$0xff]  ;;  %v590_v33 = vld [vmem:[%s8596_s1 + $0xf0] sm:$0xff] }
 0x189   :  { %2208 = vmatpush2.msra.mxu0 %v501_v29  ;;  %v1504_v56 = vpop.f32.mrf.mxu0  ;;  %2391 = vmatpush2.msra.mxu1 %v534_v36  ;;  %v1687_v51 = vpop.f32.mrf.mxu1  ;;  %v530_v29 = vmax.f32 %v260_v13, 0.0  ;;  %v285_v13 = vld [vmem:[%s8595_s0 + $0x848] sm:$0xff] }
 0x18a   :  { %2209 = vmatprep.subr.mxu0 %v8602_v0  ;;  %2141 = vmatmul.mubr.f32.gmra.mxu1 %v944_v41  ;;  %v6680_v60 = vadd.f32 %v1687_v51, %v1503_v46  ;;  %v287_v56 = vld [vmem:[%s8595_s0 + $0x858] sm:$0xff] }
 0x18b   :  { %2392 = vmatprep.subr.mxu1 %v8602_v0  ;;  %v1507_v62 = vpop.f32.mrf.mxu0  ;;  %1960 = vmatprep.mubr.f32.mxu0 %v960_v49  ;;  %v1689_v8 = vpop.f32.mrf.mxu1  ;;  %v607_v49 = vld [vmem:[%s8596_s1 + $0x178] sm:$0xff] }
 0x18c   :  { %2210 = vmatpush2.msra.mxu0 %v500_v43  ;;  %v1508_v7 = vadd.f32 %v1507_v62, %v6098_v42  ;;  %2393 = vmatpush2.msra.mxu1 %v533_v53  ;;  %v573_v42 = vld [vmem:[%s8596_s1 + $0x68] sm:$0xff]  ;;  %v606_v62 = vld [vmem:[%s8596_s1 + $0x170] sm:$0xff]  ;;  %v624_v8 = vld [vmem:[%s8596_s1 + $0x200] sm:$0xff] }
 0x18d   :  { %1961 = vmatmul.mubr.f32.gmra.mxu0 %v959_v28  ;;  %v1509_v10 = vpop.f32.mrf.mxu0  ;;  %2211 = vmatprep.subr.mxu0 %v8602_v0  ;;  %v1692_v14 = vpop.f32.mrf.mxu1  ;;  %v589_v43 = vld [vmem:[%s8596_s1 + $0xe8] sm:$0xff] }
 0x18e   :  { %2394 = vmatprep.subr.mxu1 %v8602_v0  ;;  %2145 = vmatprep.mubr.f32.mxu1 %v962_v63  ;;  %v6700_v25 = vadd.f32 %v1692_v14, %v1508_v7  ;;  %v609_v63 = vld [vmem:[%s8596_s1 + $0x188] sm:$0xff]  ;;  %v557_v7 = vmax.f32 %v287_v56, 0.0 }
 0x18f   :  { %2212 = vmatpush2.msra.mxu0 %v499_v57  ;;  %v1512_v16 = vpop.f32.mrf.mxu0  ;;  %2395 = vmatpush2.msra.mxu1 %v532_v2  ;;  %v1694_v27 = vpop.f32.mrf.mxu1 }
 0x190   :  { %2213 = vmatprep.subr.mxu0 %v8602_v0  ;;  %v1513_v26 = vadd.f32 %v1512_v16, %v6117_v55  ;;  %2146 = vmatmul.mubr.f32.gmra.mxu1 %v961_v11  ;;  %v288_v55 = vld [vmem:[%s8595_s0 + $0x860] sm:$0xff]  ;;  %v626_v16 = vld [vmem:[%s8596_s1 + $0x210] sm:$0xff] }
 0x191   :  { %2396 = vmatprep.subr.mxu1 %v8602_v0  ;;  %v1514_v31 = vpop.f32.mrf.mxu0  ;;  %2214 = vmatpush2.msra.mxu0 %v498_v12  ;;  %v1697_v36 = vpop.f32.mrf.mxu1  ;;  %v558_v54 = vmax.f32 %v288_v55, 0.0  ;;  %v556_v12 = vmax.f32 %v286_v59, 0.0  ;;  %v640_v55 = vld [vmem:[%s8596_s1 + $0x280] sm:$0xff] }
 0x192   :  { %2215 = vmatprep.mubr.f32.mxu0 %v573_v42  ;;  %2397 = vmatpush2.msra.mxu1 %v531_v1  ;;  %v6723_v40 = vadd.f32 %v1697_v36, %v1513_v26  ;;  %v623_v1 = vld [vmem:[%s8596_s1 + $0x1f8] sm:$0xff]  ;;  %v641_v26 = vld [vmem:[%s8596_s1 + $0x288] sm:$0xff] }
 0x193   :  { %2216 = vmatmul.mubr.f32.vlgmr.msra.gmra.mxu0 %v572_v23  ;;  %v1517_v41 = vpop.f32.mrf.mxu0  ;;  %2398 = vmatprep.subr.mxu1 %v8602_v0  ;;  %v1699_v47 = vpop.f32.mrf.mxu1 }
 0x194   :  { %2400 = vmatprep.mubr.f32.mxu1 %v575_v30  ;;  %v1518_v46 = vadd.f32 %v1517_v41, %v6138_v5  ;;  %2399 = vmatpush2.msra.mxu1 %v530_v29  ;;  %v591_v5 = vld [vmem:[%s8596_s1 + $0xf8] sm:$0xff]  ;;  %v555_v29 = vmax.f32 %v285_v13, 0.0  ;;  %v284_v30 = vld [vmem:[%s8595_s0 + $0x840] sm:$0xff]  ;;  %v674_v13 = vld [vmem:[%s8596_s1 + $0x390] sm:$0xff] }
 0x195   :  { %2220 = vmatprep.mubr.f32.mxu0 %v590_v33  ;;  %v1519_v53 = vpop.f32.mrf.mxu0  ;;  %2401 = vmatmul.mubr.f32.vlgmr.msra.gmra.mxu1 %v574_v39  ;;  %v1702_v28 = vpop.f32.mrf.mxu1  ;;  %v643_v39 = vld [vmem:[%s8596_s1 + $0x298] sm:$0xff] }
 0x196   :  { %4531 = vmatprep.subr.mxu0 %v559_v15  ;;  %2405 = vmatprep.mubr.f32.mxu1 %v592_v44  ;;  %v6742_v51 = vadd.f32 %v1702_v28, %v1518_v46  ;;  %v554_v44 = vmax.f32 %v284_v30, 0.0  ;;  %v658_v46 = vld [vmem:[%s8596_s1 + $0x310] sm:$0xff] }
 0x197   :  { %2221 = vmatmul.mubr.f32.gmra.mxu0 %v589_v43  ;;  %v1522_v57 = vpop.f32.mrf.mxu0  ;;  %v1704_v4 = vpop.f32.mrf.mxu1  ;;  %4595 = vmatprep.subr.mxu1 %v8602_v0 }
 0x198   :  { %2225 = vmatprep.mubr.f32.mxu0 %v607_v49  ;;  %v1523_v2 = vadd.f32 %v1522_v57, %v6161_v19  ;;  %4532 = vmatpush3.msra.mxu0 %v559_v15  ;;  %v608_v19 = vld [vmem:[%s8596_s1 + $0x180] sm:$0xff]  ;;  %v283_v15 = vld [vmem:[%s8595_s0 + $0x838] sm:$0xff] }
 0x199   :  { %v1524_v10 = vpop.f32.mrf.mxu0  ;;  %4533 = vmatprep.subr.mxu0 %v558_v54  ;;  %2406 = vmatmul.mubr.f32.gmra.mxu1 %v591_v5  ;;  %v1707_v11 = vpop.f32.mrf.mxu1  ;;  %v553_v53 = vmax.f32 %v283_v15, 0.0  ;;  %v657_v5 = vld [vmem:[%s8596_s1 + $0x308] sm:$0xff]  ;;  %v660_v57 = vld [vmem:[%s8596_s1 + $0x320] sm:$0xff] }
 0x19a   :  { %4534 = vmatpush3.msra.mxu0 %v558_v54  ;;  %2410 = vmatprep.mubr.f32.mxu1 %v609_v63  ;;  %v6764_v14 = vadd.f32 %v1707_v11, %v1523_v2  ;;  %v282_v54 = vld [vmem:[%s8595_s0 + $0x830] sm:$0xff]  ;;  %v675_v63 = vld [vmem:[%s8596_s1 + $0x398] sm:$0xff] }
 0x19b   :  { %2226 = vmatmul.mubr.f32.gmra.mxu0 %v606_v62  ;;  %v1527_v42 = vpop.f32.mrf.mxu0  ;;  %v1709_v23 = vpop.f32.mrf.mxu1  ;;  %4535 = vmatprep.subr.mxu0 %v557_v7  ;;  %v552_v4 = vmax.f32 %v282_v54, 0.0  ;;  %v708_v54 = vld [vmem:[%s8596_s1 + $0x4a0] sm:$0xff] }
 0x19c   :  { %2230 = vmatprep.mubr.f32.mxu0 %v624_v8  ;;  %v1528_v22 = vadd.f32 %v1527_v42, %v6183_v35  ;;  %4536 = vmatpush3.msra.mxu0 %v557_v7  ;;  %v625_v35 = vld [vmem:[%s8596_s1 + $0x208] sm:$0xff] }
 0x19d   :  { %v1529_v27 = vpop.f32.mrf.mxu0  ;;  %2411 = vmatmul.mubr.f32.gmra.mxu1 %v608_v19  ;;  %v1712_v31 = vpop.f32.mrf.mxu1  ;;  %4537 = vmatprep.subr.mxu0 %v556_v12  ;;  %v281_v7 = vld [vmem:[%s8595_s0 + $0x828] sm:$0xff] }
 0x19e   :  { %2415 = vmatprep.mubr.f32.mxu1 %v626_v16  ;;  %v6782_v33 = vadd.f32 %v1712_v31, %v1528_v22  ;;  %4538 = vmatpush3.msra.mxu0 %v556_v12  ;;  %v280_v12 = vld [vmem:[%s8595_s0 + $0x820] sm:$0xff]  ;;  %v677_v19 = vld [vmem:[%s8596_s1 + $0x3a8] sm:$0xff]  ;;  %v551_v16 = vmax.f32 %v281_v7, 0.0 }
 0x19f   :  { %2231 = vmatmul.mubr.f32.gmra.mxu0 %v623_v1  ;;  %v1532_v36 = vpop.f32.mrf.mxu0  ;;  %v1714_v43 = vpop.f32.mrf.mxu1  ;;  %4539 = vmatprep.subr.mxu0 %v555_v29  ;;  %v692_v22 = vld [vmem:[%s8596_s1 + $0x420] sm:$0xff]  ;;  %v550_v27 = vmax.f32 %v280_v12, 0.0 }
 0x1a0   :  { %2235 = vmatprep.mubr.f32.mxu0 %v641_v26  ;;  %v1533_v41 = vadd.f32 %v1532_v36, %v6205_v50  ;;  %4540 = vmatpush3.msra.mxu0 %v555_v29  ;;  %v642_v50 = vld [vmem:[%s8596_s1 + $0x290] sm:$0xff]  ;;  %v279_v29 = vld [vmem:[%s8595_s0 + $0x818] sm:$0xff] }
 0x1a1   :  { %v1534_v47 = vpop.f32.mrf.mxu0  ;;  %2416 = vmatmul.mubr.f32.gmra.mxu1 %v625_v35  ;;  %v1717_v49 = vpop.f32.mrf.mxu1  ;;  %4541 = vmatprep.subr.mxu0 %v554_v44  ;;  %v691_v35 = vld [vmem:[%s8596_s1 + $0x418] sm:$0xff]  ;;  %v694_v36 = vld [vmem:[%s8596_s1 + $0x430] sm:$0xff]  ;;  %v549_v43 = vmax.f32 %v279_v29, 0.0 }
 0x1a2   :  { %2420 = vmatprep.mubr.f32.mxu1 %v643_v39  ;;  %v6803_v56 = vadd.f32 %v1717_v49, %v1533_v41  ;;  %4542 = vmatpush3.msra.mxu0 %v554_v44  ;;  %v709_v39 = vld [vmem:[%s8596_s1 + $0x4a8] sm:$0xff]  ;;  %v278_v44 = vld [vmem:[%s8595_s0 + $0x810] sm:$0xff] }
 0x1a3   :  { %2236 = vmatmul.mubr.f32.gmra.mxu0 %v640_v55  ;;  %v1537_v28 = vpop.f32.mrf.mxu0  ;;  %v1719_v62 = vpop.f32.mrf.mxu1  ;;  %4543 = vmatprep.subr.mxu0 %v553_v53 }
 0x1a4   :  { %2240 = vmatprep.mubr.f32.mxu0 %v658_v46  ;;  %v1538_v59 = vadd.f32 %v1537_v28, %v6227_v3  ;;  %v659_v3 = vld [vmem:[%s8596_s1 + $0x318] sm:$0xff]  ;;  %4544 = vmatpush3.msra.mxu0 %v553_v53  ;;  %v277_v53 = vld [vmem:[%s8595_s0 + $0x808] sm:$0xff] }
 0x1a5   :  { %v1539_v2 = vpop.f32.mrf.mxu0  ;;  %2421 = vmatmul.mubr.f32.gmra.mxu1 %v642_v50  ;;  %v1722_v8 = vpop.f32.mrf.mxu1  ;;  %4545 = vmatprep.subr.mxu0 %v552_v4  ;;  %v711_v50 = vld [vmem:[%s8596_s1 + $0x4b8] sm:$0xff] }
 0x1a6   :  { %2425 = vmatprep.mubr.f32.mxu1 %v660_v57  ;;  %v6821_v10 = vadd.f32 %v1722_v8, %v1538_v59  ;;  %4546 = vmatpush3.msra.mxu0 %v552_v4  ;;  %v548_v57 = vmax.f32 %v278_v44, 0.0  ;;  %v726_v59 = vld [vmem:[%s8596_s1 + $0x530] sm:$0xff]  ;;  %v547_v2 = vmax.f32 %v277_v53, 0.0  ;;  %v276_v4 = vld [vmem:[%s8595_s0 + $0x800] sm:$0xff] }
 0x1a7   :  { %2241 = vmatmul.mubr.f32.gmra.mxu0 %v657_v5  ;;  %v1542_v11 = vpop.f32.mrf.mxu0  ;;  %v1724_v1 = vpop.f32.mrf.mxu1  ;;  %4547 = vmatprep.subr.mxu0 %v551_v16 }
 0x1a8   :  { %2245 = vmatprep.mubr.f32.mxu0 %v675_v63  ;;  %v1543_v42 = vadd.f32 %v1542_v11, %v6249_v18  ;;  %v676_v18 = vld [vmem:[%s8596_s1 + $0x3a0] sm:$0xff]  ;;  %4548 = vmatpush3.msra.mxu0 %v551_v16  ;;  %v546_v1 = vmax.f32 %v276_v4, 0.0  ;;  %v727_v16 = vld [vmem:[%s8596_s1 + $0x538] sm:$0xff] }
 0x1a9   :  { %v1544_v23 = vpop.f32.mrf.mxu0  ;;  %2426 = vmatmul.mubr.f32.gmra.mxu1 %v659_v3  ;;  %v1727_v26 = vpop.f32.mrf.mxu1  ;;  %4549 = vmatprep.subr.mxu0 %v550_v27  ;;  %v725_v3 = vld [vmem:[%s8596_s1 + $0x528] sm:$0xff]  ;;  %v728_v11 = vld [vmem:[%s8596_s1 + $0x540] sm:$0xff] }
 0x1aa   :  { %2430 = vmatprep.mubr.f32.mxu1 %v677_v19  ;;  %v6842_v30 = vadd.f32 %v1727_v26, %v1543_v42  ;;  %4550 = vmatpush3.msra.mxu0 %v550_v27  ;;  %v743_v19 = vld [vmem:[%s8596_s1 + $0x5b8] sm:$0xff]  ;;  %v745_v23 = vld [vmem:[%s8596_s1 + $0x5c8] sm:$0xff]  ;;  %v760_v27 = vld [vmem:[%s8596_s1 + $0x640] sm:$0xff] }
 0x1ab   :  { %2246 = vmatmul.mubr.f32.gmra.mxu0 %v674_v13  ;;  %v1547_v31 = vpop.f32.mrf.mxu0  ;;  %v1729_v55 = vpop.f32.mrf.mxu1  ;;  %4551 = vmatprep.subr.mxu0 %v549_v43 }
 0x1ac   :  { %2250 = vmatprep.mubr.f32.mxu0 %v692_v22  ;;  %v1548_v15 = vadd.f32 %v1547_v31, %v6271_v34  ;;  %v693_v34 = vld [vmem:[%s8596_s1 + $0x428] sm:$0xff]  ;;  %4552 = vmatpush3.msra.mxu0 %v549_v43  ;;  %v762_v55 = vld [vmem:[%s8596_s1 + $0x650] sm:$0xff] }
 0x1ad   :  { %v1549_v41 = vpop.f32.mrf.mxu0  ;;  %2431 = vmatmul.mubr.f32.gmra.mxu1 %v676_v18  ;;  %v1732_v46 = vpop.f32.mrf.mxu1  ;;  %4553 = vmatprep.subr.mxu0 %v548_v57  ;;  %v761_v43 = vld [vmem:[%s8596_s1 + $0x648] sm:$0xff] }
 0x1ae   :  { %2435 = vmatprep.mubr.f32.mxu1 %v694_v36  ;;  %v6860_v47 = vadd.f32 %v1732_v46, %v1548_v15  ;;  %4554 = vmatpush3.msra.mxu0 %v548_v57  ;;  %v759_v15 = vld [vmem:[%s8596_s1 + $0x638] sm:$0xff]  ;;  %v793_v57 = vld [vmem:[%s8596_s1 + $0x748] sm:$0xff] }
 0x1af   :  { %2251 = vmatmul.mubr.f32.gmra.mxu0 %v691_v35  ;;  %v1552_v49 = vpop.f32.mrf.mxu0  ;;  %v1734_v5 = vpop.f32.mrf.mxu1  ;;  %4555 = vmatprep.subr.mxu0 %v547_v2  ;;  %v744_v35 = vld [vmem:[%s8596_s1 + $0x5c0] sm:$0xff] }
 0x1b0   :  { %2255 = vmatprep.mubr.f32.mxu0 %v709_v39  ;;  %v1553_v28 = vadd.f32 %v1552_v49, %v6293_v52  ;;  %v710_v52 = vld [vmem:[%s8596_s1 + $0x4b0] sm:$0xff]  ;;  %4556 = vmatpush3.msra.mxu0 %v547_v2  ;;  %v779_v49 = vld [vmem:[%s8596_s1 + $0x6d8] sm:$0xff] }
 0x1b1   :  { %v1554_v62 = vpop.f32.mrf.mxu0  ;;  %2436 = vmatmul.mubr.f32.gmra.mxu1 %v693_v34  ;;  %v1737_v63 = vpop.f32.mrf.mxu1  ;;  %4557 = vmatprep.subr.mxu0 %v546_v1  ;;  %v776_v34 = vld [vmem:[%s8596_s1 + $0x6c0] sm:$0xff] }
 0x1b2   :  { %2440 = vmatprep.mubr.f32.mxu1 %v711_v50  ;;  %v6881_v7 = vadd.f32 %v1737_v63, %v1553_v28  ;;  %4558 = vmatpush3.msra.mxu0 %v546_v1  ;;  %v778_v28 = vld [vmem:[%s8596_s1 + $0x6d0] sm:$0xff]  ;;  %v811_v62 = vld [vmem:[%s8596_s1 + $0x7d8] sm:$0xff] }
 0x1b3   :  { %2256 = vmatmul.mubr.f32.gmra.mxu0 %v708_v54  ;;  %v1557_v8 = vpop.f32.mrf.mxu0  ;;  %v1739_v13 = vpop.f32.mrf.mxu1  ;;  %3699 = vmatprep.subr.mxu0 %v8602_v0  ;;  %v794_v54 = vld [vmem:[%s8596_s1 + $0x750] sm:$0xff] }
 0x1b4   :  { %2260 = vmatprep.mubr.f32.mxu0 %v726_v59  ;;  %v1558_v12 = vadd.f32 %v1557_v8, %v6315_v6  ;;  %v742_v6 = vld [vmem:[%s8596_s1 + $0x5b0] sm:$0xff] }
 0x1b5   :  { %v1559_v42 = vpop.f32.mrf.mxu0  ;;  %2441 = vmatmul.mubr.f32.gmra.mxu1 %v710_v52  ;;  %v795_v52 = vld [vmem:[%s8596_s1 + $0x758] sm:$0xff] }
 0x1b6   :  { %2445 = vmatprep.mubr.f32.mxu1 %v728_v11  ;;  %v1742_v22 = vpop.f32.mrf.mxu1  ;;  %v813_v11 = vld [vmem:[%s8596_s1 + $0x7e8] sm:$0xff] }
 0x1b7   :  { %2261 = vmatmul.mubr.f32.gmra.mxu0 %v725_v3  ;;  %v6902_v26 = vadd.f32 %v1742_v22, %v1558_v12  ;;  %v810_v3 = vld [vmem:[%s8596_s1 + $0x7d0] sm:$0xff] }
 0x1b8   :  { %2265 = vmatprep.mubr.f32.mxu0 %v743_v19  ;;  %v1744_v18 = vpop.f32.mrf.mxu1  ;;  %v812_v19 = vld [vmem:[%s8596_s1 + $0x7e0] sm:$0xff]  ;;  %v830_v22 = vld [vmem:[%s8596_s1 + $0x870] sm:$0xff] }
 0x1b9   :  { %v1562_v29 = vpop.f32.mrf.mxu0  ;;  %2446 = vmatmul.mubr.f32.gmra.mxu1 %v727_v16  ;;  %v827_v16 = vld [vmem:[%s8596_s1 + $0x858] sm:$0xff] }
 0x1ba   :  { %v1563_v31 = vadd.f32 %v1562_v29, %v6343_v24  ;;  %2450 = vmatprep.mubr.f32.mxu1 %v745_v23  ;;  %v777_v24 = vld [vmem:[%s8596_s1 + $0x6c8] sm:$0xff] }
 0x1bb   :  { %2266 = vmatmul.mubr.f32.gmra.mxu0 %v742_v6  ;;  %v1564_v36 = vpop.f32.mrf.mxu0  ;;  %v845_v23 = vld [vmem:[%s8596_s1 + $0x8e8] sm:$0xff] }
 0x1bc   :  { %2270 = vmatprep.mubr.f32.mxu0 %v760_v27  ;;  %v1747_v39 = vpop.f32.mrf.mxu1  ;;  %v829_v29 = vld [vmem:[%s8596_s1 + $0x868] sm:$0xff]  ;;  %v862_v36 = vld [vmem:[%s8596_s1 + $0x970] sm:$0xff] }
 0x1bd   :  { %2451 = vmatmul.mubr.f32.gmra.mxu1 %v744_v35  ;;  %v6921_v41 = vadd.f32 %v1747_v39, %v1563_v31  ;;  %v844_v31 = vld [vmem:[%s8596_s1 + $0x8e0] sm:$0xff]  ;;  %v846_v39 = vld [vmem:[%s8596_s1 + $0x8f0] sm:$0xff] }
 0x1be   :  { %2455 = vmatprep.mubr.f32.mxu1 %v762_v55  ;;  %v1749_v46 = vpop.f32.mrf.mxu1 }
 0x1bf   :  { %2271 = vmatmul.mubr.f32.gmra.mxu0 %v759_v15  ;;  %v1567_v44 = vpop.f32.mrf.mxu0  ;;  %v864_v46 = vld [vmem:[%s8596_s1 + $0x980] sm:$0xff] }
 0x1c0   :  { %2275 = vmatprep.mubr.f32.mxu0 %v777_v24  ;;  %v1568_v53 = vadd.f32 %v1567_v44, %v6379_v48  ;;  %v796_v48 = vld [vmem:[%s8596_s1 + $0x760] sm:$0xff]  ;;  %v861_v44 = vld [vmem:[%s8596_s1 + $0x968] sm:$0xff] }
 0x1c1   :  { %v1569_v50 = vpop.f32.mrf.mxu0  ;;  %2456 = vmatmul.mubr.f32.gmra.mxu1 %v761_v43 }
 0x1c2   :  { %2460 = vmatprep.mubr.f32.mxu1 %v779_v49  ;;  %v1752_v5 = vpop.f32.mrf.mxu1 }
 0x1c3   :  { %2276 = vmatmul.mubr.f32.gmra.mxu0 %v776_v34  ;;  %v6945_v59 = vadd.f32 %v1752_v5, %v1568_v53  ;;  %v863_v53 = vld [vmem:[%s8596_s1 + $0x978] sm:$0xff]  ;;  %v881_v5 = vld [vmem:[%s8596_s1 + $0xa08] sm:$0xff] }
 0x1c4   :  { %2280 = vmatprep.mubr.f32.mxu0 %v794_v54  ;;  %v1754_v2 = vpop.f32.mrf.mxu1 }
 0x1c5   :  { %v1572_v63 = vpop.f32.mrf.mxu0  ;;  %2461 = vmatmul.mubr.f32.gmra.mxu1 %v778_v28  ;;  %v878_v28 = vld [vmem:[%s8596_s1 + $0x9f0] sm:$0xff] }
 0x1c6   :  { %v1573_v4 = vadd.f32 %v1572_v63, %v6407_v9  ;;  %2465 = vmatprep.mubr.f32.mxu1 %v796_v48  ;;  %v828_v9 = vld [vmem:[%s8596_s1 + $0x860] sm:$0xff] }
 0x1c7   :  { %2281 = vmatmul.mubr.f32.gmra.mxu0 %v793_v57  ;;  %v1574_v8 = vpop.f32.mrf.mxu0  ;;  %v896_v48 = vld [vmem:[%s8596_s1 + $0xa80] sm:$0xff] }
 0x1c8   :  { %2285 = vmatprep.mubr.f32.mxu0 %v811_v62  ;;  %v1757_v12 = vpop.f32.mrf.mxu1  ;;  %v880_v63 = vld [vmem:[%s8596_s1 + $0xa00] sm:$0xff]  ;;  %v913_v8 = vld [vmem:[%s8596_s1 + $0xb08] sm:$0xff] }
 0x1c9   :  { %2466 = vmatmul.mubr.f32.gmra.mxu1 %v795_v52  ;;  %v6963_v13 = vadd.f32 %v1757_v12, %v1573_v4  ;;  %v895_v4 = vld [vmem:[%s8596_s1 + $0xa78] sm:$0xff]  ;;  %v897_v12 = vld [vmem:[%s8596_s1 + $0xa88] sm:$0xff] }
 0x1ca   :  { %2470 = vmatprep.mubr.f32.mxu1 %v813_v11  ;;  %v1759_v1 = vpop.f32.mrf.mxu1 }
 0x1cb   :  { %2286 = vmatmul.mubr.f32.gmra.mxu0 %v810_v3  ;;  %v1577_v42 = vpop.f32.mrf.mxu0  ;;  %v915_v1 = vld [vmem:[%s8596_s1 + $0xb18] sm:$0xff] }
 0x1cc   :  { %2290 = vmatprep.mubr.f32.mxu0 %v828_v9  ;;  %v1578_v6 = vadd.f32 %v1577_v42, %v6440_v32  ;;  %v847_v32 = vld [vmem:[%s8596_s1 + $0x8f8] sm:$0xff]  ;;  %v912_v42 = vld [vmem:[%s8596_s1 + $0xb00] sm:$0xff] }
 0x1cd   :  { %v1579_v27 = vpop.f32.mrf.mxu0  ;;  %2471 = vmatmul.mubr.f32.gmra.mxu1 %v812_v19 }
 0x1ce   :  { %2475 = vmatprep.mubr.f32.mxu1 %v830_v22  ;;  %v1762_v18 = vpop.f32.mrf.mxu1 }
 0x1cf   :  { %2291 = vmatmul.mubr.f32.gmra.mxu0 %v827_v16  ;;  %v6987_v35 = vadd.f32 %v1762_v18, %v1578_v6  ;;  %v914_v6 = vld [vmem:[%s8596_s1 + $0xb10] sm:$0xff]  ;;  %v932_v18 = vld [vmem:[%s8596_s1 + $0xba0] sm:$0xff] }
 0x1d0   :  { %2295 = vmatprep.mubr.f32.mxu0 %v845_v23  ;;  %v1764_v55 = vpop.f32.mrf.mxu1 }
 0x1d1   :  { %v1582_v15 = vpop.f32.mrf.mxu0  ;;  %2476 = vmatmul.mubr.f32.gmra.mxu1 %v829_v29  ;;  %v929_v29 = vld [vmem:[%s8596_s1 + $0xb88] sm:$0xff]  ;;  %v931_v55 = vld [vmem:[%s8596_s1 + $0xb98] sm:$0xff] }
 0x1d2   :  { %v1583_v24 = vadd.f32 %v1582_v15, %v6468_v58  ;;  %2480 = vmatprep.mubr.f32.mxu1 %v847_v32  ;;  %v879_v58 = vld [vmem:[%s8596_s1 + $0x9f8] sm:$0xff] }
 0x1d3   :  { %2296 = vmatmul.mubr.f32.gmra.mxu0 %v844_v31  ;;  %v1584_v43 = vpop.f32.mrf.mxu0  ;;  %v947_v32 = vld [vmem:[%s8596_s1 + $0xc18] sm:$0xff] }
 0x1d4   :  { %2300 = vmatprep.mubr.f32.mxu0 %v862_v36  ;;  %v1767_v34 = vpop.f32.mrf.mxu1  ;;  %v949_v43 = vld [vmem:[%s8596_s1 + $0xc28] sm:$0xff] }
 0x1d5   :  { %2481 = vmatmul.mubr.f32.gmra.mxu1 %v846_v39  ;;  %v7005_v49 = vadd.f32 %v1767_v34, %v1583_v24 }
 0x1d6   :  { %2485 = vmatprep.mubr.f32.mxu1 %v864_v46  ;;  %v1769_v50 = vpop.f32.mrf.mxu1 }
 0x1d7   :  { %2301 = vmatmul.mubr.f32.gmra.mxu0 %v861_v44  ;;  %v1587_v54 = vpop.f32.mrf.mxu0 }
 0x1d8   :  { %2305 = vmatprep.mubr.f32.mxu0 %v879_v58  ;;  %v1588_v57 = vadd.f32 %v1587_v54, %v6498_v20  ;;  %v898_v20 = vld [vmem:[%s8596_s1 + $0xa90] sm:$0xff]  ;;  %v964_v58 = vld [vmem:[%s8596_s1 + $0xca0] sm:$0xff] }
 0x1d9   :  { %v1589_v62 = vpop.f32.mrf.mxu0  ;;  %2486 = vmatmul.mubr.f32.gmra.mxu1 %v863_v53  ;;  %v948_v54 = vld [vmem:[%s8596_s1 + $0xc20] sm:$0xff] }
 0x1da   :  { %2490 = vmatprep.mubr.f32.mxu1 %v881_v5  ;;  %v1772_v2 = vpop.f32.mrf.mxu1  ;;  %v966_v5 = vld [vmem:[%s8596_s1 + $0xcb0] sm:$0xff]  ;;  %v576_v62 = vld [vmem:[%s8596_s1 + $0x80] sm:$0xff] }
 0x1db   :  { %2306 = vmatmul.mubr.f32.gmra.mxu0 %v878_v28  ;;  %v7029_v52 = vadd.f32 %v1772_v2, %v1588_v57 }
 0x1dc   :  { %2310 = vmatprep.mubr.f32.mxu0 %v896_v48  ;;  %v1774_v11 = vpop.f32.mrf.mxu1 }
 0x1dd   :  { %v1592_v3 = vpop.f32.mrf.mxu0  ;;  %2491 = vmatmul.mubr.f32.gmra.mxu1 %v880_v63 }
 0x1de   :  { %v1593_v9 = vadd.f32 %v1592_v3, %v6528_v45  ;;  %2495 = vmatprep.mubr.f32.mxu1 %v898_v20  ;;  %v930_v45 = vld [vmem:[%s8596_s1 + $0xb90] sm:$0xff] }
 0x1df   :  { %2311 = vmatmul.mubr.f32.gmra.mxu0 %v895_v4  ;;  %v1594_v19 = vpop.f32.mrf.mxu0  ;;  %v965_v4 = vld [vmem:[%s8596_s1 + $0xca8] sm:$0xff] }
 0x1e0   :  { %2315 = vmatprep.mubr.f32.mxu0 %v913_v8  ;;  %v1777_v16 = vpop.f32.mrf.mxu1 }
 0x1e1   :  { %2496 = vmatmul.mubr.f32.gmra.mxu1 %v897_v12  ;;  %v7047_v22 = vadd.f32 %v1777_v16, %v1593_v9  ;;  %v610_v9 = vld [vmem:[%s8596_s1 + $0x190] sm:$0xff] }
 0x1e2   :  { %2500 = vmatprep.mubr.f32.mxu1 %v915_v1  ;;  %v1779_v23 = vpop.f32.mrf.mxu1 }
 0x1e3   :  { %2316 = vmatmul.mubr.f32.gmra.mxu0 %v912_v42  ;;  %v1847_v27 = vpop.f32.mrf.mxu0 }
 0x1e4   :  { %2320 = vmatprep.mubr.f32.mxu0 %v930_v45  ;;  %v1848_v31 = vadd.f32 %v1847_v27, %v6573_v21  ;;  %v946_v21 = vld [vmem:[%s8596_s1 + $0xc10] sm:$0xff]  ;;  %v627_v45 = vld [vmem:[%s8596_s1 + $0x218] sm:$0xff] }
 0x1e5   :  { %v1849_v36 = vpop.f32.mrf.mxu0  ;;  %2501 = vmatmul.mubr.f32.gmra.mxu1 %v914_v6  ;;  %v2032_v15 = vpop.f32.mrf.mxu1  ;;  %v644_v6 = vld [vmem:[%s8596_s1 + $0x2a0] sm:$0xff] }
 0x1e6   :  { %2505 = vmatprep.mubr.f32.mxu1 %v932_v18  ;;  %v7065_v24 = vadd.f32 %v2032_v15, %v1848_v31  ;;  %v661_v31 = vld [vmem:[%s8596_s1 + $0x328] sm:$0xff]  ;;  %v678_v36 = vld [vmem:[%s8596_s1 + $0x3b0] sm:$0xff] }
 0x1e7   :  { %2321 = vmatmul.mubr.f32.gmra.mxu0 %v929_v29  ;;  %v1852_v39 = vpop.f32.mrf.mxu0  ;;  %v2034_v46 = vpop.f32.mrf.mxu1 }
 0x1e8   :  { %2325 = vmatprep.mubr.f32.mxu0 %v947_v32  ;;  %v1853_v44 = vadd.f32 %v1852_v39, %v6590_v38  ;;  %v963_v38 = vld [vmem:[%s8596_s1 + $0xc98] sm:$0xff]  ;;  %v712_v46 = vld [vmem:[%s8596_s1 + $0x4c0] sm:$0xff] }
 0x1e9   :  { %v1854_v34 = vpop.f32.mrf.mxu0  ;;  %2506 = vmatmul.mubr.f32.gmra.mxu1 %v931_v55  ;;  %v2037_v53 = vpop.f32.mrf.mxu1 }
 0x1ea   :  { %2510 = vmatprep.mubr.f32.mxu1 %v949_v43  ;;  %v7080_v50 = vadd.f32 %v2037_v53, %v1853_v44  ;;  %v695_v43 = vld [vmem:[%s8596_s1 + $0x438] sm:$0xff] }
 0x1eb   :  { %2326 = vmatmul.mubr.f32.gmra.mxu0 %v946_v21  ;;  %v1857_v28 = vpop.f32.mrf.mxu0  ;;  %v2039_v48 = vpop.f32.mrf.mxu1 }
 0x1ec   :  { %2330 = vmatprep.mubr.f32.mxu0 %v964_v58  ;;  %v1858_v57 = vadd.f32 %v1857_v28, %v6615_v61  ;;  %v593_v61 = vld [vmem:[%s8596_s1 + $0x108] sm:$0xff] }
 0x1ed   :  { %v1859_v63 = vpop.f32.mrf.mxu0  ;;  %2511 = vmatmul.mubr.f32.gmra.mxu1 %v948_v54  ;;  %v2042_v2 = vpop.f32.mrf.mxu1  ;;  %v729_v28 = vld [vmem:[%s8596_s1 + $0x548] sm:$0xff] }
 0x1ee   :  { %2515 = vmatprep.mubr.f32.mxu1 %v966_v5  ;;  %v7095_v20 = vadd.f32 %v2042_v2, %v1858_v57  ;;  %v746_v5 = vld [vmem:[%s8596_s1 + $0x5d0] sm:$0xff]  ;;  %v763_v2 = vld [vmem:[%s8596_s1 + $0x658] sm:$0xff] }
 0x1ef   :  { %2331 = vmatmul.mubr.f32.gmra.mxu0 %v963_v38  ;;  %v1862_v8 = vpop.f32.mrf.mxu0  ;;  %v2044_v11 = vpop.f32.mrf.mxu1 }
 0x1f0   :  { %4559 = vmatprep.mubr.msk.f32.mxu0 %vm968_vm0, %v576_v62  ;;  %v1863_v3 = vadd.f32 %v1862_v8, %v6638_v17  ;;  %v780_v8 = vld [vmem:[%s8596_s1 + $0x6e0] sm:$0xff] }
 0x1f1   :  { %v1864_v12 = vpop.f32.mrf.mxu0  ;;  %2516 = vmatmul.mubr.f32.gmra.mxu1 %v965_v4  ;;  %v2047_v19 = vpop.f32.mrf.mxu1 }
 0x1f2   :  { %v7106_v42 = vadd.f32 %v2047_v19, %v1863_v3  ;;  %v797_v12 = vld [vmem:[%s8596_s1 + $0x768] sm:$0xff] }
 0x1f3   :  { %4560 = vmatmul.mubr.msk.f32.vlgmr.msra.gmra.mxu0 %vm968_vm0, %v593_v61  ;;  %v1867_v1 = vpop.f32.mrf.mxu0  ;;  %v2049_v16 = vpop.f32.mrf.mxu1 }
 0x1f4   :  { %4562 = vmatprep.mubr.msk.f32.mxu0 %vm968_vm0, %v610_v9  ;;  %v1868_v17 = vadd.f32 %v1867_v1, %v6655_v37  ;;  %v814_v1 = vld [vmem:[%s8596_s1 + $0x7f0] sm:$0xff] }
 0x1f5   :  { %v1869_v23 = vpop.f32.mrf.mxu0  ;;  %v2052_v27 = vpop.f32.mrf.mxu1 }
 0x1f6   :  { %v7117_v29 = vadd.f32 %v2052_v27, %v1868_v17  ;;  %v831_v23 = vld [vmem:[%s8596_s1 + $0x878] sm:$0xff] }
 0x1f7   :  { %4563 = vmatmul.mubr.msk.f32.gmra.mxu0 %vm968_vm0, %v627_v45  ;;  %v1872_v18 = vpop.f32.mrf.mxu0  ;;  %v2054_v32 = vpop.f32.mrf.mxu1 }
 0x1f8   :  { %4565 = vmatprep.mubr.msk.f32.mxu0 %vm968_vm0, %v644_v6  ;;  %v1873_v37 = vadd.f32 %v1872_v18, %v6680_v60  ;;  %v848_v18 = vld [vmem:[%s8596_s1 + $0x900] sm:$0xff] }
 0x1f9   :  { %v1874_v15 = vpop.f32.mrf.mxu0  ;;  %v2057_v55 = vpop.f32.mrf.mxu1 }
 0x1fa   :  { %v7128_v39 = vadd.f32 %v2057_v55, %v1873_v37  ;;  %v865_v15 = vld [vmem:[%s8596_s1 + $0x988] sm:$0xff] }
 0x1fb   :  { %4566 = vmatmul.mubr.msk.f32.gmra.mxu0 %vm968_vm0, %v661_v31  ;;  %v1877_v21 = vpop.f32.mrf.mxu0  ;;  %v2059_v44 = vpop.f32.mrf.mxu1 }
 0x1fc   :  { %4568 = vmatprep.mubr.msk.f32.mxu0 %vm968_vm0, %v678_v36  ;;  %v1878_v60 = vadd.f32 %v1877_v21, %v6700_v25  ;;  %v882_v21 = vld [vmem:[%s8596_s1 + $0xa10] sm:$0xff] }
 0x1fd   :  { %v1879_v58 = vpop.f32.mrf.mxu0  ;;  %v2062_v34 = vpop.f32.mrf.mxu1 }
 0x1fe   :  { %v7139_v53 = vadd.f32 %v2062_v34, %v1878_v60  ;;  %v899_v58 = vld [vmem:[%s8596_s1 + $0xa98] sm:$0xff] }
 0x1ff   :  { %4569 = vmatmul.mubr.msk.f32.gmra.mxu0 %vm968_vm0, %v695_v43  ;;  %v1882_v54 = vpop.f32.mrf.mxu0  ;;  %v2064_v38 = vpop.f32.mrf.mxu1 }
 0x200   :  { %4571 = vmatprep.mubr.msk.f32.mxu0 %vm968_vm0, %v712_v46  ;;  %v1883_v25 = vadd.f32 %v1882_v54, %v6723_v40  ;;  %v916_v54 = vld [vmem:[%s8596_s1 + $0xb20] sm:$0xff] }
 0x201   :  { %v1884_v57 = vpop.f32.mrf.mxu0  ;;  %v2067_v48 = vpop.f32.mrf.mxu1 }
 0x202   :  { %v7150_v62 = vadd.f32 %v2067_v48, %v1883_v25  ;;  %v933_v57 = vld [vmem:[%s8596_s1 + $0xba8] sm:$0xff] }
 0x203   :  { %4572 = vmatmul.mubr.msk.f32.gmra.mxu0 %vm968_vm0, %v729_v28  ;;  %v1887_v63 = vpop.f32.mrf.mxu0  ;;  %v2069_v4 = vpop.f32.mrf.mxu1 }
 0x204   :  { %4574 = vmatprep.mubr.msk.f32.mxu0 %vm968_vm0, %v746_v5  ;;  %v1888_v40 = vadd.f32 %v1887_v63, %v6742_v51  ;;  %v950_v63 = vld [vmem:[%s8596_s1 + $0xc30] sm:$0xff] }
 0x205   :  { %v1889_v61 = vpop.f32.mrf.mxu0  ;;  %v2072_v3 = vpop.f32.mrf.mxu1 }
 0x206   :  { %v7161_v11 = vadd.f32 %v2072_v3, %v1888_v40  ;;  %v967_v61 = vld [vmem:[%s8596_s1 + $0xcb8] sm:$0xff]  ;;  %s4708_s1 = smov 8  }
 0x207   :  { %4575 = vmatmul.mubr.msk.f32.gmra.mxu0 %vm968_vm0, %v763_v2  ;;  %v1892_v9 = vpop.f32.mrf.mxu0  ;;  %v2074_v19 = vpop.f32.mrf.mxu1 }
 0x208   :  { %4577 = vmatprep.mubr.msk.f32.mxu0 %vm968_vm0, %v780_v8  ;;  %v1893_v51 = vadd.f32 %v1892_v9, %v6764_v14 }
 0x209   :  { %v1894_v45 = vpop.f32.mrf.mxu0  ;;  %v2077_v17 = vpop.f32.mrf.mxu1 }
 0x20a   :  { %v7172_v16 = vadd.f32 %v2077_v17, %v1893_v51 }
 0x20b   :  { %4578 = vmatmul.mubr.msk.f32.gmra.mxu0 %vm968_vm0, %v797_v12  ;;  %v1897_v6 = vpop.f32.mrf.mxu0  ;;  %v2079_v27 = vpop.f32.mrf.mxu1 }
 0x20c   :  { %4580 = vmatprep.mubr.msk.f32.mxu0 %vm968_vm0, %v814_v1  ;;  %v1898_v14 = vadd.f32 %v1897_v6, %v6782_v33 }
 0x20d   :  { %v1899_v31 = vpop.f32.mrf.mxu0  ;;  %v2082_v37 = vpop.f32.mrf.mxu1 }
 0x20e   :  { %v7183_v32 = vadd.f32 %v2082_v37, %v1898_v14 }
 0x20f   :  { %4581 = vmatmul.mubr.msk.f32.gmra.mxu0 %vm968_vm0, %v831_v23  ;;  %v1902_v36 = vpop.f32.mrf.mxu0  ;;  %v2084_v55 = vpop.f32.mrf.mxu1 }
 0x210   :  { %4583 = vmatprep.mubr.msk.f32.mxu0 %vm968_vm0, %v848_v18  ;;  %v1903_v33 = vadd.f32 %v1902_v36, %v6803_v56 }
 0x211   :  { %v1904_v43 = vpop.f32.mrf.mxu0  ;;  %v2087_v60 = vpop.f32.mrf.mxu1 }
 0x212   :  { %v7194_v44 = vadd.f32 %v2087_v60, %v1903_v33 }
 0x213   :  { %4584 = vmatmul.mubr.msk.f32.gmra.mxu0 %vm968_vm0, %v865_v15  ;;  %v1907_v46 = vpop.f32.mrf.mxu0  ;;  %v2089_v34 = vpop.f32.mrf.mxu1 }
 0x214   :  { %4586 = vmatprep.mubr.msk.f32.mxu0 %vm968_vm0, %v882_v21  ;;  %v1908_v56 = vadd.f32 %v1907_v46, %v6821_v10 }
 0x215   :  { %v1909_v28 = vpop.f32.mrf.mxu0  ;;  %v2092_v25 = vpop.f32.mrf.mxu1 }
 0x216   :  { %v7205_v38 = vadd.f32 %v2092_v25, %v1908_v56 }
 0x217   :  { %4587 = vmatmul.mubr.msk.f32.gmra.mxu0 %vm968_vm0, %v899_v58  ;;  %v1912_v5 = vpop.f32.mrf.mxu0  ;;  %v2094_v48 = vpop.f32.mrf.mxu1 }
 0x218   :  { %4589 = vmatprep.mubr.msk.f32.mxu0 %vm968_vm0, %v916_v54  ;;  %v1913_v10 = vadd.f32 %v1912_v5, %v6842_v30 }
 0x219   :  { %v1914_v2 = vpop.f32.mrf.mxu0  ;;  %v2097_v40 = vpop.f32.mrf.mxu1 }
 0x21a   :  { %v7216_v4 = vadd.f32 %v2097_v40, %v1913_v10 }
 0x21b   :  { %4590 = vmatmul.mubr.msk.f32.gmra.mxu0 %vm968_vm0, %v933_v57  ;;  %v1917_v8 = vpop.f32.mrf.mxu0  ;;  %v2099_v3 = vpop.f32.mrf.mxu1 }
 0x21c   :  { %4592 = vmatprep.mubr.msk.f32.mxu0 %vm968_vm0, %v950_v63  ;;  %v1918_v30 = vadd.f32 %v1917_v8, %v6860_v47 }
 0x21d   :  { %v1919_v9 = vpop.f32.mrf.mxu0  ;;  %v2102_v12 = vpop.f32.mrf.mxu1 }
 0x21e   :  { %v7224_v51 = vadd.f32 %v2102_v12, %v1918_v30 }
 0x21f   :  { %4593 = vmatmul.mubr.msk.f32.gmra.mxu0 %vm968_vm0, %v967_v61  ;;  %v1922_v19 = vpop.f32.mrf.mxu0  ;;  %v2104_v45 = vpop.f32.mrf.mxu1 }
 0x220   :  { %v1923_v1 = vadd.f32 %v1922_v19, %v6881_v7 }
 0x221   :  { %v1924_v17 = vpop.f32.mrf.mxu0  ;;  %v2107_v6 = vpop.f32.mrf.mxu1 }
 0x222   :  { %v7227_v23 = vadd.f32 %v2107_v6, %v1923_v1 }
 0x223   :  { %v1927_v14 = vpop.f32.mrf.mxu0  ;;  %v2109_v18 = vpop.f32.mrf.mxu1 }
 0x224   :  { %v1928_v27 = vadd.f32 %v1927_v14, %v6902_v26 }
 0x225   :  { %v1929_v47 = vpop.f32.mrf.mxu0 }
 0x226   :  { %v2112_v31 = vpop.f32.mrf.mxu1 }
 0x227   :  { %v7230_v37 = vadd.f32 %v2112_v31, %v1928_v27 }
 0x228   :  { %v2114_v15 = vpop.f32.mrf.mxu1 }
 0x229   :  { %v1932_v36 = vpop.f32.mrf.mxu0 }
 0x22a   :  { %v1933_v33 = vadd.f32 %v1932_v36, %v6921_v41 }
 0x22b   :  { %v1934_v55 = vpop.f32.mrf.mxu0 }
 0x22c   :  { %v2117_v21 = vpop.f32.mrf.mxu1 }
 0x22d   :  { %v7233_v7 = vadd.f32 %v2117_v21, %v1933_v33 }
 0x22e   :  { %v2119_v60 = vpop.f32.mrf.mxu1 }
 0x22f   :  { %v1937_v43 = vpop.f32.mrf.mxu0 }
 0x230   :  { %v1938_v46 = vadd.f32 %v1937_v43, %v6945_v59 }
 0x231   :  { %v1939_v58 = vpop.f32.mrf.mxu0 }
 0x232   :  { %v2122_v56 = vpop.f32.mrf.mxu1 }
 0x233   :  { %v7236_v26 = vadd.f32 %v2122_v56, %v1938_v46 }
 0x234   :  { %v2124_v54 = vpop.f32.mrf.mxu1 }
 0x235   :  { %v1942_v34 = vpop.f32.mrf.mxu0 }
 0x236   :  { %v1943_v28 = vadd.f32 %v1942_v34, %v6963_v13 }
 0x237   :  { %v1944_v25 = vpop.f32.mrf.mxu0 }
 0x238   :  { %v2127_v5 = vpop.f32.mrf.mxu1 }
 0x239   :  { %v7239_v57 = vadd.f32 %v2127_v5, %v1943_v28 }
 0x23a   :  { %v2129_v10 = vpop.f32.mrf.mxu1 }
 0x23b   :  { %v1947_v41 = vpop.f32.mrf.mxu0 }
 0x23c   :  { %v1948_v48 = vadd.f32 %v1947_v41, %v6987_v35 }
 0x23d   :  { %v1949_v63 = vpop.f32.mrf.mxu0 }
 0x23e   :  { %v2132_v2 = vpop.f32.mrf.mxu1 }
 0x23f   :  { %v7242_v40 = vadd.f32 %v2132_v2, %v1948_v48 }
 0x240   :  { %v2134_v8 = vpop.f32.mrf.mxu1 }
 0x241   :  { %v1952_v59 = vpop.f32.mrf.mxu0 }
 0x242   :  { %v1953_v61 = vadd.f32 %v1952_v59, %v7005_v49 }
 0x243   :  { %v1954_v30 = vpop.f32.mrf.mxu0 }
 0x244   :  { %v2137_v3 = vpop.f32.mrf.mxu1 }
 0x245   :  { %v7245_v9 = vadd.f32 %v2137_v3, %v1953_v61 }
 0x246   :  { %v2139_v12 = vpop.f32.mrf.mxu1 }
 0x247   :  { %v1957_v13 = vpop.f32.mrf.mxu0 }
 0x248   :  { %v1958_v19 = vadd.f32 %v1957_v13, %v7029_v52 }
 0x249   :  { %v1959_v1 = vpop.f32.mrf.mxu0 }
 0x24a   :  { %v2142_v45 = vpop.f32.mrf.mxu1 }
 0x24b   :  { %v7248_v17 = vadd.f32 %v2142_v45, %v1958_v19 }
 0x24c   :  { %v2144_v6 = vpop.f32.mrf.mxu1 }
 0x24d   :  { %v1962_v35 = vpop.f32.mrf.mxu0 }
 0x24e   :  { %v1963_v14 = vadd.f32 %v1962_v35, %v7047_v22 }
 0x24f   :  { %v1964_v27 = vpop.f32.mrf.mxu0 }
 0x250   :  { %v2147_v18 = vpop.f32.mrf.mxu1 }
 0x251   :  { %v7251_v47 = vadd.f32 %v2147_v18, %v1963_v14 }
 0x252   :  { %v2149_v49 = vpop.f32.mrf.mxu1 }
 0x253   :  { %v2217_v31 = vpop.f32.mrf.mxu0 }
 0x254   :  { %v2218_v36 = vadd.f32 %v2217_v31, %v7065_v24 }
 0x255   :  { %v2219_v15 = vpop.f32.mrf.mxu0  ;;  %v2402_v33 = vpop.f32.mrf.mxu1 }
 0x256   :  { %v7254_v55 = vadd.f32 %v2402_v33, %v2218_v36 }
 0x257   :  { %v2222_v52 = vpop.f32.mrf.mxu0  ;;  %v2404_v43 = vpop.f32.mrf.mxu1 }
 0x258   :  { %v2223_v21 = vadd.f32 %v2222_v52, %v7080_v50 }
 0x259   :  { %v2224_v60 = vpop.f32.mrf.mxu0  ;;  %v2407_v46 = vpop.f32.mrf.mxu1 }
 0x25a   :  { %v7257_v58 = vadd.f32 %v2407_v46, %v2223_v21 }
 0x25b   :  { %v2227_v22 = vpop.f32.mrf.mxu0  ;;  %v2409_v34 = vpop.f32.mrf.mxu1 }
 0x25c   :  { %v2228_v56 = vadd.f32 %v2227_v22, %v7095_v20 }
 0x25d   :  { %v2229_v54 = vpop.f32.mrf.mxu0  ;;  %v2412_v28 = vpop.f32.mrf.mxu1 }
 0x25e   :  { %v7260_v25 = vadd.f32 %v2412_v28, %v2228_v56 }
 0x25f   :  { %v2232_v24 = vpop.f32.mrf.mxu0  ;;  %v2414_v41 = vpop.f32.mrf.mxu1 }
 0x260   :  { %v2233_v5 = vadd.f32 %v2232_v24, %v7106_v42 }
 0x261   :  { %v2234_v10 = vpop.f32.mrf.mxu0  ;;  %v2417_v48 = vpop.f32.mrf.mxu1 }
 0x262   :  { %v7263_v50 = vadd.f32 %v2417_v48, %v2233_v5 }
 0x263   :  { %v2237_v63 = vpop.f32.mrf.mxu0  ;;  %v2419_v59 = vpop.f32.mrf.mxu1 }
 0x264   :  { %v2238_v2 = vadd.f32 %v2237_v63, %v7117_v29 }
 0x265   :  { %v2239_v8 = vpop.f32.mrf.mxu0  ;;  %v2422_v61 = vpop.f32.mrf.mxu1 }
 0x266   :  { %v7266_v20 = vadd.f32 %v2422_v61, %v2238_v2 }
 0x267   :  { %v2242_v30 = vpop.f32.mrf.mxu0  ;;  %v2424_v13 = vpop.f32.mrf.mxu1 }
 0x268   :  { %v2243_v3 = vadd.f32 %v2242_v30, %v7128_v39 }
 0x269   :  { %v2244_v12 = vpop.f32.mrf.mxu0  ;;  %v2427_v19 = vpop.f32.mrf.mxu1 }
 0x26a   :  { %v7269_v42 = vadd.f32 %v2427_v19, %v2243_v3 }
 0x26b   :  { %v2247_v1 = vpop.f32.mrf.mxu0  ;;  %v2429_v35 = vpop.f32.mrf.mxu1 }
 0x26c   :  { %v2248_v45 = vadd.f32 %v2247_v1, %v7139_v53 }
 0x26d   :  { %v2249_v6 = vpop.f32.mrf.mxu0  ;;  %v2432_v14 = vpop.f32.mrf.mxu1 }
 0x26e   :  { %v7272_v29 = vadd.f32 %v2432_v14, %v2248_v45 }
 0x26f   :  { %v2252_v27 = vpop.f32.mrf.mxu0  ;;  %v2434_v49 = vpop.f32.mrf.mxu1 }
 0x270   :  { %v2253_v18 = vadd.f32 %v2252_v27, %v7150_v62 }
 0x271   :  { %v2254_v31 = vpop.f32.mrf.mxu0  ;;  %v2437_v36 = vpop.f32.mrf.mxu1 }
 0x272   :  { %v7275_v39 = vadd.f32 %v2437_v36, %v2253_v18 }
 0x273   :  { %v2257_v15 = vpop.f32.mrf.mxu0  ;;  %v2439_v52 = vpop.f32.mrf.mxu1 }
 0x274   :  { %v2258_v33 = vadd.f32 %v2257_v15, %v7161_v11 }
 0x275   :  { %v2259_v21 = vpop.f32.mrf.mxu0  ;;  %v2442_v43 = vpop.f32.mrf.mxu1 }
 0x276   :  { %v7278_v53 = vadd.f32 %v2442_v43, %v2258_v33 }
 0x277   :  { %v2262_v60 = vpop.f32.mrf.mxu0  ;;  %v2444_v22 = vpop.f32.mrf.mxu1 }
 0x278   :  { %v2263_v46 = vadd.f32 %v2262_v60, %v7172_v16 }
 0x279   :  { %v2264_v56 = vpop.f32.mrf.mxu0  ;;  %v2447_v34 = vpop.f32.mrf.mxu1 }
 0x27a   :  { %v7281_v62 = vadd.f32 %v2447_v34, %v2263_v46 }
 0x27b   :  { %v2267_v54 = vpop.f32.mrf.mxu0  ;;  %v2449_v24 = vpop.f32.mrf.mxu1 }
 0x27c   :  { %v2268_v28 = vadd.f32 %v2267_v54, %v7183_v32 }
 0x27d   :  { %v2269_v5 = vpop.f32.mrf.mxu0  ;;  %v2452_v41 = vpop.f32.mrf.mxu1 }
 0x27e   :  { %v7284_v11 = vadd.f32 %v2452_v41, %v2268_v28 }
 0x27f   :  { %v2272_v10 = vpop.f32.mrf.mxu0  ;;  %v2454_v63 = vpop.f32.mrf.mxu1 }
 0x280   :  { %v2273_v48 = vadd.f32 %v2272_v10, %v7194_v44 }
 0x281   :  { %v2274_v2 = vpop.f32.mrf.mxu0  ;;  %v2457_v59 = vpop.f32.mrf.mxu1 }
 0x282   :  { %v7287_v16 = vadd.f32 %v2457_v59, %v2273_v48 }
 0x283   :  { %v2277_v8 = vpop.f32.mrf.mxu0  ;;  %v2459_v30 = vpop.f32.mrf.mxu1 }
 0x284   :  { %v2278_v61 = vadd.f32 %v2277_v8, %v7205_v38 }
 0x285   :  { %v2279_v3 = vpop.f32.mrf.mxu0  ;;  %v2462_v13 = vpop.f32.mrf.mxu1 }
 0x286   :  { %v7290_v32 = vadd.f32 %v2462_v13, %v2278_v61 }
 0x287   :  { %v2282_v12 = vpop.f32.mrf.mxu0  ;;  %v2464_v1 = vpop.f32.mrf.mxu1 }
 0x288   :  { %v7293_v19 = vadd.f32 %v2282_v12, %v7216_v4 }
 0x289   :  { %v2284_v45 = vpop.f32.mrf.mxu0  ;;  %v7295_v44 = vpop.f32.mrf.mxu1 }
 0x28b   :  { %v2287_v35 = vpop.f32.mrf.mxu0  ;;  %v2469_v14 = vpop.f32.mrf.mxu1 }
 0x28c   :  { %v2288_v6 = vadd.f32 %v2287_v35, %v7224_v51 }
 0x28d   :  { %v2289_v27 = vpop.f32.mrf.mxu0  ;;  %v2472_v18 = vpop.f32.mrf.mxu1 }
 0x28e   :  { %v7298_v38 = vadd.f32 %v2472_v18, %v2288_v6 }
 0x28f   :  { %v7300_v49 = vpop.f32.mrf.mxu0  ;;  %v2474_v31 = vpop.f32.mrf.mxu1 }
 0x291   :  { %v2294_v36 = vpop.f32.mrf.mxu0  ;;  %v7302_v15 = vpop.f32.mrf.mxu1 }
 0x293   :  { %v2297_v4 = vpop.f32.mrf.mxu0  ;;  %v2479_v52 = vpop.f32.mrf.mxu1 }
 0x294   :  { %v2298_v33 = vadd.f32 %v2297_v4, %v7230_v37 }
 0x295   :  { %v2299_v21 = vpop.f32.mrf.mxu0  ;;  %v2482_v43 = vpop.f32.mrf.mxu1 }
 0x296   :  { %v7305_v60 = vadd.f32 %v2482_v43, %v2298_v33 }
 0x297   :  { %v2302_v51 = vpop.f32.mrf.mxu0  ;;  %v2484_v22 = vpop.f32.mrf.mxu1 }
 0x298   :  { %v2303_v46 = vadd.f32 %v2302_v51, %v7233_v7 }
 0x299   :  { %v2304_v56 = vpop.f32.mrf.mxu0  ;;  %v2487_v34 = vpop.f32.mrf.mxu1 }
 0x29a   :  { %v7308_v54 = vadd.f32 %v2487_v34, %v2303_v46 }
 0x29b   :  { %v2307_v28 = vpop.f32.mrf.mxu0  ;;  %v2489_v5 = vpop.f32.mrf.mxu1 }
 0x29c   :  { %v2308_v24 = vadd.f32 %v2307_v28, %v7236_v26 }
 0x29d   :  { %v2309_v41 = vpop.f32.mrf.mxu0  ;;  %v2492_v10 = vpop.f32.mrf.mxu1 }
 0x29e   :  { %v7311_v37 = vadd.f32 %v2492_v10, %v2308_v24 }
 0x29f   :  { %v2312_v48 = vpop.f32.mrf.mxu0  ;;  %v2494_v2 = vpop.f32.mrf.mxu1 }
 0x2a0   :  { %v2313_v63 = vadd.f32 %v2312_v48, %v7239_v57  ;;  %v2293_v2 = vadd.f32 %v7300_v49, %v7227_v23 }
 0x2a1   :  { %v2314_v59 = vpop.f32.mrf.mxu0  ;;  %v2497_v8 = vpop.f32.mrf.mxu1 }
 0x2a2   :  { %v7314_v7 = vadd.f32 %v2497_v8, %v2313_v63  ;;  %v2468_v63 = vadd.f32 %v7295_v44, %v7293_v19 }
 0x2a3   :  { %v2317_v61 = vpop.f32.mrf.mxu0  ;;  %v2499_v3 = vpop.f32.mrf.mxu1 }
 0x2a4   :  { %v2318_v30 = vadd.f32 %v2317_v61, %v7242_v40 }
 0x2a5   :  { %v2319_v13 = vpop.f32.mrf.mxu0  ;;  %v2502_v12 = vpop.f32.mrf.mxu1 }
 0x2a6   :  { %v7317_v26 = vadd.f32 %v2502_v12, %v2318_v30  ;;  %v2478_v30 = vadd.f32 %v7302_v15, %v2293_v2 }
 0x2a7   :  { %v2322_v1 = vpop.f32.mrf.mxu0  ;;  %v2504_v35 = vpop.f32.mrf.mxu1 }
 0x2a8   :  { %v2323_v45 = vadd.f32 %v2322_v1, %v7245_v9 }
 0x2a9   :  { %v2324_v6 = vpop.f32.mrf.mxu0  ;;  %v2507_v14 = vpop.f32.mrf.mxu1 }
 0x2aa   :  { %v7320_v57 = vadd.f32 %v2507_v14, %v2323_v45 }
 0x2ab   :  { %v2327_v27 = vpop.f32.mrf.mxu0  ;;  %v2509_v31 = vpop.f32.mrf.mxu1 }
 0x2ac   :  { %v2328_v18 = vadd.f32 %v2327_v27, %v7248_v17 }
 0x2ad   :  { %v2329_v36 = vpop.f32.mrf.mxu0  ;;  %v2512_v4 = vpop.f32.mrf.mxu1 }
 0x2ae   :  { %v7323_v40 = vadd.f32 %v2512_v4, %v2328_v18 }
 0x2af   :  { %v7325_v33 = vpop.f32.mrf.mxu0  ;;  %v2514_v52 = vpop.f32.mrf.mxu1 }
 0x2b1   :  { %v2334_v21 = vpop.f32.mrf.mxu0  ;;  %v7327_v43 = vpop.f32.mrf.mxu1 }
 0x2b3   :  { %v7329_v9 = vpop.f32.mrf.mxu0  ;;  %v2519_v51 = vpop.f32.mrf.mxu1 }
 0x2b5   :  { %v2587_v46 = vpop.f32.mrf.mxu0 }
 0x2b7   :  { %v4564_v22 = vpop.f32.mrf.mxu0 }
 0x2b9   :  { %v2597_v56 = vpop.f32.mrf.mxu0 }
 0x2ba   :  { %v7388_v52 = vadd.f32 %v2597_v56, %v7260_v25 }
 0x2bb   :  { %v4567_v34 = vpop.f32.mrf.mxu0 }
 0x2bc   :  { %8621 = vst [vmem:[#allocation4_spill] sm:$0xff] %v7388_v52  ;;  %v7391_v21 = vadd.f32 %v4567_v34, %v7269_v42  ;;  %v2713_v42 = vsel %vm2706_vm1, %v7388_v52, 0.0  ;;  %v2333_v34 = vadd.f32 %v7325_v33, %v7251_v47 }
 0x2bd   :  { %v2607_v28 = vpop.f32.mrf.mxu0 }
 0x2be   :  { %v7378_v31 = vadd.f32 %v2607_v28, %v7266_v20  ;;  %8622 = vst [vmem:[#allocation5_spill] sm:$0xff] %v7391_v21  ;;  %v7398_v28 = vadd.f32 %v2587_v46, %v7254_v55  ;;  %v2722_v25 = vsel %vm2706_vm1, %v7391_v21, 0.0 }
 0x2bf   :  { %v4570_v17 = vpop.f32.mrf.mxu0 }
 0x2c0   :  { %8620 = vst [vmem:[#allocation3_spill] sm:$0xff] %v7378_v31  ;;  %v7381_v36 = vadd.f32 %v4570_v17, %v7275_v39  ;;  %v2719_v39 = vsel %vm2706_vm1, %v7378_v31, 0.0  ;;  %8623 = vst [vmem:[#allocation6_spill] sm:$0xff] %v7398_v28  ;;  %v7401_v17 = vadd.f32 %v4564_v22, %v7263_v50  ;;  %v2707_v46 = vsel %vm2706_vm1, %v7398_v28, 0.0 }
 0x2c1   :  { %v2617_v24 = vpop.f32.mrf.mxu0 }
 0x2c2   :  { %v7368_v14 = vadd.f32 %v2617_v24, %v7272_v29  ;;  %v2728_v20 = vsel %vm2706_vm1, %v7381_v36, 0.0  ;;  %8624 = vst [vmem:[#allocation7_spill] sm:$0xff] %v7401_v17  ;;  %v7411_v24 = vadd.f32 %v7329_v9, %v7257_v58  ;;  %v2716_v50 = vsel %vm2706_vm1, %v7401_v17, 0.0 }
 0x2c3   :  { %v4573_v5 = vpop.f32.mrf.mxu0 }
 0x2c4   :  { %8619 = vst [vmem:[#allocation2_spill] sm:$0xff] %v7368_v14  ;;  %v7371_v27 = vadd.f32 %v4573_v5, %v7281_v62  ;;  %v2725_v62 = vsel %vm2706_vm1, %v7368_v14, 0.0  ;;  %8625 = vst [vmem:[#allocation8_spill] sm:$0xff] %v7411_v24  ;;  %v2518_v5 = vadd.f32 %v7327_v43, %v2333_v34  ;;  %v2710_v58 = vsel %vm2706_vm1, %v7411_v24, 0.0 }
 0x2c5   :  { %v2627_v41 = vpop.f32.mrf.mxu0 }
 0x2c6   :  { %v7358_v45 = vadd.f32 %v2627_v41, %v7278_v53  ;;  %v2734_v29 = vsel %vm2706_vm1, %v7371_v27, 0.0 }
 0x2c7   :  { %v4576_v10 = vpop.f32.mrf.mxu0 }
 0x2c8   :  { %v7361_v35 = vadd.f32 %v4576_v10, %v7287_v16  ;;  %v2731_v16 = vsel %vm2706_vm1, %v7358_v45, 0.0 }
 0x2c9   :  { %v2637_v48 = vpop.f32.mrf.mxu0 }
 0x2ca   :  { %v7346_v23 = vadd.f32 %v2637_v48, %v7284_v11  ;;  %v2740_v53 = vsel %vm2706_vm1, %v7361_v35, 0.0 }
 0x2cb   :  { %v4579_v59 = vpop.f32.mrf.mxu0 }
 0x2cc   :  { %v7335_v8 = vadd.f32 %v4579_v59, %v2468_v63 }
 0x2cd   :  { %v2647_v61 = vpop.f32.mrf.mxu0 }
 0x2ce   :  { %v7339_v3 = vadd.f32 %v2647_v61, %v7290_v32  ;;  %v2746_v13 = vsel %vm2706_vm1, %v7335_v8, 0.0 }
 0x2cf   :  { %v4582_v12 = vpop.f32.mrf.mxu0  ;;  %2747 = vadd.xlane.f32.xlu1 %v2746_v13 }
 0x2d0   :  { %v7343_v1 = vadd.f32 %v4582_v12, %v2478_v30  ;;  %v2743_v32 = vsel %vm2706_vm1, %v7339_v3, 0.0 }
 0x2d1   :  { %v2657_v19 = vpop.f32.mrf.mxu0 }
 0x2d2   :  { %v7349_v44 = vadd.f32 %v2657_v19, %v7298_v38  ;;  %v2752_v49 = vsel %vm2706_vm1, %v7343_v1, 0.0  ;;  %v2737_v38 = vsel %vm2706_vm1, %v7346_v23, 0.0 }
 0x2d3   :  { %v7355_v15 = vpop.f32.mrf.mxu0  ;;  %2753 = vadd.xlane.f32.xlu0 %v2752_v49  ;;  %2744 = vadd.xlane.f32.xlu1 %v2743_v32 }
 0x2d4   :  { %v2749_v11 = vsel %vm2706_vm1, %v7349_v44, 0.0  ;;  %v7452_v2 = vadd.f32 %v7355_v15, %v7308_v54 }
 0x2d5   :  { %v2667_v6 = vpop.f32.mrf.mxu0 }
 0x2d6   :  { %v7431_v9 = vadd.f32 %v2667_v6, %v7305_v60  ;;  %8633 = vst [vmem:[#allocation16_spill] sm:$0xff] %v7452_v2 }
 0x2d7   :  { %2750 = vadd.xlane.f32.xlu0 %v2749_v11  ;;  %2738 = vadd.xlane.f32.xlu1 %v2737_v38  ;;  %v4588_v18 = vpop.f32.mrf.mxu0 }
 0x2d8   :  { %8629 = vst [vmem:[#allocation12_spill] sm:$0xff] %v7431_v9  ;;  %v7441_v48 = vadd.f32 %v4588_v18, %v7314_v7 }
 0x2d9   :  { %v2677_v4 = vpop.f32.mrf.mxu0 }
 0x2da   :  { %v7422_v47 = vadd.f32 %v2677_v4, %v7311_v37  ;;  %8631 = vst [vmem:[#allocation14_spill] sm:$0xff] %v7441_v48  ;;  %v2764_v59 = vsel %vm2706_vm1, %v7441_v48, 0.0 }
 0x2db   :  { %2741 = vadd.xlane.f32.xlu0 %v2740_v53  ;;  %2732 = vadd.xlane.f32.xlu1 %v2731_v16  ;;  %v4591_v51 = vpop.f32.mrf.mxu0 }
 0x2dc   :  { %8627 = vst [vmem:[#allocation10_spill] sm:$0xff] %v7422_v47  ;;  %v7434_v41 = vadd.f32 %v4591_v51, %v7320_v57  ;;  %v2761_v43 = vsel %vm2706_vm1, %v7422_v47, 0.0  ;;  %v2755_v57 = vsel %vm2706_vm1, %v7431_v9, 0.0 }
 0x2dd   :  { %v2687_v56 = vpop.f32.mrf.mxu0 }
 0x2de   :  { %v7414_v55 = vadd.f32 %v2687_v56, %v7317_v26  ;;  %8630 = vst [vmem:[#allocation13_spill] sm:$0xff] %v7434_v41  ;;  %v2770_v60 = vsel %vm2706_vm1, %v7434_v41, 0.0 }
 0x2df   :  { %2735 = vadd.xlane.f32.xlu0 %v2734_v29  ;;  %2726 = vadd.xlane.f32.xlu1 %v2725_v62  ;;  %v4594_v22 = vpop.f32.mrf.mxu0 }
 0x2e0   :  { %8626 = vst [vmem:[#allocation9_spill] sm:$0xff] %v7414_v55  ;;  %v7424_v33 = vadd.f32 %v4594_v22, %v2518_v5  ;;  %v2767_v26 = vsel %vm2706_vm1, %v7414_v55, 0.0 }
 0x2e1   :  { %v2697_v10 = vpop.f32.mrf.mxu0 }
 0x2e2   :  { %8628 = vst [vmem:[#allocation11_spill] sm:$0xff] %v7424_v33  ;;  %v2776_v37 = vsel %vm2706_vm1, %v7424_v33, 0.0  ;;  %v7444_v63 = vadd.f32 %v2697_v10, %v7323_v40  ;;  %v2758_v40 = vsel %vm2706_vm1, %v7452_v2, 0.0 }
 0x2e3   :  { %2729 = vadd.xlane.f32.xlu0 %v2728_v20  ;;  %2720 = vadd.xlane.f32.xlu1 %v2719_v39 }
 0x2e4   :  { %8632 = vst [vmem:[#allocation15_spill] sm:$0xff] %v7444_v63  ;;  %v2773_v7 = vsel %vm2706_vm1, %v7444_v63, 0.0 }
 0x2e7   :  { %2723 = vadd.xlane.f32.xlu0 %v2722_v25  ;;  %2714 = vadd.xlane.f32.xlu1 %v2713_v42 }
 0x2eb   :  { %2717 = vadd.xlane.f32.xlu0 %v2716_v50  ;;  %2708 = vadd.xlane.f32.xlu1 %v2707_v46 }
 0x2ef   :  { %2711 = vadd.xlane.f32.xlu0 %v2710_v58  ;;  %2768 = vadd.xlane.f32.xlu1 %v2767_v26 }
 0x2f3   :  { %2777 = vadd.xlane.f32.xlu0 %v2776_v37  ;;  %2762 = vadd.xlane.f32.xlu1 %v2761_v43 }
 0x2f7   :  { %2771 = vadd.xlane.f32.xlu0 %v2770_v60  ;;  %2756 = vadd.xlane.f32.xlu1 %v2755_v57 }
 0x2fb   :  { %2765 = vadd.xlane.f32.xlu0 %v2764_v59  ;;  %2774 = vadd.xlane.f32.xlu1 %v2773_v7 }
 0x2ff   :  { %2759 = vadd.xlane.f32.xlu0 %v2758_v40 }
 0x358   :  { %v2748_v61 = vpop.xlane.xlu1 %2747 }
 0x359   :  { %v7474_v4 = vmul.f32 0.020408163, %v2748_v61 }
 0x35b   :  { %v2817_v26 = vsub.f32 %v7335_v8, %v7474_v4 }
 0x35c   :  { %v2754_v30 = vpop.xlane.xlu0 %2753  ;;  %v2745_v13 = vpop.xlane.xlu1 %2744 }
 0x35d   :  { %v7464_v11 = vmul.f32 0.020408163, %v2745_v13  ;;  %v7485_v22 = vmul.f32 0.020408163, %v2754_v30  ;;  %v2841_v40 = vmul.f32 %v2817_v26, %v2817_v26 }
 0x35f   :  { %v2816_v39 = vsub.f32 %v7339_v3, %v7464_v11  ;;  %v2819_v61 = vsub.f32 %v7343_v1, %v7485_v22 }
 0x360   :  { %v2751_v12 = vpop.xlane.xlu0 %2750  ;;  %v2739_v19 = vpop.xlane.xlu1 %2738 }
 0x361   :  { %v7460_v49 = vmul.f32 0.020408163, %v2739_v19  ;;  %v2840_v58 = vmul.f32 %v2816_v39, %v2816_v39 }
 0x363   :  { %v2814_v38 = vsub.f32 %v7346_v23, %v7460_v49 }
 0x364   :  { %v2742_v54 = vpop.xlane.xlu0 %2741  ;;  %v2733_v32 = vpop.xlane.xlu1 %2732 }
 0x365   :  { %v7462_v15 = vmul.f32 0.020408163, %v2733_v32  ;;  %v7468_v6 = vmul.f32 0.020408163, %v2742_v54  ;;  %v2838_v20 = vmul.f32 %v2814_v38, %v2814_v38  ;;  %v2888_v54 = vsel %vm2706_vm1, %v2840_v58, 0.0 }
 0x367   :  { %v2812_v53 = vsub.f32 %v7358_v45, %v7462_v15  ;;  %v2815_v56 = vsub.f32 %v7361_v35, %v7468_v6  ;;  %v2882_v43 = vsel %vm2706_vm1, %v2838_v20, 0.0 }
 0x368   :  { %v2736_v16 = vpop.xlane.xlu0 %2735  ;;  %v2727_v18 = vpop.xlane.xlu1 %2726 }
 0x369   :  { %v7472_v29 = vmul.f32 0.020408163, %v2736_v16  ;;  %v2836_v62 = vmul.f32 %v2812_v53, %v2812_v53  ;;  %v7478_v51 = vmul.f32 0.020408163, %v2727_v18  ;;  %v2839_v10 = vmul.f32 %v2815_v56, %v2815_v56 }
 0x36a   :  { %v2891_v16 = vsel %vm2706_vm1, %v2841_v40, 0.0  ;;  %v2843_v18 = vmul.f32 %v2819_v61, %v2819_v61 }
 0x36b   :  { %v2876_v25 = vsel %vm2706_vm1, %v2836_v62, 0.0  ;;  %v2813_v42 = vsub.f32 %v7371_v27, %v7472_v29  ;;  %v2810_v60 = vsub.f32 %v7368_v14, %v7478_v51  ;;  %v2885_v19 = vsel %vm2706_vm1, %v2839_v10, 0.0  ;;  %v3048_v14 = vld [vmem:[%s8598_s3 + $0x20] sm:$0xff] }
 0x36c   :  { %v2730_v34 = vpop.xlane.xlu0 %2729  ;;  %v2721_v50 = vpop.xlane.xlu1 %2720  ;;  %2877 = vadd.xlane.f32.xlu1 %v2876_v25  ;;  %v2897_v58 = vsel %vm2706_vm1, %v2843_v18, 0.0 }
 0x36d   :  { %v2837_v46 = vmul.f32 %v2813_v42, %v2813_v42  ;;  %v7487_v5 = vmul.f32 0.020408163, %v2721_v50  ;;  %v7495_v7 = vmul.f32 0.020408163, %v2730_v34  ;;  %v2834_v32 = vmul.f32 %v2810_v60, %v2810_v60 }
 0x36f   :  { %v2879_v37 = vsel %vm2706_vm1, %v2837_v46, 0.0  ;;  %v2808_v30 = vsub.f32 %v7378_v31, %v7487_v5  ;;  %v2811_v20 = vsub.f32 %v7381_v36, %v7495_v7  ;;  %v2870_v42 = vsel %vm2706_vm1, %v2834_v32, 0.0 }
 0x370   :  { %v2724_v57 = vpop.xlane.xlu0 %2723  ;;  %v2715_v59 = vpop.xlane.xlu1 %2714  ;;  %2880 = vadd.xlane.f32.xlu0 %v2879_v37  ;;  %2883 = vadd.xlane.f32.xlu1 %v2882_v43  ;;  %v7515_v46 = vmul.f32 0.020408163, %v2751_v12 }
 0x371   :  { %v7501_v13 = vmul.f32 0.020408163, %v2715_v59  ;;  %v2832_v62 = vmul.f32 %v2808_v30, %v2808_v30  ;;  %v7508_v39 = vmul.f32 0.020408163, %v2724_v57  ;;  %v2835_v37 = vmul.f32 %v2811_v20, %v2811_v20 }
 0x372   :  { %v2818_v30 = vsub.f32 %v7349_v44, %v7515_v46 }
 0x373   :  { %v2806_v56 = vsub.f32 %v7388_v52, %v7501_v13  ;;  %v2864_v26 = vsel %vm2706_vm1, %v2832_v62, 0.0  ;;  %v2809_v60 = vsub.f32 %v7391_v21, %v7508_v39  ;;  %v2873_v61 = vsel %vm2706_vm1, %v2835_v37, 0.0 }
 0x374   :  { %v2718_v38 = vpop.xlane.xlu0 %2717  ;;  %2886 = vadd.xlane.f32.xlu0 %v2885_v19  ;;  %2889 = vadd.xlane.f32.xlu1 %v2888_v54  ;;  %v2709_v53 = vpop.xlane.xlu1 %2708  ;;  %v2842_v20 = vmul.f32 %v2818_v30, %v2818_v30 }
 0x375   :  { %v7510_v25 = vmul.f32 0.020408163, %v2709_v53  ;;  %v7519_v43 = vmul.f32 0.020408163, %v2718_v38  ;;  %v2830_v10 = vmul.f32 %v2806_v56, %v2806_v56  ;;  %v2833_v54 = vmul.f32 %v2809_v60, %v2809_v60 }
 0x376   :  { %v2894_v30 = vsel %vm2706_vm1, %v2842_v20, 0.0 }
 0x377   :  { %v2804_v57 = vsub.f32 %v7398_v28, %v7510_v25  ;;  %v2858_v19 = vsel %vm2706_vm1, %v2830_v10, 0.0  ;;  %v2807_v38 = vsub.f32 %v7401_v17, %v7519_v43  ;;  %v2867_v56 = vsel %vm2706_vm1, %v2833_v54, 0.0 }
 0x378   :  { %2892 = vadd.xlane.f32.xlu0 %v2891_v16  ;;  %v2712_v34 = vpop.xlane.xlu0 %2711  ;;  %2871 = vadd.xlane.f32.xlu1 %v2870_v42  ;;  %v2769_v50 = vpop.xlane.xlu1 %2768 }
 0x379   :  { %v7525_v12 = vmul.f32 0.020408163, %v2712_v34  ;;  %v2828_v32 = vmul.f32 %v2804_v57, %v2804_v57  ;;  %v7543_v10 = vmul.f32 0.020408163, %v2769_v50 }
 0x37b   :  { %v2805_v42 = vsub.f32 %v7411_v24, %v7525_v12  ;;  %v2852_v34 = vsel %vm2706_vm1, %v2828_v32, 0.0 }
 0x37c   :  { %2898 = vadd.xlane.f32.xlu0 %v2897_v58  ;;  %v2778_v59 = vpop.xlane.xlu0 %2777  ;;  %2865 = vadd.xlane.f32.xlu1 %v2864_v26  ;;  %v2763_v40 = vpop.xlane.xlu1 %2762  ;;  %v2831_v58 = vmul.f32 %v2807_v38, %v2807_v38 }
 0x37d   :  { %v7535_v62 = vmul.f32 0.020408163, %v2763_v40  ;;  %v2829_v60 = vmul.f32 %v2805_v42, %v2805_v42 }
 0x37f   :  { %v2822_v57 = vsub.f32 %v7422_v47, %v7535_v62  ;;  %v2855_v50 = vsel %vm2706_vm1, %v2829_v60, 0.0 }
 0x380   :  { %2874 = vadd.xlane.f32.xlu0 %v2873_v61  ;;  %v2772_v53 = vpop.xlane.xlu0 %2771  ;;  %2859 = vadd.xlane.f32.xlu1 %v2858_v19  ;;  %v2757_v16 = vpop.xlane.xlu1 %2756  ;;  %v2861_v61 = vsel %vm2706_vm1, %v2831_v58, 0.0 }
 0x381   :  { %v7533_v18 = vmul.f32 0.020408163, %v2757_v16  ;;  %v7553_v16 = vmul.f32 0.020408163, %v2772_v53  ;;  %v2846_v42 = vmul.f32 %v2822_v57, %v2822_v57 }
 0x383   :  { %v2820_v26 = vsub.f32 %v7431_v9, %v7533_v18  ;;  %v2906_v60 = vsel %vm2706_vm1, %v2846_v42, 0.0 }
 0x384   :  { %2868 = vadd.xlane.f32.xlu0 %v2867_v56  ;;  %v2766_v37 = vpop.xlane.xlu0 %2765  ;;  %2853 = vadd.xlane.f32.xlu1 %v2852_v34  ;;  %v2775_v54 = vpop.xlane.xlu1 %2774  ;;  %v2824_v56 = vsub.f32 %v7414_v55, %v7543_v10 }
 0x385   :  { %v7547_v40 = vmul.f32 0.020408163, %v2766_v37  ;;  %v2844_v19 = vmul.f32 %v2820_v26, %v2820_v26  ;;  %v7558_v34 = vmul.f32 0.020408163, %v2775_v54  ;;  %v7565_v37 = vmul.f32 0.020408163, %v2778_v59 }
 0x386   :  { %v2848_v57 = vmul.f32 %v2824_v56, %v2824_v56 }
 0x387   :  { %v2900_v58 = vsel %vm2706_vm1, %v2844_v19, 0.0  ;;  %v2823_v26 = vsub.f32 %v7441_v48, %v7547_v40  ;;  %v2825_v19 = vsub.f32 %v7434_v41, %v7553_v16  ;;  %v2826_v54 = vsub.f32 %v7444_v63, %v7558_v34 }
 0x388   :  { %2862 = vadd.xlane.f32.xlu0 %v2861_v61  ;;  %v2760_v32 = vpop.xlane.xlu0 %2759  ;;  %2895 = vadd.xlane.f32.xlu1 %v2894_v30  ;;  %v2827_v42 = vsub.f32 %v7424_v33, %v7565_v37 }
 0x389   :  { %v7551_v38 = vmul.f32 0.020408163, %v2760_v32  ;;  %v2847_v30 = vmul.f32 %v2823_v26, %v2823_v26  ;;  %v2912_v32 = vsel %vm2706_vm1, %v2848_v57, 0.0  ;;  %v2849_v59 = vmul.f32 %v2825_v19, %v2825_v19 }
 0x38a   :  { %v2851_v26 = vmul.f32 %v2827_v42, %v2827_v42 }
 0x38b   :  { %v2821_v20 = vsub.f32 %v7452_v2, %v7551_v38  ;;  %v2915_v56 = vsel %vm2706_vm1, %v2849_v59, 0.0 }
 0x38c   :  { %2856 = vadd.xlane.f32.xlu0 %v2855_v50  ;;  %2901 = vadd.xlane.f32.xlu1 %v2900_v58  ;;  %v2909_v50 = vsel %vm2706_vm1, %v2847_v30, 0.0  ;;  %v2850_v58 = vmul.f32 %v2826_v54, %v2826_v54 }
 0x38d   :  { %v2845_v53 = vmul.f32 %v2821_v20, %v2821_v20 }
 0x38e   :  { %v2918_v20 = vsel %vm2706_vm1, %v2850_v58, 0.0 }
 0x38f   :  { %v2903_v61 = vsel %vm2706_vm1, %v2845_v53, 0.0  ;;  %v2921_v53 = vsel %vm2706_vm1, %v2851_v26, 0.0 }
 0x390   :  { %2904 = vadd.xlane.f32.xlu0 %v2903_v61  ;;  %2907 = vadd.xlane.f32.xlu1 %v2906_v60  ;;  %v8601_v60 = vmov 0  }
 0x391   :  { %4656 = vset.pattern.permute.xlu1 %v8601_v60  ;;  %4655 = vset.pattern.permute.xlu0 %v8601_v60 }
 0x394   :  { %2910 = vadd.xlane.f32.xlu0 %v2909_v50  ;;  %2913 = vadd.xlane.f32.xlu1 %v2912_v32 }
 0x398   :  { %2916 = vadd.xlane.f32.xlu0 %v2915_v56  ;;  %2919 = vadd.xlane.f32.xlu1 %v2918_v20 }
 0x39c   :  { %2922 = vadd.xlane.f32.xlu0 %v2921_v53 }
 0x3f5   :  { %v2878_v57 = vpop.xlane.xlu1 %2877 }
 0x3f9   :  { %v2881_v61 = vpop.xlane.xlu0 %2880  ;;  %v7582_v30 = vpop.xlane.xlu1 %2883 }
 0x3fa   :  { %v2933_v24 = vmul.f32 0.020408163, %v2881_v61 }
 0x3fd   :  { %v2887_v19 = vpop.xlane.xlu0 %2886  ;;  %v7584_v54 = vpop.xlane.xlu1 %2889 }
 0x3fe   :  { %v2935_v17 = vmul.f32 0.020408163, %v2887_v19 }
 0x401   :  { %v7586_v32 = vpop.xlane.xlu0 %2892  ;;  %v2872_v50 = vpop.xlane.xlu1 %2871 }
 0x402   :  { %v2930_v2 = vmul.f32 0.020408163, %v2872_v50 }
 0x404   :  { %v2978_v33 = vadd.f32 1e-05, %v2930_v2 }
 0x405   :  { %v7588_v59 = vpop.xlane.xlu0 %2898  ;;  %v2866_v58 = vpop.xlane.xlu1 %2865 }
 0x406   :  { %v2928_v42 = vmul.f32 0.020408163, %v2866_v58 }
 0x408   :  { %v2976_v26 = vadd.f32 1e-05, %v2928_v42 }
 0x409   :  { %v2875_v56 = vpop.xlane.xlu0 %2874  ;;  %v7590_v20 = vpop.xlane.xlu1 %2859 }
 0x40a   :  { %v2931_v53 = vmul.f32 0.020408163, %v2875_v56  ;;  %4657 = vrsqrt.f32 %v2976_v26 }
 0x40c   :  { %v2979_v47 = vadd.f32 1e-05, %v2931_v53  ;;  %v2932_v53 = vmul.f32 0.020408163, %v2878_v57 }
 0x40d   :  { %v2869_v60 = vpop.xlane.xlu0 %2868  ;;  %v7592_v0 = vpop.xlane.xlu1 %2853 }
 0x40e   :  { %v2929_v9 = vmul.f32 0.020408163, %v2869_v60  ;;  %v2980_v57 = vadd.f32 1e-05, %v2932_v53 }
 0x410   :  { %v2977_v48 = vadd.f32 1e-05, %v2929_v9 }
 0x411   :  { %v2863_v55 = vpop.xlane.xlu0 %2862  ;;  %v7594_v63 = vpop.xlane.xlu1 %2895 }
 0x412   :  { %4659 = vrsqrt.f32 %v2977_v48  ;;  %v2927_v41 = vmul.f32 0.020408163, %v2863_v55  ;;  %v2952_v55 = vld [vmem:[%s8597_s2 + $0x20] sm:$0xff] }
 0x413   :  { %4661 = vrsqrt.f32 %v2979_v47 }
 0x414   :  { %v2975_v58 = vadd.f32 1e-05, %v2927_v41  ;;  %v2981_v41 = vadd.f32 1e-05, %v2933_v24 }
 0x415   :  { %v7596_v28 = vpop.xlane.xlu0 %2856  ;;  %v2902_v42 = vpop.xlane.xlu1 %2901 }
 0x416   :  { %4663 = vrsqrt.f32 %v2975_v58  ;;  %v2940_v56 = vmul.f32 0.020408163, %v2902_v42  ;;  %v2983_v42 = vadd.f32 1e-05, %v2935_v17  ;;  %v2955_v17 = vld [vmem:[%s8597_s2 + $0x38] sm:$0xff] }
 0x417   :  { %4665 = vrsqrt.f32 %v2978_v33  ;;  %v4658_v47 = vpop.eup %4657  ;;  %v2953_v33 = vld [vmem:[%s8597_s2 + $0x28] sm:$0xff] }
 0x418   :  { %v2988_v60 = vadd.f32 1e-05, %v2940_v56  ;;  %v3024_v56 = vmul.f32 %v4658_v47, %v2952_v55 }
 0x419   :  { %v2905_v26 = vpop.xlane.xlu0 %2904  ;;  %v2908_v50 = vpop.xlane.xlu1 %2907 }
 0x41a   :  { %v2941_v9 = vmul.f32 0.020408163, %v2905_v26  ;;  %v2942_v52 = vmul.f32 0.020408163, %v2908_v50  ;;  %4667 = vrsqrt.f32 %v2988_v60  ;;  %v2951_v50 = vld [vmem:[%s8597_s2 + $0x18] sm:$0xff] }
 0x41c   :  { %v2989_v48 = vadd.f32 1e-05, %v2941_v9  ;;  %v2990_v2 = vadd.f32 1e-05, %v2942_v52  ;;  %v3049_v9 = vld [vmem:[%s8598_s3 + $0x28] sm:$0xff] }
 0x41d   :  { %v7601_v58 = vpop.xlane.xlu0 %2910  ;;  %v7603_v61 = vpop.xlane.xlu1 %2913 }
 0x41e   :  { %4669 = vrsqrt.f32 %v2989_v48 }
 0x41f   :  { %v4660_v19 = vpop.eup %4659  ;;  %4671 = vrsqrt.f32 %v2990_v2 }
 0x420   :  { %4673 = vrsqrt.f32 %v2981_v41  ;;  %v3025_v60 = vmul.f32 %v4660_v19, %v2953_v33  ;;  %v4662_v26 = vpop.eup %4661  ;;  %v3072_v41 = vmul.f32 %v3024_v56, %v7487_v5  ;;  %v2964_v5 = vld [vmem:[%s8597_s2 + $0x80] sm:$0xff] }
 0x421   :  { %v7608_v24 = vpop.xlane.xlu0 %2916  ;;  %v2920_v52 = vpop.xlane.xlu1 %2919  ;;  %4675 = vrsqrt.f32 %v2980_v57  ;;  %v3027_v19 = vmul.f32 %v4662_v26, %v2955_v17  ;;  %v2954_v57 = vld [vmem:[%s8597_s2 + $0x30] sm:$0xff]  ;;  %v2937_v26 = vmul.f32 0.020408163, %v7586_v32 }
 0x422   :  { %v2946_v53 = vmul.f32 0.020408163, %v2920_v52  ;;  %v3073_v55 = vmul.f32 %v3025_v60, %v7508_v39  ;;  %4677 = vrsqrt.f32 %v2983_v42  ;;  %v2934_v39 = vmul.f32 0.020408163, %v7582_v30  ;;  %v2965_v30 = vld [vmem:[%s8597_s2 + $0x88] sm:$0xff] }
 0x423   :  { %v4664_v47 = vpop.eup %4663  ;;  %v3075_v17 = vmul.f32 %v3027_v19, %v7495_v7  ;;  %v2985_v32 = vadd.f32 1e-05, %v2937_v26  ;;  %v2957_v26 = vld [vmem:[%s8597_s2 + $0x48] sm:$0xff] }
 0x424   :  { %v2994_v48 = vadd.f32 1e-05, %v2946_v53  ;;  %v7621_v2 = vmul.f32 %v4664_v47, %v2951_v50  ;;  %v3097_v33 = vsub.f32 %v3049_v9, %v3073_v55  ;;  %v4666_v31 = vpop.eup %4665  ;;  %v3096_v9 = vsub.f32 %v3048_v14, %v3072_v41  ;;  %v2966_v14 = vld [vmem:[%s8597_s2 + $0x90] sm:$0xff] }
 0x425   :  { %v2923_v21 = vpop.xlane.xlu0 %2922  ;;  %v3026_v53 = vmul.f32 %v4666_v31, %v2954_v57  ;;  %v2982_v47 = vadd.f32 1e-05, %v2934_v39  ;;  %v7650_v31 = vld [vmem:[%s8598_s3 + $0x80] sm:$0xff]  ;;  %v2939_v41 = vmul.f32 0.020408163, %v7588_v59 }
 0x426   :  { %v2947_v42 = vmul.f32 0.020408163, %v2923_v21  ;;  %3133 = vperm.xlu0 %4655, %v7621_v2   ;;  %3287 = vperm.xlu1 %4656, %v3097_v33   ;;  %4679 = vrsqrt.f32 %v2994_v48  ;;  %v3051_v21 = vld [vmem:[%s8598_s3 + $0x38] sm:$0xff] }
 0x427   :  { %v4668_v52 = vpop.eup %4667  ;;  %v3074_v57 = vmul.f32 %v3026_v53, %v7478_v51  ;;  %v7673_v51 = vld [vmem:[%s8598_s3 + $0x88] sm:$0xff] }
 0x428   :  { %v2995_v50 = vadd.f32 1e-05, %v2947_v42  ;;  %v7642_v55 = vmul.f32 %v4668_v52, %v2964_v5  ;;  %v3050_v5 = vld [vmem:[%s8598_s3 + $0x30] sm:$0xff] }
 0x42a   :  { %4681 = vrsqrt.f32 %v2995_v50  ;;  %3143 = vperm.xlu0 %4655, %v3025_v60   ;;  %3282 = vperm.xlu1 %4656, %v3096_v9   ;;  %v7655_v48 = vmul.f32 %v7642_v55, %v7533_v18  ;;  %v3099_v60 = vsub.f32 %v3051_v21, %v3075_v17  ;;  %v7682_v50 = vld [vmem:[%s8598_s3 + $0x90] sm:$0xff]  ;;  %v2936_v17 = vmul.f32 0.020408163, %v7584_v54  ;;  %v2959_v54 = vld [vmem:[%s8597_s2 + $0x58] sm:$0xff] }
 0x42b   :  { %v4670_v7 = vpop.eup %4669  ;;  %4683 = vrsqrt.f32 %v2982_v47  ;;  %v2987_v21 = vadd.f32 1e-05, %v2939_v41  ;;  %v2926_v47 = vmul.f32 0.020408163, %v7590_v20  ;;  %v2970_v20 = vld [vmem:[%s8597_s2 + $0xb0] sm:$0xff] }
 0x42c   :  { %v4672_v33 = vpop.eup %4671  ;;  %v7658_v39 = vmul.f32 %v4670_v7, %v2965_v30  ;;  %v3108_v18 = vsub.f32 %v7650_v31, %v7655_v48  ;;  %4685 = vrsqrt.f32 %v2985_v32  ;;  %v2956_v7 = vld [vmem:[%s8597_s2 + $0x40] sm:$0xff]  ;;  %v2984_v32 = vadd.f32 1e-05, %v2936_v17  ;;  %v3471_v48 = vld [vmem:[%s8599_s4 + $0x158] sm:$0xff] }
 0x42d   :  { %v4674_v42 = vpop.eup %4673  ;;  %v7666_v59 = vmul.f32 %v4672_v33, %v2966_v14  ;;  %v3098_v14 = vsub.f32 %v3050_v5, %v3074_v57  ;;  %4687 = vrsqrt.f32 %v2987_v21  ;;  %v2974_v57 = vadd.f32 1e-05, %v2926_v47  ;;  %v3053_v33 = vld [vmem:[%s8598_s3 + $0x48] sm:$0xff]  ;;  %4460 = vmatprep.mubr.msk.f32.mxu1 %vm3536_vm2, %v3471_v48 }
 0x42e   :  { %3138 = vperm.xlu0 %4655, %v3024_v56   ;;  %3297 = vperm.xlu1 %4656, %v3099_v60   ;;  %v7677_v52 = vmul.f32 %v7658_v39, %v7551_v38  ;;  %v4676_v9 = vpop.eup %4675  ;;  %v3029_v38 = vmul.f32 %v4674_v42, %v2957_v26  ;;  %v2925_v42 = vmul.f32 0.020408163, %v7596_v28  ;;  %4689 = vrsqrt.f32 %v2984_v32 }
 0x42f   :  { %v7687_v30 = vmul.f32 %v7666_v59, %v7535_v62  ;;  %v4678_v56 = vpop.eup %4677  ;;  %v3028_v41 = vmul.f32 %v4676_v9, %v2956_v7  ;;  %v7716_v9 = vld [vmem:[%s8598_s3 + $0xb0] sm:$0xff]  ;;  %4691 = vrsqrt.f32 %v2974_v57  ;;  %v2943_v57 = vmul.f32 0.020408163, %v7601_v58 }
 0x430   :  { %v3031_v5 = vmul.f32 %v4678_v56, %v2959_v54  ;;  %v3077_v26 = vmul.f32 %v3029_v38, %v7472_v29  ;;  %v2924_v29 = vmul.f32 0.020408163, %v7592_v0  ;;  %v2973_v56 = vadd.f32 1e-05, %v2925_v42  ;;  %v7732_v54 = vld [vmem:[%s8598_s3 + $0xb8] sm:$0xff]  ;;  %v2958_v42 = vld [vmem:[%s8597_s2 + $0x50] sm:$0xff] }
 0x431   :  { %v3110_v62 = vsub.f32 %v7682_v50, %v7687_v30  ;;  %v3076_v17 = vmul.f32 %v3028_v41, %v7462_v15  ;;  %v2991_v58 = vadd.f32 1e-05, %v2943_v57  ;;  %v8634_v31 = vsub.f32 %v7673_v51, %v7677_v52 }
 0x432   :  { %3153 = vperm.xlu0 %4655, %v3027_v19   ;;  %3292 = vperm.xlu1 %4656, %v3098_v14   ;;  %v2971_v19 = vld [vmem:[%s8597_s2 + $0xb8] sm:$0xff]  ;;  %v3101_v47 = vsub.f32 %v3053_v33, %v3077_v26  ;;  %v2938_v33 = vmul.f32 0.020408163, %v7594_v63  ;;  %4693 = vrsqrt.f32 %v2973_v56 }
 0x433   :  { %v4680_v60 = vpop.eup %4679  ;;  %v3055_v56 = vld [vmem:[%s8598_s3 + $0x58] sm:$0xff] }
 0x434   :  { %v7711_v14 = vmul.f32 %v4680_v60, %v2970_v20  ;;  %v2972_v60 = vadd.f32 1e-05, %v2924_v29  ;;  %v2986_v63 = vadd.f32 1e-05, %v2938_v33  ;;  %v2945_v29 = vmul.f32 0.020408163, %v7608_v24 }
 0x435   :  { %v2960_v33 = vld [vmem:[%s8597_s2 + $0x60] sm:$0xff] }
 0x436   :  { %3148 = vperm.xlu0 %4655, %v3026_v53   ;;  %3173 = vperm.xlu1 %4656, %v3031_v5   ;;  %v7722_v21 = vmul.f32 %v7711_v14, %v7558_v34  ;;  %v3052_v53 = vld [vmem:[%s8598_s3 + $0x40] sm:$0xff]  ;;  %4695 = vrsqrt.f32 %v2972_v60 }
 0x437   :  { %v4682_v28 = vpop.eup %4681  ;;  %v3100_v20 = vsub.f32 %v3052_v53, %v3076_v17  ;;  %4697 = vrsqrt.f32 %v2986_v63  ;;  %v2949_v63 = vld [vmem:[%s8597_s2 + $0x8] sm:$0xff] }
 0x438   :  { %v7727_v7 = vmul.f32 %v4682_v28, %v2971_v19  ;;  %v3114_v0 = vsub.f32 %v7716_v9, %v7722_v21  ;;  %v4684_v34 = vpop.eup %4683  ;;  %v3079_v19 = vmul.f32 %v3031_v5, %v7468_v6  ;;  %4699 = vrsqrt.f32 %v2991_v58  ;;  %v3057_v58 = vld [vmem:[%s8598_s3 + $0x68] sm:$0xff] }
 0x439   :  { %v4686_v32 = vpop.eup %4685  ;;  %v3030_v26 = vmul.f32 %v4684_v34, %v2958_v42  ;;  %v2944_v6 = vmul.f32 0.020408163, %v7603_v61  ;;  %v2993_v5 = vadd.f32 1e-05, %v2945_v29  ;;  %v2948_v29 = vld [vmem:[%s8597_s2] sm:$0xff] }
 0x43a   :  { %3163 = vperm.xlu0 %4655, %v3029_v38   ;;  %3307 = vperm.xlu1 %4656, %v3101_v47   ;;  %v7738_v15 = vmul.f32 %v7727_v7, %v7565_v37  ;;  %v2961_v37 = vld [vmem:[%s8597_s2 + $0x68] sm:$0xff]  ;;  %v4688_v28 = vpop.eup %4687  ;;  %v2963_v47 = vld [vmem:[%s8597_s2 + $0x78] sm:$0xff] }
 0x43b   :  { %v3033_v17 = vmul.f32 %v4686_v32, %v2961_v37  ;;  %v4690_v53 = vpop.eup %4689  ;;  %v3035_v34 = vmul.f32 %v4688_v28, %v2963_v47  ;;  %v3078_v32 = vmul.f32 %v3030_v26, %v7460_v49  ;;  %v2992_v60 = vadd.f32 1e-05, %v2944_v6  ;;  %v3054_v37 = vld [vmem:[%s8598_s3 + $0x50] sm:$0xff]  ;;  %v2967_v6 = vld [vmem:[%s8597_s2 + $0x98] sm:$0xff] }
 0x43c   :  { %v3115_v38 = vsub.f32 %v7732_v54, %v7738_v15  ;;  %v4692_v24 = vpop.eup %4691  ;;  %4701 = vrsqrt.f32 %v2993_v5  ;;  %v3032_v57 = vmul.f32 %v4690_v53, %v2960_v33 }
 0x43d   :  { %4703 = vrsqrt.f32 %v2992_v60  ;;  %v3081_v49 = vmul.f32 %v3033_v17, %v7474_v4  ;;  %v2962_v4 = vld [vmem:[%s8597_s2 + $0x70] sm:$0xff] }
 0x43e   :  { %3158 = vperm.xlu0 %4655, %v3028_v41   ;;  %3302 = vperm.xlu1 %4656, %v3100_v20   ;;  %v3103_v41 = vsub.f32 %v3055_v56, %v3079_v19  ;;  %v2950_v20 = vld [vmem:[%s8597_s2 + $0x10] sm:$0xff]  ;;  %v3102_v19 = vsub.f32 %v3054_v37, %v3078_v32  ;;  %v3056_v32 = vld [vmem:[%s8598_s3 + $0x60] sm:$0xff]  ;;  %v3083_v37 = vmul.f32 %v3035_v34, %v7485_v22 }
 0x43f   :  { %v3022_v42 = vmul.f32 %v4692_v24, %v2950_v20  ;;  %v4694_v61 = vpop.eup %4693  ;;  %v3105_v47 = vsub.f32 %v3057_v58, %v3081_v49  ;;  %v3080_v24 = vmul.f32 %v3032_v57, %v7464_v11  ;;  %v2969_v20 = vld [vmem:[%s8597_s2 + $0xa8] sm:$0xff]  ;;  %v3059_v11 = vld [vmem:[%s8598_s3 + $0x78] sm:$0xff]  ;;  %v3058_v58 = vld [vmem:[%s8598_s3 + $0x70] sm:$0xff] }
 0x440   :  { %v3021_v28 = vmul.f32 %v4694_v61, %v2949_v63 }
 0x441   :  { %v3104_v61 = vsub.f32 %v3056_v32, %v3080_v24 }
 0x442   :  { %3168 = vperm.xlu0 %4655, %v3030_v26   ;;  %3183 = vperm.xlu1 %4656, %v3033_v17  }
 0x443   :  { %v4696_v26 = vpop.eup %4695 }
 0x444   :  { %v4698_v56 = vpop.eup %4697 }
 0x445   :  { %v4700_v53 = vpop.eup %4699  ;;  %v3034_v5 = vmul.f32 %v4698_v56, %v2962_v4 }
 0x446   :  { %3193 = vperm.xlu0 %4655, %v3035_v34   ;;  %3317 = vperm.xlu1 %4656, %v3103_v41   ;;  %v3020_v41 = vmul.f32 %v4696_v26, %v2948_v29  ;;  %v3039_v17 = vmul.f32 %v4700_v53, %v2967_v6  ;;  %v3071_v34 = vmul.f32 %v7621_v2, %v7519_v43  ;;  %v3047_v29 = vld [vmem:[%s8598_s3 + $0x18] sm:$0xff]  ;;  %v3045_v2 = vld [vmem:[%s8598_s3 + $0x8] sm:$0xff] }
 0x447   :  { %v3082_v26 = vmul.f32 %v3034_v5, %v7515_v46  ;;  %v3070_v46 = vmul.f32 %v3022_v42, %v7501_v13  ;;  %v3069_v43 = vmul.f32 %v3021_v28, %v7525_v12 }
 0x448   :  { %v3095_v56 = vsub.f32 %v3047_v29, %v3071_v34  ;;  %v3068_v13 = vmul.f32 %v3020_v41, %v7510_v25 }
 0x449   :  { %v4702_v33 = vpop.eup %4701  ;;  %v3106_v22 = vsub.f32 %v3058_v58, %v3082_v26 }
 0x44a   :  { %3178 = vperm.xlu1 %4656, %v3032_v57   ;;  %3128 = vperm.xlu0 %4655, %v3022_v42   ;;  %v3041_v60 = vmul.f32 %v4702_v33, %v2969_v20  ;;  %v4704_v63 = vpop.eup %4703  ;;  %v2968_v57 = vld [vmem:[%s8597_s2 + $0xa0] sm:$0xff]  ;;  %s4712_s2 = smov 122  }
 0x44b   :  { %v3040_v49 = vmul.f32 %v4704_v63, %v2968_v57  ;;  %v3044_v42 = vld [vmem:[%s8598_s3] sm:$0xff] }
 0x44c   :  { %v3089_v12 = vmul.f32 %v3041_v60, %v7553_v16 }
 0x44d   :  { %v3088_v25 = vmul.f32 %v3040_v49, %v7543_v10  ;;  %v3063_v10 = vld [vmem:[%s8598_s3 + $0x98] sm:$0xff] }
 0x44e   :  { %3312 = vperm.xlu1 %4656, %v3102_v19   ;;  %3123 = vperm.xlu0 %4655, %v3021_v28   ;;  %v3107_v19 = vsub.f32 %v3059_v11, %v3083_v37  ;;  %v3065_v28 = vld [vmem:[%s8598_s3 + $0xa8] sm:$0xff] }
 0x452   :  { %3327 = vperm.xlu1 %4656, %v3105_v47   ;;  %3118 = vperm.xlu0 %4655, %v3020_v41   ;;  %v3046_v47 = vld [vmem:[%s8598_s3 + $0x10] sm:$0xff]  ;;  %v3064_v41 = vld [vmem:[%s8598_s3 + $0xa0] sm:$0xff] }
 0x453   :  { %v3094_v53 = vsub.f32 %v3046_v47, %v3070_v46  ;;  %v3112_v16 = vsub.f32 %v3064_v41, %v3088_v25 }
 0x456   :  { %3213 = vperm.xlu0 %4655, %v3039_v17   ;;  %3188 = vperm.xlu1 %4656, %v3034_v5  }
 0x45a   :  { %3223 = vperm.xlu0 %4655, %v3041_v60   ;;  %3322 = vperm.xlu1 %4656, %v3104_v61  }
 0x45e   :  { %3337 = vperm.xlu1 %4656, %v3107_v19   ;;  %3218 = vperm.xlu0 %4655, %v3040_v49  }
 0x462   :  { %3332 = vperm.xlu1 %4656, %v3106_v22   ;;  %3233 = vperm.xlu0 %4655, %v7727_v7   ;;  %v3093_v7 = vsub.f32 %v3045_v2, %v3069_v43  ;;  %v8635_v2 = vmov 0.0  }
 0x466   :  { %3277 = vperm.xlu1 %4656, %v3095_v56   ;;  %3228 = vperm.xlu0 %4655, %v7711_v14   ;;  %v3092_v14 = vsub.f32 %v3044_v42, %v3068_v13 }
 0x46a   :  { %3272 = vperm.xlu1 %4656, %v3094_v53   ;;  %3208 = vperm.xlu0 %4655, %v7666_v59   ;;  %v3113_v59 = vsub.f32 %v3065_v28, %v3089_v12 }
 0x46e   :  { %3267 = vperm.xlu1 %4656, %v3093_v7   ;;  %3203 = vperm.xlu0 %4655, %v7658_v39  }
 0x472   :  { %3262 = vperm.xlu1 %4656, %v3092_v14   ;;  %3198 = vperm.xlu0 %4655, %v7642_v55   ;;  %v3087_v55 = vmul.f32 %v3039_v17, %v7547_v40  ;;  %v3429_v40 = vld [vmem:[%s8599_s4 + $0x8] sm:$0xff] }
 0x473   :  { %4439 = vmatprep.mubr.msk.f32.mxu0 %vm3536_vm2, %v3429_v40 }
 0x474   :  { %v3111_v39 = vsub.f32 %v3063_v10, %v3087_v55 }
 0x476   :  { %3367 = vperm.xlu1 %4656, %v3113_v59   ;;  %3342 = vperm.xlu0 %4655, %v3108_v18  }
 0x47a   :  { %3362 = vperm.xlu1 %4656, %v3112_v16  }
 0x47e   :  { %3377 = vperm.xlu1 %4656, %v3115_v38  }
 0x482   :  { %3372 = vperm.xlu1 %4656, %v3114_v0  }
 0x486   :  { %3357 = vperm.xlu1 %4656, %v3111_v39  }
 0x48a   :  { %3352 = vperm.xlu1 %4656, %v3110_v62  }
 0x48e   :  { %3347 = vperm.xlu1 %4656, %v8634_v31   ;;  %v8637_v31 = vld [vmem:[#allocation5_spill] sm:$0xff] }
 0x4a1   :  { %v7860_v18 = vpop.permute.xlu0 %3133  ;;  %v7862_v50 = vpop.permute.xlu1 %3287 }
 0x4a5   :  { %v7864_v30 = vpop.permute.xlu0 %3143  ;;  %v7866_v51 = vpop.permute.xlu1 %3282 }
 0x4a6   :  { %v3241_v40 = vmul.f32 %v7864_v30, %v8637_v31 }
 0x4a9   :  { %v7868_v52 = vpop.permute.xlu0 %3138  ;;  %v7870_v62 = vpop.permute.xlu1 %3297 }
 0x4ad   :  { %v3154_v9 = vpop.permute.xlu0 %3153  ;;  %v7872_v21 = vpop.permute.xlu1 %3292 }
 0x4b1   :  { %v3149_v54 = vpop.permute.xlu0 %3148  ;;  %v3174_v0 = vpop.permute.xlu1 %3173 }
 0x4b5   :  { %v3164_v15 = vpop.permute.xlu0 %3163  ;;  %v3308_v38 = vpop.permute.xlu1 %3307 }
 0x4b9   :  { %v3159_v6 = vpop.permute.xlu0 %3158  ;;  %v3303_v4 = vpop.permute.xlu1 %3302 }
 0x4bd   :  { %v3169_v17 = vpop.permute.xlu0 %3168  ;;  %v3184_v5 = vpop.permute.xlu1 %3183 }
 0x4be   :  { %v3249_v22 = vmul.f32 %v3184_v5, %v7335_v8  ;;  %v3246_v42 = vmul.f32 %v3169_v17, %v7346_v23 }
 0x4c1   :  { %v3194_v24 = vpop.permute.xlu0 %3193  ;;  %v3318_v33 = vpop.permute.xlu1 %3317 }
 0x4c2   :  { %v3251_v49 = vmul.f32 %v3194_v24, %v7343_v1  ;;  %v3247_v1 = vmul.f32 %v3174_v0, %v7361_v35  ;;  %v3244_v35 = vmul.f32 %v3159_v6, %v7358_v45  ;;  %v8636_v45 = vld [vmem:[#allocation2_spill] sm:$0xff] }
 0x4c3   :  { %v3242_v16 = vmul.f32 %v3149_v54, %v8636_v45  ;;  %v8638_v54 = vld [vmem:[#allocation3_spill] sm:$0xff] }
 0x4c4   :  { %v3391_v14 = vadd.f32 %v3318_v33, %v3247_v1  ;;  %v3388_v55 = vadd.f32 %v3303_v4, %v3244_v35  ;;  %v3240_v0 = vmul.f32 %v7868_v52, %v8638_v54  ;;  %v8639_v52 = vld [vmem:[#allocation7_spill] sm:$0xff]  ;;  %v8640_v33 = vld [vmem:[#allocation4_spill] sm:$0xff]  ;;  %v8644_v1 = vld [vmem:[#allocation13_spill] sm:$0xff] }
 0x4c5   :  { %v7874_v20 = vpop.permute.xlu0 %3128  ;;  %v3179_v32 = vpop.permute.xlu1 %3178  ;;  %v8650_v54 = vld [vmem:[#allocation12_spill] sm:$0xff] }
 0x4c6   :  { %v3248_v47 = vmul.f32 %v3179_v32, %v7339_v3  ;;  %v3415_v41 = vmax.f32 %v3391_v14, 0.0  ;;  %v3384_v17 = vadd.f32 %v7866_v51, %v3240_v0  ;;  %v3238_v32 = vmul.f32 %v7874_v20, %v8640_v33  ;;  %v8641_v51 = vld [vmem:[#allocation8_spill] sm:$0xff]  ;;  %v8646_v14 = vld [vmem:[#allocation9_spill] sm:$0xff] }
 0x4c7   :  { %v3475_v33 = vld [vmem:[%s8599_s4 + $0x178] sm:$0xff] }
 0x4c9   :  { %v3313_v60 = vpop.permute.xlu1 %3312  ;;  %v7876_v61 = vpop.permute.xlu0 %3123 }
 0x4ca   :  { %v3390_v28 = vadd.f32 %v3313_v60, %v3246_v42 }
 0x4cc   :  { %v3414_v10 = vmax.f32 %v3390_v28, 0.0 }
 0x4cd   :  { %v3328_v37 = vpop.permute.xlu1 %3327  ;;  %v7878_v63 = vpop.permute.xlu0 %3118 }
 0x4ce   :  { %v3393_v53 = vadd.f32 %v3328_v37, %v3249_v22  ;;  %v3237_v37 = vmul.f32 %v7876_v61, %v8641_v51  ;;  %v8643_v61 = vld [vmem:[#allocation11_spill] sm:$0xff] }
 0x4cf   :  { %v3477_v51 = vld [vmem:[%s8599_s4 + $0x188] sm:$0xff] }
 0x4d0   :  { %v3417_v3 = vmax.f32 %v3393_v53, 0.0 }
 0x4d1   :  { %v3189_v11 = vpop.permute.xlu1 %3188  ;;  %v7880_v19 = vpop.permute.xlu0 %3213 }
 0x4d2   :  { %v3250_v34 = vmul.f32 %v3189_v11, %v7349_v44  ;;  %v3245_v44 = vmul.f32 %v3164_v15, %v7371_v27  ;;  %v3243_v27 = vmul.f32 %v3154_v9, %v7381_v36  ;;  %v3386_v15 = vadd.f32 %v7872_v21, %v3242_v16 }
 0x4d3   :  { %v3239_v21 = vmul.f32 %v7860_v18, %v8639_v52  ;;  %v3408_v18 = vmax.f32 %v3384_v17, 0.0  ;;  %v3428_v52 = vld [vmem:[%s8599_s4] sm:$0xff]  ;;  %v3431_v17 = vld [vmem:[%s8599_s4 + $0x18] sm:$0xff] }
 0x4d4   :  { %v3389_v25 = vadd.f32 %v3308_v38, %v3245_v44  ;;  %v3387_v48 = vadd.f32 %v7870_v62, %v3243_v27  ;;  %v3412_v38 = vmax.f32 %v3388_v55, 0.0  ;;  %v3385_v62 = vadd.f32 %v7862_v50, %v3241_v40  ;;  %v8648_v55 = vld [vmem:[#allocation10_spill] sm:$0xff] }
 0x4d5   :  { %v3323_v57 = vpop.permute.xlu1 %3322  ;;  %v7885_v56 = vpop.permute.xlu0 %3223  ;;  %v3410_v5 = vmax.f32 %v3386_v15, 0.0 }
 0x4d6   :  { %v3392_v7 = vadd.f32 %v3323_v57, %v3248_v47  ;;  %v3413_v9 = vmax.f32 %v3389_v25, 0.0  ;;  %v3411_v6 = vmax.f32 %v3387_v48, 0.0  ;;  %v3409_v24 = vmax.f32 %v3385_v62, 0.0  ;;  %v8649_v48 = vld [vmem:[#allocation16_spill] sm:$0xff] }
 0x4d8   :  { %v3416_v59 = vmax.f32 %v3392_v7, 0.0  ;;  %v3257_v7 = vmul.f32 %v7885_v56, %v8644_v1  ;;  %v8647_v56 = vld [vmem:[#allocation14_spill] sm:$0xff]  ;;  %v3442_v1 = vld [vmem:[%s8599_s4 + $0x70] sm:$0xff] }
 0x4d9   :  { %v3338_v26 = vpop.permute.xlu1 %3337  ;;  %v7895_v12 = vpop.permute.xlu0 %3218 }
 0x4da   :  { %v3395_v58 = vadd.f32 %v3338_v26, %v3251_v49  ;;  %v8642_v49 = vld [vmem:[#allocation6_spill] sm:$0xff] }
 0x4db   :  { %v3236_v26 = vmul.f32 %v7878_v63, %v8642_v49  ;;  %v3436_v49 = vld [vmem:[%s8599_s4 + $0x40] sm:$0xff] }
 0x4dc   :  { %v3419_v29 = vmax.f32 %v3395_v58, 0.0 }
 0x4dd   :  { %v3333_v46 = vpop.permute.xlu1 %3332  ;;  %v3234_v39 = vpop.permute.xlu0 %3233 }
 0x4de   :  { %v3394_v43 = vadd.f32 %v3333_v46, %v3250_v34  ;;  %3700 = vmatpush1.msra.mxu0 %v3419_v29  ;;  %4619 = vmatpush1.msra.mxu1 %v3419_v29  ;;  %v3259_v34 = vmul.f32 %v3234_v39, %v8643_v61  ;;  %v3438_v61 = vld [vmem:[%s8599_s4 + $0x50] sm:$0xff] }
 0x4df   :  { %3701 = vmatprep.subr.mxu0 %v8635_v2  ;;  %4596 = vmatprep.subr.mxu1 %v8635_v2 }
 0x4e0   :  { %v3418_v8 = vmax.f32 %v3394_v43, 0.0 }
 0x4e1   :  { %v7891_v13 = vpop.permute.xlu1 %3277  ;;  %v3229_v4 = vpop.permute.xlu0 %3228 }
 0x4e2   :  { %3702 = vmatpush1.msra.mxu0 %v3418_v8  ;;  %4620 = vmatpush1.msra.mxu1 %v3418_v8  ;;  %v3383_v60 = vadd.f32 %v7891_v13, %v3239_v21  ;;  %v8645_v8 = vld [vmem:[#allocation15_spill] sm:$0xff]  ;;  %v3470_v21 = vld [vmem:[%s8599_s4 + $0x150] sm:$0xff] }
 0x4e3   :  { %3703 = vmatprep.subr.mxu0 %v8635_v2  ;;  %4597 = vmatprep.subr.mxu1 %v8635_v2  ;;  %v3258_v13 = vmul.f32 %v3229_v4, %v8645_v8  ;;  %v3445_v8 = vld [vmem:[%s8599_s4 + $0x88] sm:$0xff] }
 0x4e4   :  { %3704 = vmatpush1.msra.mxu0 %v3417_v3  ;;  %4621 = vmatpush1.msra.mxu1 %v3417_v3  ;;  %v3407_v58 = vmax.f32 %v3383_v60, 0.0  ;;  %v3256_v3 = vmul.f32 %v7895_v12, %v8646_v14  ;;  %v3474_v60 = vld [vmem:[%s8599_s4 + $0x170] sm:$0xff]  ;;  %v3447_v14 = vld [vmem:[%s8599_s4 + $0x98] sm:$0xff] }
 0x4e5   :  { %3705 = vmatprep.subr.mxu0 %v8635_v2  ;;  %4598 = vmatprep.subr.mxu1 %v8635_v2  ;;  %v3273_v23 = vpop.permute.xlu1 %3272  ;;  %v3209_v57 = vpop.permute.xlu0 %3208 }
 0x4e6   :  { %3706 = vmatpush1.msra.mxu0 %v3416_v59  ;;  %4622 = vmatpush1.msra.mxu1 %v3416_v59  ;;  %v3382_v11 = vadd.f32 %v3273_v23, %v3238_v32  ;;  %v3255_v23 = vmul.f32 %v7880_v19, %v8647_v56  ;;  %v3254_v19 = vmul.f32 %v3209_v57, %v8648_v55  ;;  %v3432_v32 = vld [vmem:[%s8599_s4 + $0x20] sm:$0xff]  ;;  %v3437_v57 = vld [vmem:[%s8599_s4 + $0x48] sm:$0xff]  ;;  %v3491_v56 = vld [vmem:[%s8599_s4 + $0x1f8] sm:$0xff] }
 0x4e7   :  { %3707 = vmatprep.subr.mxu0 %v8635_v2  ;;  %4599 = vmatprep.subr.mxu1 %v8635_v2  ;;  %v3495_v55 = vld [vmem:[%s8599_s4 + $0x218] sm:$0xff] }
 0x4e8   :  { %3708 = vmatpush1.msra.mxu0 %v3415_v41  ;;  %4623 = vmatpush1.msra.mxu1 %v3415_v41  ;;  %v3406_v29 = vmax.f32 %v3382_v11, 0.0  ;;  %v3476_v11 = vld [vmem:[%s8599_s4 + $0x180] sm:$0xff] }
 0x4e9   :  { %3709 = vmatprep.subr.mxu0 %v8635_v2  ;;  %4600 = vmatprep.subr.mxu1 %v8635_v2  ;;  %v3268_v36 = vpop.permute.xlu1 %3267  ;;  %v3204_v43 = vpop.permute.xlu0 %3203 }
 0x4ea   :  { %3710 = vmatpush1.msra.mxu0 %v3414_v10  ;;  %4624 = vmatpush1.msra.mxu1 %v3414_v10  ;;  %v3381_v22 = vadd.f32 %v3268_v36, %v3237_v37  ;;  %v3434_v37 = vld [vmem:[%s8599_s4 + $0x30] sm:$0xff] }
 0x4eb   :  { %3711 = vmatprep.subr.mxu0 %v8635_v2  ;;  %4601 = vmatprep.subr.mxu1 %v8635_v2 }
 0x4ec   :  { %3712 = vmatpush1.msra.mxu0 %v3413_v9  ;;  %4625 = vmatpush1.msra.mxu1 %v3413_v9  ;;  %v3405_v63 = vmax.f32 %v3381_v22, 0.0  ;;  %v3253_v9 = vmul.f32 %v3204_v43, %v8649_v48  ;;  %v3481_v22 = vld [vmem:[%s8599_s4 + $0x1a8] sm:$0xff] }
 0x4ed   :  { %3713 = vmatprep.subr.mxu0 %v8635_v2  ;;  %4602 = vmatprep.subr.mxu1 %v8635_v2  ;;  %v3263_v30 = vpop.permute.xlu1 %3262  ;;  %v3199_v41 = vpop.permute.xlu0 %3198  ;;  %v3485_v43 = vld [vmem:[%s8599_s4 + $0x1c8] sm:$0xff] }
 0x4ee   :  { %3714 = vmatpush1.msra.mxu0 %v3412_v38  ;;  %4626 = vmatpush1.msra.mxu1 %v3412_v38  ;;  %v3380_v46 = vadd.f32 %v3263_v30, %v3236_v26  ;;  %v3252_v0 = vmul.f32 %v3199_v41, %v8650_v54  ;;  %v3478_v26 = vld [vmem:[%s8599_s4 + $0x190] sm:$0xff]  ;;  %v3493_v41 = vld [vmem:[%s8599_s4 + $0x208] sm:$0xff]  ;;  %v3456_v54 = vld [vmem:[%s8599_s4 + $0xe0] sm:$0xff] }
 0x4ef   :  { %3715 = vmatprep.subr.mxu0 %v8635_v2  ;;  %4603 = vmatprep.subr.mxu1 %v8635_v2  ;;  %v3457_v48 = vld [vmem:[%s8599_s4 + $0xe8] sm:$0xff] }
 0x4f0   :  { %3716 = vmatpush1.msra.mxu0 %v3411_v6  ;;  %4627 = vmatpush1.msra.mxu1 %v3411_v6  ;;  %v3404_v44 = vmax.f32 %v3380_v46, 0.0  ;;  %v3483_v46 = vld [vmem:[%s8599_s4 + $0x1b8] sm:$0xff] }
 0x4f1   :  { %3717 = vmatprep.subr.mxu0 %v8635_v2  ;;  %4604 = vmatprep.subr.mxu1 %v8635_v2  ;;  %v3368_v50 = vpop.permute.xlu1 %3367  ;;  %v3343_v40 = vpop.permute.xlu0 %3342 }
 0x4f2   :  { %3718 = vmatpush1.msra.mxu0 %v3410_v5  ;;  %4628 = vmatpush1.msra.mxu1 %v3410_v5  ;;  %v3401_v35 = vadd.f32 %v3368_v50, %v3257_v7  ;;  %v3396_v30 = vadd.f32 %v3343_v40, %v3252_v0  ;;  %v3473_v5 = vld [vmem:[%s8599_s4 + $0x168] sm:$0xff]  ;;  %v3472_v50 = vld [vmem:[%s8599_s4 + $0x160] sm:$0xff]  ;;  %v3498_v0 = vld [vmem:[%s8599_s4 + $0x230] sm:$0xff] }
 0x4f3   :  { %3719 = vmatprep.subr.mxu0 %v8635_v2  ;;  %4605 = vmatprep.subr.mxu1 %v8635_v2  ;;  %v3484_v7 = vld [vmem:[%s8599_s4 + $0x1c0] sm:$0xff] }
 0x4f4   :  { %3720 = vmatpush1.msra.mxu0 %v3409_v24  ;;  %4629 = vmatpush1.msra.mxu1 %v3409_v24  ;;  %v3425_v45 = vmax.f32 %v3401_v35, 0.0  ;;  %v3420_v4 = vmax.f32 %v3396_v30, 0.0  ;;  %v3433_v24 = vld [vmem:[%s8599_s4 + $0x28] sm:$0xff]  ;;  %v3446_v35 = vld [vmem:[%s8599_s4 + $0x90] sm:$0xff]  ;;  %v3496_v40 = vld [vmem:[%s8599_s4 + $0x220] sm:$0xff] }
 0x4f5   :  { %3721 = vmatprep.subr.mxu0 %v8635_v2  ;;  %4606 = vmatprep.subr.mxu1 %v8635_v2  ;;  %v3363_v20 = vpop.permute.xlu1 %3362  ;;  %v3458_v30 = vld [vmem:[%s8599_s4 + $0xf0] sm:$0xff] }
 0x4f6   :  { %3722 = vmatpush1.msra.mxu0 %v3408_v18  ;;  %4630 = vmatpush1.msra.mxu1 %v3408_v18  ;;  %v3400_v27 = vadd.f32 %v3363_v20, %v3256_v3  ;;  %v3435_v18 = vld [vmem:[%s8599_s4 + $0x38] sm:$0xff]  ;;  %v3489_v3 = vld [vmem:[%s8599_s4 + $0x1e8] sm:$0xff] }
 0x4f7   :  { %3723 = vmatprep.subr.mxu0 %v8635_v2  ;;  %4607 = vmatprep.subr.mxu1 %v8635_v2  ;;  %v3479_v20 = vld [vmem:[%s8599_s4 + $0x198] sm:$0xff] }
 0x4f8   :  { %3724 = vmatpush1.msra.mxu0 %v3407_v58  ;;  %4631 = vmatpush1.msra.mxu1 %v3407_v58  ;;  %v3424_v10 = vmax.f32 %v3400_v27, 0.0  ;;  %v3439_v58 = vld [vmem:[%s8599_s4 + $0x58] sm:$0xff]  ;;  %v3490_v27 = vld [vmem:[%s8599_s4 + $0x1f0] sm:$0xff] }
 0x4f9   :  { %3725 = vmatprep.subr.mxu0 %v8635_v2  ;;  %4608 = vmatprep.subr.mxu1 %v8635_v2  ;;  %v3378_v47 = vpop.permute.xlu1 %3377 }
 0x4fa   :  { %v3403_v53 = vadd.f32 %v3378_v47, %v3259_v34  ;;  %3726 = vmatpush1.msra.mxu0 %v3406_v29  ;;  %4632 = vmatpush1.msra.mxu1 %v3406_v29  ;;  %v3480_v34 = vld [vmem:[%s8599_s4 + $0x1a0] sm:$0xff]  ;;  %v3441_v29 = vld [vmem:[%s8599_s4 + $0x68] sm:$0xff] }
 0x4fb   :  { %3727 = vmatprep.subr.mxu0 %v8635_v2  ;;  %4609 = vmatprep.subr.mxu1 %v8635_v2  ;;  %v3440_v47 = vld [vmem:[%s8599_s4 + $0x60] sm:$0xff] }
 0x4fc   :  { %3728 = vmatpush1.msra.mxu0 %v3405_v63  ;;  %4633 = vmatpush1.msra.mxu1 %v3405_v63  ;;  %v3427_v28 = vmax.f32 %v3403_v53, 0.0  ;;  %v3482_v63 = vld [vmem:[%s8599_s4 + $0x1b0] sm:$0xff]  ;;  %v3443_v53 = vld [vmem:[%s8599_s4 + $0x78] sm:$0xff] }
 0x4fd   :  { %3729 = vmatprep.subr.mxu0 %v8635_v2  ;;  %4610 = vmatprep.subr.mxu1 %v8635_v2  ;;  %v3373_v42 = vpop.permute.xlu1 %3372 }
 0x4fe   :  { %v3402_v59 = vadd.f32 %v3373_v42, %v3258_v13  ;;  %3730 = vmatpush1.msra.mxu0 %v3404_v44  ;;  %4634 = vmatpush1.msra.mxu1 %v3404_v44  ;;  %v3487_v13 = vld [vmem:[%s8599_s4 + $0x1d8] sm:$0xff]  ;;  %v3444_v44 = vld [vmem:[%s8599_s4 + $0x80] sm:$0xff]  ;;  %v3486_v42 = vld [vmem:[%s8599_s4 + $0x1d0] sm:$0xff] }
 0x4ff   :  { %3747 = vmatprep.subr.mxu0 %v8635_v2  ;;  %4611 = vmatprep.subr.mxu1 %v8635_v2 }
 0x500   :  { %v3426_v25 = vmax.f32 %v3402_v59, 0.0  ;;  %3748 = vmatpush2.msra.mxu0 %v3427_v28  ;;  %4635 = vmatpush2.msra.mxu1 %v3427_v28  ;;  %v3488_v28 = vld [vmem:[%s8599_s4 + $0x1e0] sm:$0xff]  ;;  %v3449_v59 = vld [vmem:[%s8599_s4 + $0xa8] sm:$0xff] }
 0x501   :  { %3749 = vmatprep.subr.mxu0 %v8635_v2  ;;  %4612 = vmatprep.subr.mxu1 %v8635_v2  ;;  %v3358_v12 = vpop.permute.xlu1 %3357 }
 0x502   :  { %v3399_v16 = vadd.f32 %v3358_v12, %v3255_v23  ;;  %3750 = vmatpush2.msra.mxu0 %v3426_v25  ;;  %4636 = vmatpush2.msra.mxu1 %v3426_v25  ;;  %v3448_v23 = vld [vmem:[%s8599_s4 + $0xa0] sm:$0xff]  ;;  %v3451_v25 = vld [vmem:[%s8599_s4 + $0xb8] sm:$0xff]  ;;  %v3450_v12 = vld [vmem:[%s8599_s4 + $0xb0] sm:$0xff] }
 0x503   :  { %3751 = vmatprep.subr.mxu0 %v8635_v2  ;;  %4613 = vmatprep.subr.mxu1 %v8635_v2 }
 0x504   :  { %3752 = vmatpush2.msra.mxu0 %v3425_v45  ;;  %4637 = vmatpush2.msra.mxu1 %v3425_v45  ;;  %v3423_v36 = vmax.f32 %v3399_v16, 0.0  ;;  %v3492_v45 = vld [vmem:[%s8599_s4 + $0x200] sm:$0xff]  ;;  %v3453_v16 = vld [vmem:[%s8599_s4 + $0xc8] sm:$0xff] }
 0x505   :  { %3753 = vmatprep.subr.mxu0 %v8635_v2  ;;  %4614 = vmatprep.subr.mxu1 %v8635_v2  ;;  %v3353_v39 = vpop.permute.xlu1 %3352 }
 0x506   :  { %v3398_v31 = vadd.f32 %v3353_v39, %v3254_v19  ;;  %3754 = vmatpush2.msra.mxu0 %v3424_v10  ;;  %4638 = vmatpush2.msra.mxu1 %v3424_v10  ;;  %v3452_v19 = vld [vmem:[%s8599_s4 + $0xc0] sm:$0xff]  ;;  %v3494_v10 = vld [vmem:[%s8599_s4 + $0x210] sm:$0xff]  ;;  %v3455_v39 = vld [vmem:[%s8599_s4 + $0xd8] sm:$0xff] }
 0x507   :  { %3755 = vmatprep.subr.mxu0 %v8635_v2  ;;  %4615 = vmatprep.subr.mxu1 %v8635_v2 }
 0x508   :  { %v3422_v15 = vmax.f32 %v3398_v31, 0.0  ;;  %3756 = vmatpush2.msra.mxu0 %v3423_v36  ;;  %4639 = vmatpush2.msra.mxu1 %v3423_v36  ;;  %v3497_v36 = vld [vmem:[%s8599_s4 + $0x228] sm:$0xff]  ;;  %v3454_v31 = vld [vmem:[%s8599_s4 + $0xd0] sm:$0xff] }
 0x509   :  { %3757 = vmatprep.subr.mxu0 %v8635_v2  ;;  %4616 = vmatprep.subr.mxu1 %v8635_v2  ;;  %v3348_v38 = vpop.permute.xlu1 %3347 }
 0x50a   :  { %v3397_v62 = vadd.f32 %v3348_v38, %v3253_v9  ;;  %3758 = vmatpush2.msra.mxu0 %v3422_v15  ;;  %4640 = vmatpush2.msra.mxu1 %v3422_v15  ;;  %v3499_v9 = vld [vmem:[%s8599_s4 + $0x238] sm:$0xff]  ;;  %v3501_v38 = vld [vmem:[%s8599_s4 + $0x248] sm:$0xff] }
 0x50b   :  { %3759 = vmatprep.subr.mxu0 %v8635_v2  ;;  %4617 = vmatprep.subr.mxu1 %v8635_v2  ;;  %v3459_v15 = vld [vmem:[%s8599_s4 + $0xf8] sm:$0xff] }
 0x50c   :  { %v3421_v6 = vmax.f32 %v3397_v62, 0.0  ;;  %v3500_v62 = vld [vmem:[%s8599_s4 + $0x240] sm:$0xff] }
 0x50e   :  { %3760 = vmatpush2.msra.mxu0 %v3421_v6  ;;  %4641 = vmatpush2.msra.mxu1 %v3421_v6  ;;  %v3461_v6 = vld [vmem:[%s8599_s4 + $0x108] sm:$0xff] }
 0x50f   :  { %3761 = vmatprep.subr.mxu0 %v8635_v2  ;;  %4618 = vmatprep.subr.mxu1 %v8635_v2  ;;  %v3430_v2 = vld [vmem:[%s8599_s4 + $0x10] sm:$0xff] }
 0x510   :  { %3762 = vmatpush2.msra.mxu0 %v3420_v4  ;;  %4642 = vmatpush2.msra.mxu1 %v3420_v4  ;;  %v3503_v4 = vld [vmem:[%s8599_s4 + $0x258] sm:$0xff] }
 0x511   :  { %3764 = vmatmul.mubr.f32.vlgmr.msra.gmra.mxu0 %v3428_v52  ;;  %3869 = vmatmul.mubr.f32.vlgmr.msra.gmra.mxu1 %v3470_v21  ;;  %v3460_v52 = vld [vmem:[%s8599_s4 + $0x100] sm:$0xff]  ;;  %v3502_v21 = vld [vmem:[%s8599_s4 + $0x250] sm:$0xff] }
 0x512   :  { %4440 = vmatprep.mubr.msk.f32.mxu0 %vm3536_vm2, %v3431_v17  ;;  %4461 = vmatprep.mubr.msk.f32.mxu1 %vm3536_vm2, %v3473_v5  ;;  %v3463_v17 = vld [vmem:[%s8599_s4 + $0x118] sm:$0xff]  ;;  %v3505_v5 = vld [vmem:[%s8599_s4 + $0x268] sm:$0xff] }
 0x515   :  { %3769 = vmatmul.mubr.f32.gmra.mxu0 %v3430_v2  ;;  %3874 = vmatmul.mubr.f32.gmra.mxu1 %v3472_v50  ;;  %v3462_v2 = vld [vmem:[%s8599_s4 + $0x110] sm:$0xff]  ;;  %v3504_v50 = vld [vmem:[%s8599_s4 + $0x260] sm:$0xff] }
 0x516   :  { %4441 = vmatprep.mubr.msk.f32.mxu0 %vm3536_vm2, %v3433_v24  ;;  %4462 = vmatprep.mubr.msk.f32.mxu1 %vm3536_vm2, %v3475_v33  ;;  %v3465_v24 = vld [vmem:[%s8599_s4 + $0x128] sm:$0xff]  ;;  %v3507_v33 = vld [vmem:[%s8599_s4 + $0x278] sm:$0xff] }
 0x519   :  { %3774 = vmatmul.mubr.f32.gmra.mxu0 %v3432_v32  ;;  %3879 = vmatmul.mubr.f32.gmra.mxu1 %v3474_v60  ;;  %v3464_v32 = vld [vmem:[%s8599_s4 + $0x120] sm:$0xff]  ;;  %v3506_v60 = vld [vmem:[%s8599_s4 + $0x270] sm:$0xff] }
 0x51a   :  { %4442 = vmatprep.mubr.msk.f32.mxu0 %vm3536_vm2, %v3435_v18  ;;  %4463 = vmatprep.mubr.msk.f32.mxu1 %vm3536_vm2, %v3477_v51  ;;  %v3467_v18 = vld [vmem:[%s8599_s4 + $0x138] sm:$0xff]  ;;  %v3509_v51 = vld [vmem:[%s8599_s4 + $0x288] sm:$0xff] }
 0x51d   :  { %3779 = vmatmul.mubr.f32.gmra.mxu0 %v3434_v37  ;;  %3884 = vmatmul.mubr.f32.gmra.mxu1 %v3476_v11  ;;  %v3466_v37 = vld [vmem:[%s8599_s4 + $0x130] sm:$0xff]  ;;  %v3508_v11 = vld [vmem:[%s8599_s4 + $0x280] sm:$0xff] }
 0x51e   :  { %4443 = vmatprep.mubr.msk.f32.mxu0 %vm3536_vm2, %v3437_v57  ;;  %4464 = vmatprep.mubr.msk.f32.mxu1 %vm3536_vm2, %v3479_v20  ;;  %v3469_v57 = vld [vmem:[%s8599_s4 + $0x148] sm:$0xff]  ;;  %v3511_v20 = vld [vmem:[%s8599_s4 + $0x298] sm:$0xff] }
 0x521   :  { %3784 = vmatmul.mubr.f32.gmra.mxu0 %v3436_v49  ;;  %3889 = vmatmul.mubr.f32.gmra.mxu1 %v3478_v26  ;;  %v3468_v49 = vld [vmem:[%s8599_s4 + $0x140] sm:$0xff]  ;;  %v3510_v26 = vld [vmem:[%s8599_s4 + $0x290] sm:$0xff] }
 0x522   :  { %4444 = vmatprep.mubr.msk.f32.mxu0 %vm3536_vm2, %v3439_v58  ;;  %4465 = vmatprep.mubr.msk.f32.mxu1 %vm3536_vm2, %v3481_v22  ;;  %v3513_v58 = vld [vmem:[%s8599_s4 + $0x2a8] sm:$0xff]  ;;  %v3512_v22 = vld [vmem:[%s8599_s4 + $0x2a0] sm:$0xff] }
 0x525   :  { %3789 = vmatmul.mubr.f32.gmra.mxu0 %v3438_v61  ;;  %3894 = vmatmul.mubr.f32.gmra.mxu1 %v3480_v34  ;;  %v3515_v61 = vld [vmem:[%s8599_s4 + $0x2b8] sm:$0xff]  ;;  %v3514_v34 = vld [vmem:[%s8599_s4 + $0x2b0] sm:$0xff] }
 0x526   :  { %4445 = vmatprep.mubr.msk.f32.mxu0 %vm3536_vm2, %v3441_v29  ;;  %4466 = vmatprep.mubr.msk.f32.mxu1 %vm3536_vm2, %v3483_v46  ;;  %v3517_v29 = vld [vmem:[%s8599_s4 + $0x2c8] sm:$0xff]  ;;  %v3516_v46 = vld [vmem:[%s8599_s4 + $0x2c0] sm:$0xff] }
 0x529   :  { %3794 = vmatmul.mubr.f32.gmra.mxu0 %v3440_v47  ;;  %3899 = vmatmul.mubr.f32.gmra.mxu1 %v3482_v63  ;;  %v3519_v47 = vld [vmem:[%s8599_s4 + $0x2d8] sm:$0xff]  ;;  %v3518_v63 = vld [vmem:[%s8599_s4 + $0x2d0] sm:$0xff] }
 0x52a   :  { %4446 = vmatprep.mubr.msk.f32.mxu0 %vm3536_vm2, %v3443_v53  ;;  %4467 = vmatprep.mubr.msk.f32.mxu1 %vm3536_vm2, %v3485_v43  ;;  %v3521_v53 = vld [vmem:[%s8599_s4 + $0x2e8] sm:$0xff]  ;;  %v3520_v43 = vld [vmem:[%s8599_s4 + $0x2e0] sm:$0xff] }
 0x52d   :  { %3799 = vmatmul.mubr.f32.gmra.mxu0 %v3442_v1  ;;  %3904 = vmatmul.mubr.f32.gmra.mxu1 %v3484_v7  ;;  %v3523_v1 = vld [vmem:[%s8599_s4 + $0x2f8] sm:$0xff]  ;;  %v3522_v7 = vld [vmem:[%s8599_s4 + $0x2f0] sm:$0xff] }
 0x52e   :  { %4447 = vmatprep.mubr.msk.f32.mxu0 %vm3536_vm2, %v3445_v8  ;;  %4468 = vmatprep.mubr.msk.f32.mxu1 %vm3536_vm2, %v3487_v13  ;;  %v3525_v8 = vld [vmem:[%s8599_s4 + $0x308] sm:$0xff]  ;;  %v3524_v13 = vld [vmem:[%s8599_s4 + $0x300] sm:$0xff] }
 0x531   :  { %3804 = vmatmul.mubr.f32.gmra.mxu0 %v3444_v44  ;;  %3909 = vmatmul.mubr.f32.gmra.mxu1 %v3486_v42  ;;  %v3527_v44 = vld [vmem:[%s8599_s4 + $0x318] sm:$0xff]  ;;  %v3526_v42 = vld [vmem:[%s8599_s4 + $0x310] sm:$0xff] }
 0x532   :  { %4448 = vmatprep.mubr.msk.f32.mxu0 %vm3536_vm2, %v3447_v14  ;;  %4469 = vmatprep.mubr.msk.f32.mxu1 %vm3536_vm2, %v3489_v3  ;;  %v3529_v14 = vld [vmem:[%s8599_s4 + $0x328] sm:$0xff]  ;;  %v3528_v3 = vld [vmem:[%s8599_s4 + $0x320] sm:$0xff] }
 0x535   :  { %3809 = vmatmul.mubr.f32.gmra.mxu0 %v3446_v35  ;;  %3914 = vmatmul.mubr.f32.gmra.mxu1 %v3488_v28  ;;  %v3531_v35 = vld [vmem:[%s8599_s4 + $0x338] sm:$0xff]  ;;  %v3530_v28 = vld [vmem:[%s8599_s4 + $0x330] sm:$0xff] }
 0x536   :  { %4449 = vmatprep.mubr.msk.f32.mxu0 %vm3536_vm2, %v3449_v59  ;;  %4470 = vmatprep.mubr.msk.f32.mxu1 %vm3536_vm2, %v3491_v56  ;;  %v3533_v59 = vld [vmem:[%s8599_s4 + $0x348] sm:$0xff]  ;;  %v3532_v56 = vld [vmem:[%s8599_s4 + $0x340] sm:$0xff] }
 0x539   :  { %3814 = vmatmul.mubr.f32.gmra.mxu0 %v3448_v23  ;;  %3919 = vmatmul.mubr.f32.gmra.mxu1 %v3490_v27  ;;  %v3535_v23 = vld [vmem:[%s8599_s4 + $0x358] sm:$0xff]  ;;  %v3534_v27 = vld [vmem:[%s8599_s4 + $0x350] sm:$0xff]  ;;  %s4709_s4 = smov 7  }
 0x53a   :  { %4450 = vmatprep.mubr.msk.f32.mxu0 %vm3536_vm2, %v3451_v25  ;;  %4471 = vmatprep.mubr.msk.f32.mxu1 %vm3536_vm2, %v3493_v41 }
 0x53d   :  { %3819 = vmatmul.mubr.f32.gmra.mxu0 %v3450_v12  ;;  %3924 = vmatmul.mubr.f32.gmra.mxu1 %v3492_v45 }
 0x53e   :  { %4451 = vmatprep.mubr.msk.f32.mxu0 %vm3536_vm2, %v3453_v16  ;;  %4472 = vmatprep.mubr.msk.f32.mxu1 %vm3536_vm2, %v3495_v55 }
 0x541   :  { %3824 = vmatmul.mubr.f32.gmra.mxu0 %v3452_v19  ;;  %3929 = vmatmul.mubr.f32.gmra.mxu1 %v3494_v10 }
 0x542   :  { %4452 = vmatprep.mubr.msk.f32.mxu0 %vm3536_vm2, %v3455_v39  ;;  %4473 = vmatprep.mubr.msk.f32.mxu1 %vm3536_vm2, %v3497_v36 }
 0x545   :  { %3829 = vmatmul.mubr.f32.gmra.mxu0 %v3454_v31  ;;  %3934 = vmatmul.mubr.f32.gmra.mxu1 %v3496_v40 }
 0x546   :  { %4453 = vmatprep.mubr.msk.f32.mxu0 %vm3536_vm2, %v3457_v48  ;;  %4474 = vmatprep.mubr.msk.f32.mxu1 %vm3536_vm2, %v3499_v9 }
 0x549   :  { %3834 = vmatmul.mubr.f32.gmra.mxu0 %v3456_v54  ;;  %3939 = vmatmul.mubr.f32.gmra.mxu1 %v3498_v0 }
 0x54a   :  { %4454 = vmatprep.mubr.msk.f32.mxu0 %vm3536_vm2, %v3459_v15  ;;  %4475 = vmatprep.mubr.msk.f32.mxu1 %vm3536_vm2, %v3501_v38 }
 0x54d   :  { %3839 = vmatmul.mubr.f32.gmra.mxu0 %v3458_v30  ;;  %3944 = vmatmul.mubr.f32.gmra.mxu1 %v3500_v62 }
 0x54e   :  { %4455 = vmatprep.mubr.msk.f32.mxu0 %vm3536_vm2, %v3461_v6  ;;  %4476 = vmatprep.mubr.msk.f32.mxu1 %vm3536_vm2, %v3503_v4 }
 0x551   :  { %3844 = vmatmul.mubr.f32.gmra.mxu0 %v3460_v52  ;;  %3949 = vmatmul.mubr.f32.gmra.mxu1 %v3502_v21 }
 0x552   :  { %4456 = vmatprep.mubr.msk.f32.mxu0 %vm3536_vm2, %v3463_v17  ;;  %4477 = vmatprep.mubr.msk.f32.mxu1 %vm3536_vm2, %v3505_v5 }
 0x555   :  { %3849 = vmatmul.mubr.f32.gmra.mxu0 %v3462_v2  ;;  %3954 = vmatmul.mubr.f32.gmra.mxu1 %v3504_v50 }
 0x556   :  { %4457 = vmatprep.mubr.msk.f32.mxu0 %vm3536_vm2, %v3465_v24  ;;  %4478 = vmatprep.mubr.msk.f32.mxu1 %vm3536_vm2, %v3507_v33 }
 0x559   :  { %3854 = vmatmul.mubr.f32.gmra.mxu0 %v3464_v32  ;;  %3959 = vmatmul.mubr.f32.gmra.mxu1 %v3506_v60 }
 0x55a   :  { %4458 = vmatprep.mubr.msk.f32.mxu0 %vm3536_vm2, %v3467_v18  ;;  %4479 = vmatprep.mubr.msk.f32.mxu1 %vm3536_vm2, %v3509_v51 }
 0x55d   :  { %3859 = vmatmul.mubr.f32.gmra.mxu0 %v3466_v37  ;;  %3964 = vmatmul.mubr.f32.gmra.mxu1 %v3508_v11 }
 0x55e   :  { %4459 = vmatprep.mubr.msk.f32.mxu0 %vm3536_vm2, %v3469_v57  ;;  %4480 = vmatprep.mubr.msk.f32.mxu1 %vm3536_vm2, %v3511_v20 }
 0x561   :  { %3864 = vmatmul.mubr.f32.gmra.mxu0 %v3468_v49  ;;  %3969 = vmatmul.mubr.f32.gmra.mxu1 %v3510_v26 }
 0x562   :  { %4481 = vmatprep.mubr.msk.f32.mxu1 %vm3536_vm2, %v3513_v58 }
 0x565   :  { %3974 = vmatmul.mubr.f32.gmra.mxu1 %v3512_v22 }
 0x566   :  { %4482 = vmatprep.mubr.msk.f32.mxu1 %vm3536_vm2, %v3515_v61 }
 0x569   :  { %3979 = vmatmul.mubr.f32.gmra.mxu1 %v3514_v34 }
 0x56a   :  { %4483 = vmatprep.mubr.msk.f32.mxu1 %vm3536_vm2, %v3517_v29 }
 0x56d   :  { %3984 = vmatmul.mubr.f32.gmra.mxu1 %v3516_v46 }
 0x56e   :  { %4484 = vmatprep.mubr.msk.f32.mxu1 %vm3536_vm2, %v3519_v47 }
 0x571   :  { %3989 = vmatmul.mubr.f32.gmra.mxu1 %v3518_v63 }
 0x572   :  { %4485 = vmatprep.mubr.msk.f32.mxu1 %vm3536_vm2, %v3521_v53 }
 0x575   :  { %3994 = vmatmul.mubr.f32.gmra.mxu1 %v3520_v43 }
 0x576   :  { %4486 = vmatprep.mubr.msk.f32.mxu1 %vm3536_vm2, %v3523_v1 }
 0x579   :  { %3999 = vmatmul.mubr.f32.gmra.mxu1 %v3522_v7 }
 0x57a   :  { %4487 = vmatprep.mubr.msk.f32.mxu1 %vm3536_vm2, %v3525_v8 }
 0x57d   :  { %4004 = vmatmul.mubr.f32.gmra.mxu1 %v3524_v13 }
 0x57e   :  { %4488 = vmatprep.mubr.msk.f32.mxu1 %vm3536_vm2, %v3527_v44 }
 0x581   :  { %4009 = vmatmul.mubr.f32.gmra.mxu1 %v3526_v42 }
 0x582   :  { %4489 = vmatprep.mubr.msk.f32.mxu1 %vm3536_vm2, %v3529_v14 }
 0x585   :  { %4014 = vmatmul.mubr.f32.gmra.mxu1 %v3528_v3 }
 0x586   :  { %4490 = vmatprep.mubr.msk.f32.mxu1 %vm3536_vm2, %v3531_v35 }
 0x589   :  { %4019 = vmatmul.mubr.f32.gmra.mxu1 %v3530_v28 }
 0x58a   :  { %4491 = vmatprep.mubr.msk.f32.mxu1 %vm3536_vm2, %v3533_v59 }
 0x58d   :  { %4024 = vmatmul.mubr.f32.gmra.mxu1 %v3532_v56 }
 0x58e   :  { %4492 = vmatprep.mubr.msk.f32.mxu1 %vm3536_vm2, %v3535_v23  ;;  %vm4263_vm2 = vcmask 392192  }
 0x591   :  { %4029 = vmatmul.mubr.f32.gmra.mxu1 %v3534_v27 }
 0x5d1   :  { %v3765_v25 = vpop.f32.mrf.mxu0  ;;  %v3870_v41 = vpop.f32.mrf.mxu1 }
 0x5d2   :  { %4202 = vrot.lane.b32.xlu0 %v3870_v41, %s4707_s16  ;;  %4061 = vrot.lane.b32.xlu1 %v3765_v25, %s4708_s1  ;;  %v4034_v25 = vlaneseq }
 0x5d3   :  { %v3767_v12 = vpop.f32.mrf.mxu0  ;;  %v3872_v45 = vpop.f32.mrf.mxu1 }
 0x5d5   :  { %v3770_v16 = vpop.f32.mrf.mxu0  ;;  %v3875_v55 = vpop.f32.mrf.mxu1 }
 0x5d6   :  { %4204 = vrot.lane.b32.xlu1 %v3875_v55, %s4707_s16  ;;  %4063 = vrot.lane.b32.xlu0 %v3770_v16, %s4708_s1  ;;  %v4035_v55 = vand.u32 127, %v4034_v25 }
 0x5d7   :  { %v3772_v19 = vpop.f32.mrf.mxu0  ;;  %v3877_v10 = vpop.f32.mrf.mxu1 }
 0x5d9   :  { %v3775_v39 = vpop.f32.mrf.mxu0  ;;  %v3880_v36 = vpop.f32.mrf.mxu1 }
 0x5da   :  { %4206 = vrot.lane.b32.xlu0 %v3880_v36, %s4707_s16  ;;  %4065 = vrot.lane.b32.xlu1 %v3775_v39, %s4708_s1 }
 0x5db   :  { %v3777_v31 = vpop.f32.mrf.mxu0  ;;  %v3882_v40 = vpop.f32.mrf.mxu1 }
 0x5dc   :  { %v8378_v31 = vmul.u32.u64.low 2454267026, %v4035_v55  ;;  %v8379_v40 = vmul.u32.u64.high 2454267026, %v4035_v55, %v8378_v31 }
 0x5dd   :  { %v3780_v48 = vpop.f32.mrf.mxu0  ;;  %v8345_v9 = vpop.f32.mrf.mxu1 }
 0x5de   :  { %4067 = vrot.lane.b32.xlu0 %v3780_v48, %s4708_s1  ;;  %vm4042_vm3 = vc.u32 %v8378_v31, 2454267026 }
 0x5df   :  { %v3782_v54 = vpop.f32.mrf.mxu0  ;;  %v3887_v0 = vpop.f32.mrf.mxu1 }
 0x5e1   :  { %v3785_v15 = vpop.f32.mrf.mxu0  ;;  %v8347_v38 = vpop.f32.mrf.mxu1 }
 0x5e2   :  { %4069 = vrot.lane.b32.xlu1 %v3785_v15, %s4708_s1 }
 0x5e3   :  { %v3787_v30 = vpop.f32.mrf.mxu0  ;;  %v3892_v62 = vpop.f32.mrf.mxu1 }
 0x5e5   :  { %v3790_v6 = vpop.f32.mrf.mxu0  ;;  %v8349_v4 = vpop.f32.mrf.mxu1 }
 0x5e6   :  { %4071 = vrot.lane.b32.xlu0 %v3790_v6, %s4708_s1 }
 0x5e7   :  { %v3792_v52 = vpop.f32.mrf.mxu0  ;;  %v3897_v21 = vpop.f32.mrf.mxu1 }
 0x5e8   :  { %v8651_v21 = vmov 0  }
 0x5e9   :  { %v3795_v17 = vpop.f32.mrf.mxu0  ;;  %v8351_v5 = vpop.f32.mrf.mxu1 }
 0x5ea   :  { %4110 = vrot.lane.b32.xlu1 %v3795_v17, %s4709_s4  ;;  %v4043_v17 = vsel %vm4042_vm3, 1, %v8651_v21  ;;  %vm4306_vm3 = vcmask 351232  }
 0x5eb   :  { %v3797_v2 = vpop.f32.mrf.mxu0  ;;  %v3902_v50 = vpop.f32.mrf.mxu1 }
 0x5ed   :  { %v3800_v24 = vpop.f32.mrf.mxu0  ;;  %v8354_v33 = vpop.f32.mrf.mxu1 }
 0x5ee   :  { %4112 = vrot.lane.b32.xlu0 %v3800_v24, %s4709_s4  ;;  %v4044_v24 = vadd.s32 %v8379_v40, %v4043_v17 }
 0x5ef   :  { %v3802_v32 = vpop.f32.mrf.mxu0  ;;  %v3907_v60 = vpop.f32.mrf.mxu1 }
 0x5f1   :  { %v3805_v18 = vpop.f32.mrf.mxu0  ;;  %v8357_v51 = vpop.f32.mrf.mxu1 }
 0x5f2   :  { %4114 = vrot.lane.b32.xlu1 %v3805_v18, %s4709_s4 }
 0x5f3   :  { %v3807_v37 = vpop.f32.mrf.mxu0  ;;  %v3912_v11 = vpop.f32.mrf.mxu1 }
 0x5f4   :  { %v4045_v37 = vshrl.u32 %v4044_v24, 2 }
 0x5f5   :  { %v3810_v57 = vpop.f32.mrf.mxu0  ;;  %v3915_v20 = vpop.f32.mrf.mxu1 }
 0x5f6   :  { %4245 = vrot.lane.b32.xlu1 %v3915_v20, %s4710_s17  ;;  %4116 = vrot.lane.b32.xlu0 %v3810_v57, %s4709_s4  ;;  %v4046_v20 = vmul.u32 7, %v4045_v37 }
 0x5f7   :  { %v3812_v49 = vpop.f32.mrf.mxu0  ;;  %v3917_v26 = vpop.f32.mrf.mxu1 }
 0x5f9   :  { %v3815_v58 = vpop.f32.mrf.mxu0  ;;  %v3920_v22 = vpop.f32.mrf.mxu1 }
 0x5fa   :  { %4247 = vrot.lane.b32.xlu0 %v3920_v22, %s4710_s17  ;;  %4118 = vrot.lane.b32.xlu1 %v3815_v58, %s4709_s4  ;;  %v4047_v58 = vsub.s32 %v4035_v55, %v4046_v20 }
 0x5fb   :  { %v3817_v61 = vpop.f32.mrf.mxu0  ;;  %v3922_v34 = vpop.f32.mrf.mxu1 }
 0x5fc   :  { %vm4050_vm4 = vcmp.ne.s32.totalorder %v4047_v58, 0  ;;  %vm4051_vm5 = vcmp.lt.s32.totalorder %v4047_v58, 0 }
 0x5fd   :  { %v3820_v29 = vpop.f32.mrf.mxu0  ;;  %v3925_v46 = vpop.f32.mrf.mxu1  ;;  %vm4052_vm6 = vmand %vm4051_vm5, %vm4050_vm4  ;;  %vm4349_vm4 = vcmask 343040   ;;  %vm4386_vm5 = vcmask 334848  }
 0x5fe   :  { %4249 = vrot.lane.b32.xlu1 %v3925_v46, %s4710_s17  ;;  %4120 = vrot.lane.b32.xlu0 %v3820_v29, %s4709_s4  ;;  %v4053_v46 = vadd.s32 7, %v4047_v58 }
 0x5ff   :  { %v3822_v47 = vpop.f32.mrf.mxu0  ;;  %v3927_v63 = vpop.f32.mrf.mxu1 }
 0x601   :  { %v3825_v53 = vpop.f32.mrf.mxu0  ;;  %v3930_v43 = vpop.f32.mrf.mxu1 }
 0x602   :  { %4251 = vrot.lane.b32.xlu0 %v3930_v43, %s4710_s17  ;;  %4147 = vrot.lane.b32.xlu1 %v3825_v53, %s4711_s18  ;;  %v4054_v53 = vsel %vm4052_vm6, %v4053_v46, %v4047_v58 }
 0x603   :  { %v3827_v1 = vpop.f32.mrf.mxu0  ;;  %v3932_v7 = vpop.f32.mrf.mxu1  ;;  %v4172_v58 = vadd.s32 1, %v4054_v53 }
 0x604   :  { %v4086_v1 = vadd.s32 4294967295, %v4054_v53 }
 0x605   :  { %v3830_v8 = vpop.f32.mrf.mxu0  ;;  %v3935_v13 = vpop.f32.mrf.mxu1  ;;  %vm4173_vm13 = vcmp.ge.s32.totalorder %v4172_v58, 0  ;;  %vm4174_vm14 = vcmp.lt.s32.totalorder %v4172_v58, 7 }
 0x606   :  { %4253 = vrot.lane.b32.xlu1 %v3935_v13, %s4710_s17  ;;  %4149 = vrot.lane.b32.xlu0 %v3830_v8, %s4711_s18  ;;  %vm4087_vm7 = vcmp.ge.s32.totalorder %v4086_v1, 0  ;;  %vm4088_vm8 = vcmp.lt.s32.totalorder %v4086_v1, 7  ;;  %vm8442_vm0 = vmand %vm4173_vm13, %vm4174_vm14 }
 0x607   :  { %v3832_v44 = vpop.f32.mrf.mxu0  ;;  %v3937_v42 = vpop.f32.mrf.mxu1  ;;  %vm8391_vm11 = vmand %vm4087_vm7, %vm4088_vm8 }
 0x609   :  { %v3835_v14 = vpop.f32.mrf.mxu0  ;;  %v3940_v3 = vpop.f32.mrf.mxu1 }
 0x60a   :  { %4255 = vrot.lane.b32.xlu0 %v3940_v3, %s4710_s17  ;;  %4151 = vrot.lane.b32.xlu1 %v3835_v14, %s4711_s18 }
 0x60b   :  { %v3837_v35 = vpop.f32.mrf.mxu0  ;;  %v3942_v28 = vpop.f32.mrf.mxu1 }
 0x60d   :  { %v3840_v59 = vpop.f32.mrf.mxu0  ;;  %v3945_v56 = vpop.f32.mrf.mxu1 }
 0x60e   :  { %4288 = vrot.lane.b32.xlu1 %v3945_v56, %s4712_s2  ;;  %4153 = vrot.lane.b32.xlu0 %v3840_v59, %s4711_s18 }
 0x60f   :  { %v3842_v23 = vpop.f32.mrf.mxu0  ;;  %v3947_v27 = vpop.f32.mrf.mxu1 }
 0x611   :  { %v3845_v41 = vpop.f32.mrf.mxu0  ;;  %v3950_v12 = vpop.f32.mrf.mxu1 }
 0x612   :  { %4290 = vrot.lane.b32.xlu0 %v3950_v12, %s4712_s2  ;;  %4155 = vrot.lane.b32.xlu1 %v3845_v41, %s4711_s18 }
 0x613   :  { %v3847_v45 = vpop.f32.mrf.mxu0  ;;  %v3952_v16 = vpop.f32.mrf.mxu1 }
 0x615   :  { %v3850_v19 = vpop.f32.mrf.mxu0  ;;  %v3955_v10 = vpop.f32.mrf.mxu1 }
 0x616   :  { %4292 = vrot.lane.b32.xlu1 %v3955_v10, %s4712_s2  ;;  %4157 = vrot.lane.b32.xlu0 %v3850_v19, %s4711_s18 }
 0x617   :  { %v3852_v39 = vpop.f32.mrf.mxu0  ;;  %v3957_v36 = vpop.f32.mrf.mxu1 }
 0x619   :  { %v3855_v48 = vpop.f32.mrf.mxu0  ;;  %v3960_v54 = vpop.f32.mrf.mxu1 }
 0x61a   :  { %4294 = vrot.lane.b32.xlu0 %v3960_v54, %s4712_s2  ;;  %4196 = vrot.lane.b32.xlu1 %v3855_v48, %s4707_s16 }
 0x61b   :  { %v3857_v0 = vpop.f32.mrf.mxu0  ;;  %v3962_v15 = vpop.f32.mrf.mxu1 }
 0x61d   :  { %v3860_v30 = vpop.f32.mrf.mxu0  ;;  %v3965_v62 = vpop.f32.mrf.mxu1 }
 0x61e   :  { %4296 = vrot.lane.b32.xlu1 %v3965_v62, %s4712_s2  ;;  %4198 = vrot.lane.b32.xlu0 %v3860_v30, %s4707_s16 }
 0x61f   :  { %v3862_v6 = vpop.f32.mrf.mxu0  ;;  %v3967_v52 = vpop.f32.mrf.mxu1 }
 0x621   :  { %v3865_v2 = vpop.f32.mrf.mxu0  ;;  %v3970_v50 = vpop.f32.mrf.mxu1 }
 0x622   :  { %4298 = vrot.lane.b32.xlu0 %v3970_v50, %s4712_s2  ;;  %4200 = vrot.lane.b32.xlu1 %v3865_v2, %s4707_s16 }
 0x623   :  { %v3972_v32 = vpop.f32.mrf.mxu1  ;;  %v3867_v60 = vpop.f32.mrf.mxu0 }
 0x625   :  { %v3975_v18 = vpop.f32.mrf.mxu1 }
 0x626   :  { %4331 = vrot.lane.b32.xlu1 %v3975_v18, %s4713_s19 }
 0x627   :  { %v3977_v11 = vpop.f32.mrf.mxu1 }
 0x629   :  { %v3980_v57 = vpop.f32.mrf.mxu1 }
 0x62a   :  { %4333 = vrot.lane.b32.xlu0 %v3980_v57, %s4713_s19 }
 0x62b   :  { %v3982_v49 = vpop.f32.mrf.mxu1 }
 0x62d   :  { %v3985_v26 = vpop.f32.mrf.mxu1 }
 0x62e   :  { %4335 = vrot.lane.b32.xlu1 %v3985_v26, %s4713_s19 }
 0x62f   :  { %v3987_v22 = vpop.f32.mrf.mxu1 }
 0x631   :  { %v3990_v61 = vpop.f32.mrf.mxu1 }
 0x632   :  { %4337 = vrot.lane.b32.xlu0 %v3990_v61, %s4713_s19 }
 0x633   :  { %v3992_v34 = vpop.f32.mrf.mxu1 }
 0x635   :  { %v3995_v29 = vpop.f32.mrf.mxu1 }
 0x636   :  { %4339 = vrot.lane.b32.xlu1 %v3995_v29, %s4713_s19 }
 0x637   :  { %v3997_v47 = vpop.f32.mrf.mxu1 }
 0x639   :  { %v4000_v63 = vpop.f32.mrf.mxu1 }
 0x63a   :  { %4341 = vrot.lane.b32.xlu0 %v4000_v63, %s4713_s19 }
 0x63b   :  { %v4002_v43 = vpop.f32.mrf.mxu1 }
 0x63d   :  { %v4005_v7 = vpop.f32.mrf.mxu1 }
 0x63e   :  { %4368 = vrot.lane.b32.xlu1 %v4005_v7, %s4714_s20 }
 0x63f   :  { %v4007_v8 = vpop.f32.mrf.mxu1 }
 0x641   :  { %v4010_v13 = vpop.f32.mrf.mxu1 }
 0x642   :  { %4370 = vrot.lane.b32.xlu0 %v4010_v13, %s4714_s20 }
 0x643   :  { %v4012_v44 = vpop.f32.mrf.mxu1 }
 0x644   :  { %v4203_v14 = vpop.permute.xlu0 %4202  ;;  %v4062_v3 = vpop.permute.xlu1 %4061 }
 0x645   :  { %v4015_v35 = vpop.f32.mrf.mxu1  ;;  %v8396_v28 = vsel %vm4214_vm9, 0.0, %v4203_v14  ;;  %v4080_v59 = vsel %vm4079_vm10, 0.0, %v4062_v3 }
 0x646   :  { %4372 = vrot.lane.b32.xlu1 %v4015_v35, %s4714_s20  ;;  %v4224_v56 = vsel %vm8391_vm11, %v8396_v28, 0.0  ;;  %v4092_v23 = vsel %vm8391_vm11, %v4080_v59, 0.0 }
 0x647   :  { %v4017_v27 = vpop.f32.mrf.mxu1 }
 0x648   :  { %v4205_v25 = vpop.permute.xlu1 %4204  ;;  %v4064_v41 = vpop.permute.xlu0 %4063 }
 0x649   :  { %v4020_v12 = vpop.f32.mrf.mxu1  ;;  %v8406_v45 = vsel %vm4214_vm9, 0.0, %v4205_v25  ;;  %v4081_v16 = vsel %vm4079_vm10, 0.0, %v4064_v41 }
 0x64a   :  { %4374 = vrot.lane.b32.xlu0 %v4020_v12, %s4714_s20  ;;  %v4225_v55 = vsel %vm8391_vm11, %v8406_v45, 0.0  ;;  %v4093_v19 = vsel %vm8391_vm11, %v4081_v16, 0.0 }
 0x64b   :  { %v4022_v10 = vpop.f32.mrf.mxu1 }
 0x64c   :  { %v4207_v39 = vpop.permute.xlu0 %4206  ;;  %v4066_v36 = vpop.permute.xlu1 %4065 }
 0x64d   :  { %v4025_v31 = vpop.f32.mrf.mxu1  ;;  %v8416_v40 = vsel %vm4214_vm9, 0.0, %v4207_v39  ;;  %v4082_v48 = vsel %vm4079_vm10, 0.0, %v4066_v36 }
 0x64e   :  { %4376 = vrot.lane.b32.xlu1 %v4025_v31, %s4714_s20  ;;  %v4226_v54 = vsel %vm8391_vm11, %v8416_v40, 0.0  ;;  %v4094_v0 = vsel %vm8391_vm11, %v4082_v48, 0.0 }
 0x64f   :  { %v4027_v15 = vpop.f32.mrf.mxu1 }
 0x650   :  { %v4068_v30 = vpop.permute.xlu0 %4067 }
 0x651   :  { %v4030_v62 = vpop.f32.mrf.mxu1  ;;  %v4083_v6 = vsel %vm4079_vm10, 0.0, %v4068_v30 }
 0x652   :  { %4378 = vrot.lane.b32.xlu0 %v4030_v62, %s4714_s20  ;;  %v4095_v52 = vsel %vm8391_vm11, %v4083_v6, 0.0 }
 0x653   :  { %v4032_v21 = vpop.f32.mrf.mxu1 }
 0x654   :  { %v4070_v17 = vpop.permute.xlu1 %4069 }
 0x655   :  { %v4084_v2 = vsel %vm4079_vm10, 0.0, %v4070_v17 }
 0x656   :  { %v4096_v50 = vsel %vm8391_vm11, %v4084_v2, 0.0 }
 0x658   :  { %v4072_v24 = vpop.permute.xlu0 %4071 }
 0x659   :  { %v4085_v32 = vsel %vm4079_vm10, 0.0, %v4072_v24 }
 0x65a   :  { %v4097_v60 = vsel %vm8391_vm11, %v4085_v32, 0.0 }
 0x65c   :  { %v4111_v18 = vpop.permute.xlu1 %4110 }
 0x65d   :  { %v4129_v34 = vsel %vm4128_vm12, 0.0, %v4111_v18 }
 0x65e   :  { %v4135_v47 = vadd.f32 %v4129_v34, %v4092_v23 }
 0x660   :  { %v4113_v37 = vpop.permute.xlu0 %4112 }
 0x661   :  { %v4130_v53 = vsel %vm4128_vm12, 0.0, %v4113_v37 }
 0x662   :  { %v4136_v44 = vadd.f32 %v4130_v53, %v4093_v19 }
 0x664   :  { %v4115_v11 = vpop.permute.xlu1 %4114 }
 0x665   :  { %v4131_v3 = vsel %vm4128_vm12, 0.0, %v4115_v11 }
 0x666   :  { %v4137_v25 = vadd.f32 %v4131_v3, %v4094_v0 }
 0x668   :  { %v8435_v57 = vpop.permute.xlu1 %4245  ;;  %v4117_v20 = vpop.permute.xlu0 %4116 }
 0x669   :  { %v4132_v12 = vsel %vm4128_vm12, 0.0, %v4117_v20 }
 0x66a   :  { %v4138_v36 = vadd.f32 %v4132_v12, %v4095_v52 }
 0x66c   :  { %v8437_v49 = vpop.permute.xlu0 %4247  ;;  %v4119_v26 = vpop.permute.xlu1 %4118 }
 0x66d   :  { %v4133_v31 = vsel %vm4128_vm12, 0.0, %v4119_v26  ;;  %v4265_v12 = vsel %vm4263_vm2, %v8437_v49, 0.0 }
 0x66e   :  { %v4139_v30 = vadd.f32 %v4133_v31, %v4096_v50  ;;  %v4271_v49 = vsel %vm8442_vm0, %v4265_v12, 0.0 }
 0x670   :  { %v8439_v22 = vpop.permute.xlu1 %4249  ;;  %v4121_v61 = vpop.permute.xlu0 %4120 }
 0x671   :  { %v4134_v21 = vsel %vm4128_vm12, 0.0, %v4121_v61 }
 0x672   :  { %v4140_v50 = vadd.f32 %v4134_v21, %v4097_v60 }
 0x674   :  { %v4252_v29 = vpop.permute.xlu0 %4251  ;;  %v4148_v46 = vpop.permute.xlu1 %4147 }
 0x675   :  { %v4166_v43 = vsel %vm4165_vm15, 0.0, %v4148_v46  ;;  %v4267_v17 = vsel %vm4263_vm2, %v4252_v29, 0.0 }
 0x676   :  { %v4178_v1 = vsel %vm8442_vm0, %v4166_v43, 0.0  ;;  %v4273_v37 = vsel %vm8442_vm0, %v4267_v17, 0.0 }
 0x677   :  { %v4184_v7 = vadd.f32 %v4178_v1, %v4135_v47 }
 0x678   :  { %v4254_v8 = vpop.permute.xlu1 %4253  ;;  %v4150_v13 = vpop.permute.xlu0 %4149 }
 0x679   :  { %v4167_v14 = vsel %vm4165_vm15, 0.0, %v4150_v13  ;;  %v4268_v26 = vsel %vm4263_vm2, %v4254_v8, 0.0  ;;  %v4264_v8 = vsel %vm4263_vm2, %v8435_v57, 0.0 }
 0x67a   :  { %v4179_v35 = vsel %vm8442_vm0, %v4167_v14, 0.0  ;;  %v4274_v34 = vsel %vm8442_vm0, %v4268_v26, 0.0  ;;  %v4270_v57 = vsel %vm8442_vm0, %v4264_v8, 0.0 }
 0x67b   :  { %v8454_v59 = vadd.f32 %v4179_v35, %v4136_v44 }
 0x67c   :  { %v4256_v23 = vpop.permute.xlu0 %4255  ;;  %v4152_v27 = vpop.permute.xlu1 %4151 }
 0x67d   :  { %v4168_v41 = vsel %vm4165_vm15, 0.0, %v4152_v27  ;;  %v4269_v29 = vsel %vm4263_vm2, %v4256_v23, 0.0 }
 0x67e   :  { %v4180_v16 = vsel %vm8442_vm0, %v4168_v41, 0.0 }
 0x67f   :  { %v8460_v19 = vadd.f32 %v4180_v16, %v4137_v25 }
 0x680   :  { %v4289_v10 = vpop.permute.xlu1 %4288  ;;  %v4154_v39 = vpop.permute.xlu0 %4153 }
 0x681   :  { %v4169_v48 = vsel %vm4165_vm15, 0.0, %v4154_v39  ;;  %v4307_v14 = vsel %vm4306_vm3, %v4289_v10, 0.0 }
 0x682   :  { %v4181_v15 = vsel %vm8442_vm0, %v4169_v48, 0.0  ;;  %v4313_v39 = vsel %vm8391_vm11, %v4307_v14, 0.0 }
 0x683   :  { %v4187_v0 = vadd.f32 %v4181_v15, %v4138_v36 }
 0x684   :  { %v4291_v62 = vpop.permute.xlu0 %4290  ;;  %v4156_v6 = vpop.permute.xlu1 %4155 }
 0x685   :  { %v4230_v52 = vadd.f32 %v4224_v56, %v4187_v0  ;;  %v4170_v2 = vsel %vm4165_vm15, 0.0, %v4156_v6  ;;  %v4308_v36 = vsel %vm4306_vm3, %v4291_v62, 0.0  ;;  %v4266_v62 = vsel %vm4263_vm2, %v8439_v22, 0.0 }
 0x686   :  { %v4182_v24 = vsel %vm8442_vm0, %v4170_v2, 0.0  ;;  %v4314_v2 = vsel %vm8391_vm11, %v4308_v36, 0.0 }
 0x687   :  { %v4188_v32 = vadd.f32 %v4182_v24, %v4139_v30  ;;  %v4236_v18 = vadd.f32 %v4230_v52, %v8351_v5 }
 0x688   :  { %v4293_v11 = vpop.permute.xlu1 %4292  ;;  %v4158_v20 = vpop.permute.xlu0 %4157 }
 0x689   :  { %v4231_v28 = vadd.f32 %v4225_v55, %v4188_v32  ;;  %v4171_v56 = vsel %vm4165_vm15, 0.0, %v4158_v20  ;;  %v4279_v58 = vadd.f32 %v4273_v37, %v4236_v18  ;;  %v4309_v24 = vsel %vm4306_vm3, %v4293_v11, 0.0 }
 0x68a   :  { %v4183_v61 = vsel %vm8442_vm0, %v4171_v56, 0.0  ;;  %v4315_v20 = vsel %vm8391_vm11, %v4309_v24, 0.0 }
 0x68b   :  { %v4189_v5 = vadd.f32 %v4183_v61, %v4140_v50  ;;  %v4237_v60 = vadd.f32 %v4231_v28, %v8354_v33  ;;  %v4272_v50 = vsel %vm8442_vm0, %v4266_v62, 0.0 }
 0x68c   :  { %v4295_v46 = vpop.permute.xlu0 %4294  ;;  %v4197_v47 = vpop.permute.xlu1 %4196 }
 0x68d   :  { %v4232_v45 = vadd.f32 %v4226_v54, %v4189_v5  ;;  %v4310_v55 = vsel %vm4306_vm3, %v4295_v46, 0.0  ;;  %v4215_v43 = vsel %vm4214_vm9, 0.0, %v4197_v47  ;;  %v4280_v53 = vadd.f32 %v4274_v34, %v4237_v60 }
 0x68e   :  { %v4316_v33 = vsel %vm8391_vm11, %v4310_v55, 0.0  ;;  %v4221_v1 = vsel %vm8391_vm11, %v4215_v43, 0.0  ;;  %v4275_v54 = vsel %vm8442_vm0, %v4269_v29, 0.0 }
 0x68f   :  { %v8502_v13 = vadd.f32 %v4316_v33, %v4279_v58  ;;  %v4227_v44 = vadd.f32 %v4221_v1, %v4184_v7  ;;  %v4238_v40 = vadd.f32 %v4232_v45, %v8357_v51 }
 0x690   :  { %v4297_v3 = vpop.permute.xlu1 %4296  ;;  %v4199_v35 = vpop.permute.xlu0 %4198 }
 0x691   :  { %v4233_v23 = vadd.f32 %v4227_v44, %v8345_v9  ;;  %v4311_v27 = vsel %vm4306_vm3, %v4297_v3, 0.0  ;;  %v4216_v25 = vsel %vm4214_vm9, 0.0, %v4199_v35  ;;  %v4281_v41 = vadd.f32 %v4275_v54, %v4238_v40 }
 0x692   :  { %v4317_v51 = vsel %vm8391_vm11, %v4311_v27, 0.0  ;;  %v4222_v7 = vsel %vm8391_vm11, %v4216_v25, 0.0 }
 0x693   :  { %v8519_v16 = vadd.f32 %v4317_v51, %v4280_v53  ;;  %v4228_v9 = vadd.f32 %v4222_v7, %v8454_v59  ;;  %v4276_v10 = vadd.f32 %v4270_v57, %v4233_v23 }
 0x694   :  { %v4299_v31 = vpop.permute.xlu0 %4298  ;;  %v4201_v48 = vpop.permute.xlu1 %4200 }
 0x695   :  { %v4234_v15 = vadd.f32 %v4228_v9, %v8347_v38  ;;  %v4312_v0 = vsel %vm4306_vm3, %v4299_v31, 0.0  ;;  %v4217_v30 = vsel %vm4214_vm9, 0.0, %v4201_v48  ;;  %v4319_v6 = vadd.f32 %v4313_v39, %v4276_v10 }
 0x696   :  { %v4318_v59 = vsel %vm8391_vm11, %v4312_v0, 0.0  ;;  %v4223_v21 = vsel %vm8391_vm11, %v4217_v30, 0.0 }
 0x697   :  { %v4324_v17 = vadd.f32 %v4318_v59, %v4281_v41  ;;  %v4229_v38 = vadd.f32 %v4223_v21, %v8460_v19  ;;  %v4277_v52 = vadd.f32 %v4271_v49, %v4234_v15 }
 0x698   :  { %v4332_v26 = vpop.permute.xlu1 %4331 }
 0x699   :  { %v4235_v32 = vadd.f32 %v4229_v38, %v8349_v4  ;;  %v4320_v18 = vadd.f32 %v4314_v2, %v4277_v52  ;;  %v4350_v61 = vsel %vm4349_vm4, %v4332_v26, 0.0 }
 0x69a   :  { %v4356_v5 = vadd.f32 %v4350_v61, %v4319_v6 }
 0x69b   :  { %v4278_v37 = vadd.f32 %v4272_v50, %v4235_v32 }
 0x69c   :  { %v4334_v28 = vpop.permute.xlu0 %4333 }
 0x69d   :  { %v4321_v22 = vadd.f32 %v4315_v20, %v4278_v37  ;;  %v4351_v34 = vsel %vm4349_vm4, %v4334_v28, 0.0 }
 0x69e   :  { %v4357_v47 = vadd.f32 %v4351_v34, %v4320_v18 }
 0x6a0   :  { %v4336_v19 = vpop.permute.xlu1 %4335 }
 0x6a1   :  { %v4352_v55 = vsel %vm4349_vm4, %v4336_v19, 0.0 }
 0x6a2   :  { %v4358_v1 = vadd.f32 %v4352_v55, %v4321_v22 }
 0x6a4   :  { %v4338_v56 = vpop.permute.xlu0 %4337 }
 0x6a5   :  { %v4353_v44 = vsel %vm4349_vm4, %v4338_v56, 0.0 }
 0x6a6   :  { %v4359_v3 = vadd.f32 %v4353_v44, %v8502_v13 }
 0x6a8   :  { %v4340_v58 = vpop.permute.xlu1 %4339 }
 0x6a9   :  { %v4354_v23 = vsel %vm4349_vm4, %v4340_v58, 0.0 }
 0x6aa   :  { %v4360_v57 = vadd.f32 %v4354_v23, %v8519_v16 }
 0x6ac   :  { %v4342_v11 = vpop.permute.xlu0 %4341 }
 0x6ad   :  { %v4355_v51 = vsel %vm4349_vm4, %v4342_v11, 0.0 }
 0x6ae   :  { %v4361_v10 = vadd.f32 %v4355_v51, %v4324_v17 }
 0x6b0   :  { %v4369_v4 = vpop.permute.xlu1 %4368 }
 0x6b1   :  { %v4387_v60 = vsel %vm4386_vm5, %v4369_v4, 0.0 }
 0x6b2   :  { %v4393_v42 = vsel %vm8442_vm0, %v4387_v60, 0.0 }
 0x6b3   :  { %v4399_v29 = vadd.f32 %v4393_v42, %v4356_v5 }
 0x6b4   :  { %v4371_v46 = vpop.permute.xlu0 %4370 }
 0x6b5   :  { %4405 = vst.msk [vmem:[%s8600_s5] sm:$0xff] %vm2706_vm1, %v4399_v29  ;;  %v4388_v45 = vsel %vm4386_vm5, %v4371_v46, 0.0 }
 0x6b6   :  { %v4394_v43 = vsel %vm8442_vm0, %v4388_v45, 0.0 }
 0x6b7   :  { %v4400_v53 = vadd.f32 %v4394_v43, %v4357_v47 }
 0x6b8   :  { %v4373_v33 = vpop.permute.xlu1 %4372 }
 0x6b9   :  { %4406 = vst.msk [vmem:[%s8600_s5 + $0x8] sm:$0xff] %vm2706_vm1, %v4400_v53  ;;  %v4389_v8 = vsel %vm4386_vm5, %v4373_v33, 0.0 }
 0x6ba   :  { %v4395_v40 = vsel %vm8442_vm0, %v4389_v8, 0.0 }
 0x6bb   :  { %v4401_v54 = vadd.f32 %v4395_v40, %v4358_v1 }
 0x6bc   :  { %v4375_v14 = vpop.permute.xlu0 %4374 }
 0x6bd   :  { %4407 = vst.msk [vmem:[%s8600_s5 + $0x10] sm:$0xff] %vm2706_vm1, %v4401_v54  ;;  %v4390_v35 = vsel %vm4386_vm5, %v4375_v14, 0.0 }
 0x6be   :  { %v4396_v27 = vsel %vm8442_vm0, %v4390_v35, 0.0 }
 0x6bf   :  { %v4402_v25 = vadd.f32 %v4396_v27, %v4359_v3 }
 0x6c0   :  { %v4377_v41 = vpop.permute.xlu1 %4376 }
 0x6c1   :  { %4408 = vst.msk [vmem:[%s8600_s5 + $0x18] sm:$0xff] %vm2706_vm1, %v4402_v25  ;;  %v4391_v13 = vsel %vm4386_vm5, %v4377_v41, 0.0 }
 0x6c2   :  { %v4397_v7 = vsel %vm8442_vm0, %v4391_v13, 0.0 }
 0x6c3   :  { %v4403_v12 = vadd.f32 %v4397_v7, %v4360_v57 }
 0x6c4   :  { %v4379_v9 = vpop.permute.xlu0 %4378 }
 0x6c5   :  { %4409 = vst.msk [vmem:[%s8600_s5 + $0x20] sm:$0xff] %vm2706_vm1, %v4403_v12  ;;  %v4392_v16 = vsel %vm4386_vm5, %v4379_v9, 0.0 }
 0x6c6   :  { %v4398_v39 = vsel %vm8442_vm0, %v4392_v16, 0.0 }
 0x6c7   :  { %v4404_v36 = vadd.f32 %v4398_v39, %v4361_v10 }
 0x6c9   :  { %4410 = vst.msk [vmem:[%s8600_s5 + $0x28] sm:$0xff] %vm2706_vm1, %v4404_v36 }

</bundles_post_ra>
